<compile_context>
chip_gen: v7x
topology: tpu7x:2x2x1
jax: 0.10.0
libtpu: 0.0.40
codegen_flags: <defaults>
</compile_context>

<pallas_src>
import functools

import jax
import jax.numpy as jnp
from jax.experimental import pallas as pl
from jax.experimental.pallas import tpu as pltpu


def _round_up(x, m):
    return ((x + m - 1) // m) * m


def _node_embedding_kernel(type_ref, tok_ref, table_ref, out_ref, *,
                           v_type, n_sub, fold):
    """One row-tile of NodeEmbedding.

    type_ref : (tile_f, fold)         int32  node-type ids (`fold` logical rows per line)
    tok_ref  : (tile_f, fold * S)     int32  sub-token ids
    table_ref: (fold, V, fold * C)    float  per-group column-shifted combined tables
    out_ref  : (tile_f, fold * C)     f32    packed output, fold*C >= 128 -> lane-dense store
    """
    tile_f = out_ref.shape[0]
    v_total = table_ref.shape[1]
    mm_dtype = table_ref.dtype

    # Hoisted: one iota reused by every compare (no per-iteration broadcasts).
    col = jax.lax.broadcasted_iota(jnp.int32, (tile_f, v_total), 1)

    acc = jnp.zeros(out_ref.shape, jnp.float32)
    for g in range(fold):
        # Multi-hot counts accumulated in int32; one cast to the matmul dtype below.
        acts = (col == type_ref[:, g:g + 1]).astype(jnp.int32)
        for j in range(n_sub):
            tok = tok_ref[:, g * n_sub + j:g * n_sub + j + 1] + v_type
            acts = acts + (col == tok).astype(jnp.int32)
        # Group-g table slab holds the combined table at columns [g*C, (g+1)*C) and
        # zeros elsewhere, so summing the fold matmuls yields the packed, lane-dense
        # (tile_f, fold*C) output in one unmasked store.
        acc = acc + jnp.dot(acts.astype(mm_dtype), table_ref[g],
                            preferred_element_type=jnp.float32)
    out_ref[...] = acc.astype(out_ref.dtype)


def prepare_node_embedding_table(type_table, token_table, dtype=jnp.float32):
    """Build the folded block-diagonal combined table ONCE (hoisted out of forward).

    Returns (fold, v_type + v_tok, fold * C): group g holds the (V, C) combined table
    at column offset g*C.  fold > 1 only when C < 128, so the kernel output block can
    be >= 128 lanes wide (dense stores).  `dtype=jnp.bfloat16` halves table VMEM /
    DMA bytes (one-hot counts are exact in bf16; the embedding values themselves get
    bf16-rounded -- gate on model tolerance).
    """
    v_type, d = type_table.shape
    v_tok, d2 = token_table.shape
    assert d == d2
    c = 2 * d
    fold = (128 // c) if (c < 128 and 128 % c == 0) else 1

    combined = jnp.zeros((v_type + v_tok, c), dtype)
    combined = combined.at[:v_type, :d].set(type_table.astype(dtype))
    combined = combined.at[v_type:, d:].set(token_table.astype(dtype))

    folded = jnp.zeros((fold, v_type + v_tok, fold * c), dtype)
    for g in range(fold):
        folded = folded.at[g, :, g * c:(g + 1) * c].set(combined)
    return folded


def node_embedding_forward(type_index, sub_token_ids, folded_table, *,
                           num_type_rows, reduce_dim=2, concat_dim=2, row_tile=256):
    """NodeEmbedding.forward(type_index, sub_token_ids, reduce_dim, concat_dim).

    `folded_table` comes from prepare_node_embedding_table (built once at init).
    """
    # TODO(synk): kernel specialised to the reduce_dim=2 / concat_dim=2 call pattern
    # used by the tree layers; other dims fall outside this layout.
    assert reduce_dim == 2 and concat_dim == 2

    B, N = type_index.shape
    S = sub_token_ids.shape[2]
    fold, v_total, fold_c = folded_table.shape
    C = fold_c // fold
    v_type = num_type_rows

    rows = B * N
    # Logical rows per grid step: big tiles amortise the ~0.35us/step pipeline
    # overhead and fill the MXU M dim.  Must stay a multiple of 8*fold so the
    # folded sublane tile remains (8, 128)-aligned.
    unit = 8 * fold
    row_tile = max(unit, (min(row_tile, _round_up(rows, unit)) // unit) * unit)
    rows_p = _round_up(rows, row_tile)
    # v7x has 2 TensorCores: keep >= 2 steps on the "parallel" axis when possible.
    if rows_p // row_tile < 2 and rows > unit:
        row_tile = max(unit, _round_up((rows + 1) // 2, unit))
        rows_p = _round_up(rows, row_tile)
    tile_f = row_tile // fold
    n_steps = rows_p // row_tile

    # Flatten + zero-pad ids (reshape + pad only; no scatter in the forward path).
    # Pad rows use id 0 (padding row -> zero embedding) and are sliced off below.
    type_flat = type_index.reshape(rows).astype(jnp.int32)
    tok_flat = sub_token_ids.reshape(rows, S).astype(jnp.int32)
    pad = rows_p - rows
    if pad:
        type_flat = jnp.pad(type_flat, ((0, pad),))
        tok_flat = jnp.pad(tok_flat, ((0, pad), (0, 0)))
    type_f = type_flat.reshape(rows_p // fold, fold)
    tok_f = tok_flat.reshape(rows_p // fold, fold * S)

    # VMEM budget from actual buffer sizes: double-buffered pipeline tiles plus
    # compiler-scratch headroom, capped well below v7x's 64 MiB physical VMEM.
    # (For large vocabs the constant-index table could also be single-buffered
    # via pipeline_mode=pl.Buffered(1); unnecessary at this table size.)
    itemsize = jnp.dtype(folded_table.dtype).itemsize
    io_bytes = (folded_table.size * itemsize
                + tile_f * fold * 4
                + tile_f * fold * S * 4
                + tile_f * fold_c * 4)
    vmem_limit = int(min(48 << 20, max(16 << 20, 2 * io_bytes + (8 << 20))))

    kernel = functools.partial(_node_embedding_kernel,
                               v_type=v_type, n_sub=S, fold=fold)
    out = pl.pallas_call(
        kernel,
        out_shape=jax.ShapeDtypeStruct((rows_p // fold, fold_c), jnp.float32),
        grid=(n_steps,),
        in_specs=[
            pl.BlockSpec((tile_f, fold), lambda i: (i, 0)),
            pl.BlockSpec((tile_f, fold * S), lambda i: (i, 0)),
            pl.BlockSpec((fold, v_total, fold_c), lambda i: (0, 0, 0)),
        ],
        out_specs=pl.BlockSpec((tile_f, fold_c), lambda i: (i, 0)),
        compiler_params=pltpu.CompilerParams(
            dimension_semantics=("parallel",),
            vmem_limit_bytes=vmem_limit,
        ),
    )(type_f, tok_f, folded_table)

    # (rows_p//fold, fold*C) row-major == (rows_p, C); drop padding rows.
    return out.reshape(rows_p, C)[:rows].reshape(B, N, C)


def node_embedding_ref(type_index, sub_token_ids, type_table, token_table):
    """Pure-JAX reference mirroring the PyTorch module."""
    type_emb = type_table[type_index]                     # (B, N, C/2)
    tok_emb = token_table[sub_token_ids].sum(axis=2)      # (B, N, C/2)
    return jnp.concatenate([type_emb, tok_emb], axis=2)   # (B, N, C)


def init_tables(key, in_channels, vocab_type_size, vocab_token_size):
    d = in_channels // 2
    k_type, k_tok = jax.random.split(key)
    type_table = jax.random.normal(k_type, (vocab_type_size + 1, d), jnp.float32)
    token_table = jax.random.normal(k_tok, (vocab_token_size + 1, d), jnp.float32)
    # padding_idx=0: nn.Embedding zeroes row 0 at init.
    type_table = type_table.at[0].set(0.0)
    token_table = token_table.at[0].set(0.0)
    return type_table, token_table


if __name__ == "__main__":
    config = dict(in_channels=64, vocab_type_size=30, vocab_token_size=100)
    B, N, S = 4, 256, 5          # batch, nodes per graph, sub-tokens per node

    key = jax.random.PRNGKey(0)
    k_tab, k_type, k_tok = jax.random.split(key, 3)
    type_table, token_table = init_tables(
        k_tab, config["in_channels"], config["vocab_type_size"], config["vocab_token_size"])

    # Built once at parameter-init time (hoisted out of the per-call forward path).
    folded_table = prepare_node_embedding_table(type_table, token_table)

    # Ids include 0 (padding) to exercise padding_idx semantics.
    type_index = jax.random.randint(k_type, (B, N), 0, config["vocab_type_size"] + 1)
    sub_token_ids = jax.random.randint(k_tok, (B, N, S), 0, config["vocab_token_size"] + 1)

    fwd = jax.jit(functools.partial(
        node_embedding_forward,
        num_type_rows=config["vocab_type_size"] + 1,
        row_tile=256))
    out = jax.block_until_ready(fwd(type_index, sub_token_ids, folded_table))

    ref = node_embedding_ref(type_index, sub_token_ids, type_table, token_table)

    assert out.shape == (B, N, config["in_channels"]), out.shape
    err = float(jnp.max(jnp.abs(out - ref)))
    assert jnp.allclose(out, ref, atol=1e-5, rtol=1e-5), f"max abs err = {err}"
    print("KERNEL_OK")
</pallas_src>

<mosaic_0001>
module attributes {stable_mosaic.version = 11 : i64} {
  func.func @_node_embedding_kernel(%arg0: i32, %arg1: memref<128x2xi32, #tpu.memory_space<vmem>>, %arg2: memref<128x10xi32, #tpu.memory_space<vmem>>, %arg3: memref<2x132x128xf32, #tpu.memory_space<vmem>>, %arg4: memref<128x128xf32, #tpu.memory_space<vmem>>) attributes {dimension_semantics = [#tpu.dimension_semantics<parallel>], iteration_bounds = array<i64: 4>, scalar_prefetch = 0 : i64, scratch_operands = 0 : i64, tpu.core_type = #tpu.core_type<tc>, window_params = [{transform_indices = @transform_0, window_bounds = array<i64: 128, 2>}, {transform_indices = @transform_1, window_bounds = array<i64: 128, 10>}, {pipeline_mode = #tpu.pipeline_mode<synchronous>, transform_indices = @transform_2, window_bounds = array<i64: 2, 132, 128>}, {transform_indices = @transform_3, window_bounds = array<i64: 128, 128>}]} {
    %0 = tpu.iota {dimensions = array<i32: 1>} : vector<128x132xi32>
    %cst = arith.constant 0.000000e+00 : f32
    %1 = vector.broadcast %cst : f32 to vector<128x128xf32>
    %c0 = arith.constant 0 : index
    %c0_0 = arith.constant 0 : index
    %2 = vector.load %arg1[%c0, %c0_0] : memref<128x2xi32, #tpu.memory_space<vmem>>, vector<128x1xi32>
    %3 = vector.broadcast %2 : vector<128x1xi32> to vector<128x132xi32>
    %4 = arith.cmpi eq, %0, %3 : vector<128x132xi32>
    %5 = arith.extui %4 : vector<128x132xi1> to vector<128x132xi32>
    %c0_1 = arith.constant 0 : index
    %c0_2 = arith.constant 0 : index
    %6 = vector.load %arg2[%c0_1, %c0_2] : memref<128x10xi32, #tpu.memory_space<vmem>>, vector<128x1xi32>
    %c31_i32 = arith.constant 31 : i32
    %7 = vector.broadcast %c31_i32 : i32 to vector<128x1xi32>
    %8 = arith.addi %6, %7 : vector<128x1xi32>
    %9 = vector.broadcast %8 : vector<128x1xi32> to vector<128x132xi32>
    %10 = arith.cmpi eq, %0, %9 : vector<128x132xi32>
    %11 = arith.extui %10 : vector<128x132xi1> to vector<128x132xi32>
    %12 = arith.addi %5, %11 : vector<128x132xi32>
    %c0_3 = arith.constant 0 : index
    %c1 = arith.constant 1 : index
    %13 = vector.load %arg2[%c0_3, %c1] : memref<128x10xi32, #tpu.memory_space<vmem>>, vector<128x1xi32>
    %c31_i32_4 = arith.constant 31 : i32
    %14 = vector.broadcast %c31_i32_4 : i32 to vector<128x1xi32>
    %15 = arith.addi %13, %14 : vector<128x1xi32>
    %16 = vector.broadcast %15 : vector<128x1xi32> to vector<128x132xi32>
    %17 = arith.cmpi eq, %0, %16 : vector<128x132xi32>
    %18 = arith.extui %17 : vector<128x132xi1> to vector<128x132xi32>
    %19 = arith.addi %12, %18 : vector<128x132xi32>
    %c0_5 = arith.constant 0 : index
    %c2 = arith.constant 2 : index
    %20 = vector.load %arg2[%c0_5, %c2] : memref<128x10xi32, #tpu.memory_space<vmem>>, vector<128x1xi32>
    %c31_i32_6 = arith.constant 31 : i32
    %21 = vector.broadcast %c31_i32_6 : i32 to vector<128x1xi32>
    %22 = arith.addi %20, %21 : vector<128x1xi32>
    %23 = vector.broadcast %22 : vector<128x1xi32> to vector<128x132xi32>
    %24 = arith.cmpi eq, %0, %23 : vector<128x132xi32>
    %25 = arith.extui %24 : vector<128x132xi1> to vector<128x132xi32>
    %26 = arith.addi %19, %25 : vector<128x132xi32>
    %c0_7 = arith.constant 0 : index
    %c3 = arith.constant 3 : index
    %27 = vector.load %arg2[%c0_7, %c3] : memref<128x10xi32, #tpu.memory_space<vmem>>, vector<128x1xi32>
    %c31_i32_8 = arith.constant 31 : i32
    %28 = vector.broadcast %c31_i32_8 : i32 to vector<128x1xi32>
    %29 = arith.addi %27, %28 : vector<128x1xi32>
    %30 = vector.broadcast %29 : vector<128x1xi32> to vector<128x132xi32>
    %31 = arith.cmpi eq, %0, %30 : vector<128x132xi32>
    %32 = arith.extui %31 : vector<128x132xi1> to vector<128x132xi32>
    %33 = arith.addi %26, %32 : vector<128x132xi32>
    %c0_9 = arith.constant 0 : index
    %c4 = arith.constant 4 : index
    %34 = vector.load %arg2[%c0_9, %c4] : memref<128x10xi32, #tpu.memory_space<vmem>>, vector<128x1xi32>
    %c31_i32_10 = arith.constant 31 : i32
    %35 = vector.broadcast %c31_i32_10 : i32 to vector<128x1xi32>
    %36 = arith.addi %34, %35 : vector<128x1xi32>
    %37 = vector.broadcast %36 : vector<128x1xi32> to vector<128x132xi32>
    %38 = arith.cmpi eq, %0, %37 : vector<128x132xi32>
    %39 = arith.extui %38 : vector<128x132xi1> to vector<128x132xi32>
    %40 = arith.addi %33, %39 : vector<128x132xi32>
    %41 = arith.sitofp %40 : vector<128x132xi32> to vector<128x132xf32>
    %c0_11 = arith.constant 0 : index
    %c0_12 = arith.constant 0 : index
    %c0_13 = arith.constant 0 : index
    %42 = vector.load %arg3[%c0_11, %c0_12, %c0_13] : memref<2x132x128xf32, #tpu.memory_space<vmem>>, vector<1x132x128xf32>
    %43 = vector.shape_cast %42 : vector<1x132x128xf32> to vector<132x128xf32>
    %cst_14 = arith.constant dense<0.000000e+00> : vector<128x128xf32>
    %44 = tpu.matmul %41, %43, %cst_14 {dimension_numbers = #tpu.dot_dimension_numbers<[1], [0], [0], [1], [0, 0, 1, 1], [], []>} : vector<128x132xf32>, vector<132x128xf32>, vector<128x128xf32> -> vector<128x128xf32>
    %45 = arith.addf %1, %44 : vector<128x128xf32>
    %c0_15 = arith.constant 0 : index
    %c1_16 = arith.constant 1 : index
    %46 = vector.load %arg1[%c0_15, %c1_16] : memref<128x2xi32, #tpu.memory_space<vmem>>, vector<128x1xi32>
    %47 = vector.broadcast %46 : vector<128x1xi32> to vector<128x132xi32>
    %48 = arith.cmpi eq, %0, %47 : vector<128x132xi32>
    %49 = arith.extui %48 : vector<128x132xi1> to vector<128x132xi32>
    %c0_17 = arith.constant 0 : index
    %c5 = arith.constant 5 : index
    %50 = vector.load %arg2[%c0_17, %c5] : memref<128x10xi32, #tpu.memory_space<vmem>>, vector<128x1xi32>
    %c31_i32_18 = arith.constant 31 : i32
    %51 = vector.broadcast %c31_i32_18 : i32 to vector<128x1xi32>
    %52 = arith.addi %50, %51 : vector<128x1xi32>
    %53 = vector.broadcast %52 : vector<128x1xi32> to vector<128x132xi32>
    %54 = arith.cmpi eq, %0, %53 : vector<128x132xi32>
    %55 = arith.extui %54 : vector<128x132xi1> to vector<128x132xi32>
    %56 = arith.addi %49, %55 : vector<128x132xi32>
    %c0_19 = arith.constant 0 : index
    %c6 = arith.constant 6 : index
    %57 = vector.load %arg2[%c0_19, %c6] : memref<128x10xi32, #tpu.memory_space<vmem>>, vector<128x1xi32>
    %c31_i32_20 = arith.constant 31 : i32
    %58 = vector.broadcast %c31_i32_20 : i32 to vector<128x1xi32>
    %59 = arith.addi %57, %58 : vector<128x1xi32>
    %60 = vector.broadcast %59 : vector<128x1xi32> to vector<128x132xi32>
    %61 = arith.cmpi eq, %0, %60 : vector<128x132xi32>
    %62 = arith.extui %61 : vector<128x132xi1> to vector<128x132xi32>
    %63 = arith.addi %56, %62 : vector<128x132xi32>
    %c0_21 = arith.constant 0 : index
    %c7 = arith.constant 7 : index
    %64 = vector.load %arg2[%c0_21, %c7] : memref<128x10xi32, #tpu.memory_space<vmem>>, vector<128x1xi32>
    %c31_i32_22 = arith.constant 31 : i32
    %65 = vector.broadcast %c31_i32_22 : i32 to vector<128x1xi32>
    %66 = arith.addi %64, %65 : vector<128x1xi32>
    %67 = vector.broadcast %66 : vector<128x1xi32> to vector<128x132xi32>
    %68 = arith.cmpi eq, %0, %67 : vector<128x132xi32>
    %69 = arith.extui %68 : vector<128x132xi1> to vector<128x132xi32>
    %70 = arith.addi %63, %69 : vector<128x132xi32>
    %c0_23 = arith.constant 0 : index
    %c8 = arith.constant 8 : index
    %71 = vector.load %arg2[%c0_23, %c8] : memref<128x10xi32, #tpu.memory_space<vmem>>, vector<128x1xi32>
    %c31_i32_24 = arith.constant 31 : i32
    %72 = vector.broadcast %c31_i32_24 : i32 to vector<128x1xi32>
    %73 = arith.addi %71, %72 : vector<128x1xi32>
    %74 = vector.broadcast %73 : vector<128x1xi32> to vector<128x132xi32>
    %75 = arith.cmpi eq, %0, %74 : vector<128x132xi32>
    %76 = arith.extui %75 : vector<128x132xi1> to vector<128x132xi32>
    %77 = arith.addi %70, %76 : vector<128x132xi32>
    %c0_25 = arith.constant 0 : index
    %c9 = arith.constant 9 : index
    %78 = vector.load %arg2[%c0_25, %c9] : memref<128x10xi32, #tpu.memory_space<vmem>>, vector<128x1xi32>
    %c31_i32_26 = arith.constant 31 : i32
    %79 = vector.broadcast %c31_i32_26 : i32 to vector<128x1xi32>
    %80 = arith.addi %78, %79 : vector<128x1xi32>
    %81 = vector.broadcast %80 : vector<128x1xi32> to vector<128x132xi32>
    %82 = arith.cmpi eq, %0, %81 : vector<128x132xi32>
    %83 = arith.extui %82 : vector<128x132xi1> to vector<128x132xi32>
    %84 = arith.addi %77, %83 : vector<128x132xi32>
    %85 = arith.sitofp %84 : vector<128x132xi32> to vector<128x132xf32>
    %c1_27 = arith.constant 1 : index
    %c0_28 = arith.constant 0 : index
    %c0_29 = arith.constant 0 : index
    %86 = vector.load %arg3[%c1_27, %c0_28, %c0_29] : memref<2x132x128xf32, #tpu.memory_space<vmem>>, vector<1x132x128xf32>
    %87 = vector.shape_cast %86 : vector<1x132x128xf32> to vector<132x128xf32>
    %cst_30 = arith.constant dense<0.000000e+00> : vector<128x128xf32>
    %88 = tpu.matmul %85, %87, %cst_30 {dimension_numbers = #tpu.dot_dimension_numbers<[1], [0], [0], [1], [0, 0, 1, 1], [], []>} : vector<128x132xf32>, vector<132x128xf32>, vector<128x128xf32> -> vector<128x128xf32>
    %89 = arith.addf %45, %88 : vector<128x128xf32>
    %c0_31 = arith.constant 0 : index
    %c0_32 = arith.constant 0 : index
    %90 = vector.load %arg4[%c0_31, %c0_32] : memref<128x128xf32, #tpu.memory_space<vmem>>, vector<128x128xf32>
    tpu.vector_store %arg4[%c0_31, %c0_32], %89 {strides = array<i32>} : memref<128x128xf32, #tpu.memory_space<vmem>>, vector<128x128xf32>,
    return
  }
  func.func @transform_0(%arg0: i32) -> (i32, i32) {
    %c0_i32 = arith.constant 0 : i32
    %c0_i32_0 = arith.constant 0 : i32
    return %arg0, %c0_i32 : i32, i32
  }
  func.func @transform_1(%arg0: i32) -> (i32, i32) {
    %c0_i32 = arith.constant 0 : i32
    %c0_i32_0 = arith.constant 0 : i32
    return %arg0, %c0_i32 : i32, i32
  }
  func.func @transform_2(%arg0: i32) -> (i32, i32, i32) {
    %c0_i32 = arith.constant 0 : i32
    %c0_i32_0 = arith.constant 0 : i32
    %c0_i32_1 = arith.constant 0 : i32
    %c0_i32_2 = arith.constant 0 : i32
    return %c0_i32, %c0_i32_0, %c0_i32_1 : i32, i32, i32
  }
  func.func @transform_3(%arg0: i32) -> (i32, i32) {
    %c0_i32 = arith.constant 0 : i32
    %c0_i32_0 = arith.constant 0 : i32
    return %arg0, %c0_i32 : i32, i32
  }
}

</mosaic_0001>

<bundles_post_ra>
// kernel: node_embedding_forward.1
= control target key start
LH: loop header
LB: loop body
LE: loop exit
PB: predicated region body
PF: predicated region fallthrough
CT: control target
= control target key end

     0   :  { %s2755_s12 = smov 0   ;;  %s5523_s0 = inlined_call_operand.vmem [shape: s32[512,2], index: 0, kind: input, shape index: {}]   ;;  %s5524_s1 = inlined_call_operand.vmem [shape: s32[512,10], index: 1, kind: input, shape index: {}]   ;;  %s5525_s2 = inlined_call_operand.vmem [shape: f32[2,132,128], index: 2, kind: input, shape index: {}]   ;;  %s5526_s3 = inlined_call_operand.vmem [shape: f32[512,128], index: 3, kind: output, shape index: {}]  }
   0x1 LB: > { %s2488_s13 = sadd.s32 4294967295, %s2721_s12   ;;  %p2492_p0 = scmp.ge.s32.totalorder %s2721_s12, 1  ;;  %s2721_s12 = sphi %s2755_s12, %s13_s12  }
   0x2   : > { %p149_p1 = scmp.lt.s32.totalorder %s2721_s12, 5 }
   0x4   : > { %p150_p2 = pnand %p2492_p0, %p149_p1 }
   0x6   : > { %153 = sbr.rel (%p150_p2) target bundleno = 880 (0x370), region = 32 }
   0xd   : > { %s2493_s14 = sshll.u32 %s2488_s13, 4  ;;  %v5531_v0 = vmov 0   ;;  %v5533_v49 = vmov 1   ;;  %v2725_v50 = vmov 2   ;;  %v2726_v51 = vmov 3  }
   0xe   : > { %2637 = vset.pattern.permute.xlu1 %v5531_v0  ;;  %2636 = vset.pattern.permute.xlu0 %v5531_v0  ;;  %p179_p3 = scmp.lt.s32.totalorder %s2493_s14, 63  ;;  %v2727_v52 = vmov 4   ;;  %v1114_v0 = vld [vmem:[%s5525_s2 + $0x18] sm:$0xff]  ;;  %vm2059_vm0 = vcmask 1043456  }
  0x10   : > { %s5845_s14 = smov (!%p179_p3, %s2493_s14), 63 }
  0x11   : > { %s2765_s15 = sshll.u32 %s5845_s14, 3 }
  0x12   : > { %s2771_s18 = scalar_lea.vmem %s5523_s0, %s2765_s15  ;;  %s2827_s21 = scalar_lea.vmem %s5524_s1, %s2765_s15 }
  0x13   : > { %v2774_v1 = vld [vmem:[%s2771_s18 + $0x10] sm:$0xff]  ;;  %v2777_v2 = vld [vmem:[%s2771_s18] sm:$0xff]  ;;  %v2782_v3 = vld [vmem:[%s2771_s18 + $0x18] sm:$0xff]  ;;  %s5377_s19 = scalar_lea.vmem %s5526_s3, %s2765_s15 }
  0x14   : > { %222 = vperm.xlu1 %2637, %v2774_v1   ;;  %216 = vperm.xlu0 %2636, %v2777_v2   ;;  %v2785_v4 = vld [vmem:[%s2771_s18 + $0x8] sm:$0xff]  ;;  %v2793_v6 = vld [vmem:[%s2771_s18 + $0x20] sm:$0xff]  ;;  %v2798_v7 = vld [vmem:[%s2771_s18 + $0x38] sm:$0xff] }
  0x15   : > { %v2790_v5 = vld [vmem:[%s2771_s18 + $0x28] sm:$0xff]  ;;  %v2801_v8 = vld [vmem:[%s2771_s18 + $0x30] sm:$0xff]  ;;  %v2809_v10 = vld [vmem:[%s2771_s18 + $0x40] sm:$0xff] }
  0x16   : > { %v2806_v9 = vld [vmem:[%s2771_s18 + $0x48] sm:$0xff]  ;;  %v2814_v11 = vld [vmem:[%s2771_s18 + $0x58] sm:$0xff]  ;;  %v2817_v12 = vld [vmem:[%s2771_s18 + $0x50] sm:$0xff] }
  0x17   : > { %5605 = vst [vmem:[#allocation2_spill] sm:$0xff] %v2814_v11  ;;  %v212_v13 = vld [vmem:[%s2771_s18 + $0x68] sm:$0xff]  ;;  %v211_v14 = vld [vmem:[%s2771_s18 + $0x60] sm:$0xff]  ;;  %v214_v15 = vld [vmem:[%s2771_s18 + $0x78] sm:$0xff] }
  0x18   : > { %225 = vperm.xlu1 %2637, %v2782_v3   ;;  %219 = vperm.xlu0 %2636, %v2785_v4   ;;  %v213_v16 = vld [vmem:[%s2771_s18 + $0x70] sm:$0xff]  ;;  %v328_v17 = vld [vmem:[%s2827_s21 + $0x8] sm:$0xff]  ;;  %v327_v18 = vld [vmem:[%s2827_s21] sm:$0xff] }
  0x19   : > { %v2833_v19 = vadd.s32 31, %v328_v17  ;;  %v2835_v20 = vadd.s32 31, %v327_v18  ;;  %v330_v21 = vld [vmem:[%s2827_s21 + $0x18] sm:$0xff]  ;;  %v329_v22 = vld [vmem:[%s2827_s21 + $0x10] sm:$0xff]  ;;  %v332_v25 = vld [vmem:[%s2827_s21 + $0x28] sm:$0xff]  ;;  %v5529_v17 = vmov 5  }
  0x1a   : > { %v2841_v23 = vadd.s32 31, %v330_v21  ;;  %v2843_v24 = vadd.s32 31, %v329_v22  ;;  %v331_v26 = vld [vmem:[%s2827_s21 + $0x20] sm:$0xff]  ;;  %v2849_v27 = vadd.s32 31, %v332_v25  ;;  %v334_v29 = vld [vmem:[%s2827_s21 + $0x38] sm:$0xff]  ;;  %v333_v30 = vld [vmem:[%s2827_s21 + $0x30] sm:$0xff] }
  0x1b   : > { %v2851_v28 = vadd.s32 31, %v331_v26  ;;  %v2857_v31 = vadd.s32 31, %v334_v29  ;;  %v2859_v32 = vadd.s32 31, %v333_v30  ;;  %v336_v33 = vld [vmem:[%s2827_s21 + $0x48] sm:$0xff]  ;;  %v335_v34 = vld [vmem:[%s2827_s21 + $0x40] sm:$0xff]  ;;  %v338_v37 = vld [vmem:[%s2827_s21 + $0x58] sm:$0xff] }
  0x1c   : > { %231 = vperm.xlu1 %2637, %v2790_v5   ;;  %228 = vperm.xlu0 %2636, %v2793_v6   ;;  %5606 = vst [vmem:[#allocation3_spill] sm:$0xff] %v2843_v24  ;;  %5607 = vst [vmem:[#allocation4_spill] sm:$0xff] %v2849_v27  ;;  %v2865_v35 = vadd.s32 31, %v336_v33  ;;  %v2867_v36 = vadd.s32 31, %v335_v34  ;;  %v337_v38 = vld [vmem:[%s2827_s21 + $0x50] sm:$0xff]  ;;  %v2873_v39 = vadd.s32 31, %v338_v37 }
  0x1d   : > { %5608 = vst [vmem:[#allocation5_spill] sm:$0xff] %v2851_v28  ;;  %5609 = vst [vmem:[#allocation6_spill] sm:$0xff] %v2857_v31  ;;  %v2875_v40 = vadd.s32 31, %v337_v38  ;;  %v340_v41 = vld [vmem:[%s2827_s21 + $0x68] sm:$0xff]  ;;  %v339_v42 = vld [vmem:[%s2827_s21 + $0x60] sm:$0xff]  ;;  %v5527_v29 = vmov 6  }
  0x1e   : > { %5610 = vst [vmem:[#allocation7_spill] sm:$0xff] %v2859_v32  ;;  %5611 = vst [vmem:[#allocation8_spill] sm:$0xff] %v2865_v35  ;;  %v2881_v43 = vadd.s32 31, %v340_v41  ;;  %v2883_v44 = vadd.s32 31, %v339_v42  ;;  %v342_v45 = vld [vmem:[%s2827_s21 + $0x78] sm:$0xff]  ;;  %v341_v46 = vld [vmem:[%s2827_s21 + $0x70] sm:$0xff] }
  0x1f   : > { %5612 = vst [vmem:[#allocation9_spill] sm:$0xff] %v2867_v36  ;;  %5613 = vst [vmem:[#allocation10_spill] sm:$0xff] %v2873_v39  ;;  %v2889_v47 = vadd.s32 31, %v342_v45  ;;  %v2891_v48 = vadd.s32 31, %v341_v46  ;;  %v1111_v42 = vld [vmem:[%s5525_s2] sm:$0xff]  ;;  %v1112_v45 = vld [vmem:[%s5525_s2 + $0x8] sm:$0xff] }
  0x20   : > { %237 = vperm.xlu1 %2637, %v2798_v7   ;;  %234 = vperm.xlu0 %2636, %v2801_v8   ;;  %5614 = vst [vmem:[#allocation11_spill] sm:$0xff] %v2875_v40  ;;  %5615 = vst [vmem:[#allocation12_spill] sm:$0xff] %v2881_v43 }
  0x21   : > { %5616 = vst [vmem:[#allocation13_spill] sm:$0xff] %v2883_v44  ;;  %5617 = vst [vmem:[#allocation14_spill] sm:$0xff] %v2889_v47 }
  0x22   : > { %5618 = vst [vmem:[#allocation15_spill] sm:$0xff] %v2891_v48 }
  0x24   : > { %243 = vperm.xlu1 %2637, %v2806_v9   ;;  %240 = vperm.xlu0 %2636, %v2809_v10  }
  0x28   : > { %249 = vperm.xlu1 %2637, %v2814_v11   ;;  %246 = vperm.xlu0 %2636, %v2817_v12  }
  0x2c   : > { %255 = vperm.xlu1 %2637, %v212_v13   ;;  %252 = vperm.xlu0 %2636, %v211_v14  }
  0x30   : > { %261 = vperm.xlu1 %2637, %v214_v15   ;;  %258 = vperm.xlu0 %2636, %v213_v16  }
  0x34   : > { %363 = vperm.xlu1 %2637, %v2833_v19   ;;  %360 = vperm.xlu0 %2636, %v2835_v20  }
  0x38   : > { %369 = vperm.xlu1 %2637, %v2841_v23   ;;  %366 = vperm.xlu0 %2636, %v2843_v24  }
  0x3c   : > { %375 = vperm.xlu1 %2637, %v2849_v27   ;;  %372 = vperm.xlu0 %2636, %v2851_v28  }
  0x40   : > { %381 = vperm.xlu1 %2637, %v2857_v31   ;;  %378 = vperm.xlu0 %2636, %v2859_v32  }
  0x44   : > { %387 = vperm.xlu1 %2637, %v2865_v35   ;;  %384 = vperm.xlu0 %2636, %v2867_v36  }
  0x48   : > { %393 = vperm.xlu1 %2637, %v2873_v39   ;;  %390 = vperm.xlu0 %2636, %v2875_v40  }
  0x4c   : > { %399 = vperm.xlu1 %2637, %v2881_v43   ;;  %396 = vperm.xlu0 %2636, %v2883_v44  }
  0x50   : > { %405 = vperm.xlu1 %2637, %v2889_v47   ;;  %402 = vperm.xlu0 %2636, %v2891_v48  }
  0x54   : > { %2638 = vset.pattern.permute.xlu1 %v5533_v49  ;;  %2640 = vset.pattern.permute.xlu0 %v2725_v50 }
  0x55   : > { %507 = vperm.xlu1 %2638, %v2833_v19   ;;  %651 = vperm.xlu0 %2640, %v2833_v19  }
  0x59   : > { %510 = vperm.xlu1 %2638, %v2843_v24   ;;  %660 = vperm.xlu0 %2640, %v2851_v28  }
  0x5d   : > { %516 = vperm.xlu1 %2638, %v2851_v28   ;;  %666 = vperm.xlu0 %2640, %v2859_v32  }
  0x61   : > { %522 = vperm.xlu1 %2638, %v2859_v32   ;;  %672 = vperm.xlu0 %2640, %v2867_v36  }
  0x65   : > { %528 = vperm.xlu1 %2638, %v2867_v36   ;;  %678 = vperm.xlu0 %2640, %v2875_v40  }
  0x69   : > { %534 = vperm.xlu1 %2638, %v2875_v40   ;;  %684 = vperm.xlu0 %2640, %v2883_v44  }
  0x6d   : > { %540 = vperm.xlu1 %2638, %v2883_v44   ;;  %690 = vperm.xlu0 %2640, %v2891_v48  }
  0x71   : > { %546 = vperm.xlu1 %2638, %v2891_v48   ;;  %2641 = vset.pattern.permute.xlu0 %v2726_v51 }
  0x72   : > { %792 = vperm.xlu0 %2641, %v2835_v20  }
  0x75   : > { %2639 = vset.pattern.permute.xlu1 %v2725_v50 }
  0x76   : > { %648 = vperm.xlu1 %2639, %v2835_v20   ;;  %801 = vperm.xlu0 %2641, %v2841_v23  }
  0x7a   : > { %654 = vperm.xlu1 %2639, %v2843_v24   ;;  %807 = vperm.xlu0 %2641, %v2849_v27  }
  0x7e   : > { %657 = vperm.xlu1 %2639, %v2841_v23   ;;  %813 = vperm.xlu0 %2641, %v2857_v31  }
  0x82   : > { %663 = vperm.xlu1 %2639, %v2849_v27   ;;  %819 = vperm.xlu0 %2641, %v2865_v35  }
  0x86   : > { %669 = vperm.xlu1 %2639, %v2857_v31   ;;  %825 = vperm.xlu0 %2641, %v2873_v39  }
  0x8a   : > { %675 = vperm.xlu1 %2639, %v2865_v35   ;;  %831 = vperm.xlu0 %2641, %v2881_v43  }
  0x8e   : > { %681 = vperm.xlu1 %2639, %v2873_v39   ;;  %837 = vperm.xlu0 %2641, %v2889_v47  }
  0x92   : > { %687 = vperm.xlu1 %2639, %v2881_v43   ;;  %2644 = vset.pattern.permute.xlu0 %v2727_v52 }
  0x93   : > { %v2927_v53 = vpop.permute.xlu1 %222  ;;  %939 = vperm.xlu0 %2644, %v2833_v19   ;;  %v2930_v54 = vpop.permute.xlu0 %216 }
  0x96   : > { %693 = vperm.xlu1 %2639, %v2889_v47  }
  0x97   : > { %v2933_v55 = vpop.permute.xlu1 %225  ;;  %948 = vperm.xlu0 %2644, %v2851_v28   ;;  %v2936_v56 = vpop.permute.xlu0 %219 }
  0x9a   : > { %2642 = vset.pattern.permute.xlu1 %v2726_v51  ;;  %v2577_v51 = vpack.c.bf16 %v1112_v45, %v1111_v42 }
  0x9b   : > { %795 = vperm.xlu1 %2642, %v2833_v19   ;;  %v2939_v57 = vpop.permute.xlu1 %231  ;;  %954 = vperm.xlu0 %2644, %v2859_v32   ;;  %v2942_v58 = vpop.permute.xlu0 %228 }
  0x9f   : > { %798 = vperm.xlu1 %2642, %v2843_v24   ;;  %v2945_v59 = vpop.permute.xlu1 %237  ;;  %960 = vperm.xlu0 %2644, %v2867_v36   ;;  %v2948_v60 = vpop.permute.xlu0 %234 }
  0xa3   : > { %804 = vperm.xlu1 %2642, %v2851_v28   ;;  %v2951_v61 = vpop.permute.xlu1 %243  ;;  %966 = vperm.xlu0 %2644, %v2875_v40   ;;  %v2954_v62 = vpop.permute.xlu0 %240  ;;  %v1122_v28 = vld [vmem:[%s5525_s2 + $0x58] sm:$0xff] }
  0xa7   : > { %810 = vperm.xlu1 %2642, %v2859_v32   ;;  %v2957_v63 = vpop.permute.xlu1 %249  ;;  %972 = vperm.xlu0 %2644, %v2883_v44   ;;  %v2960_v13 = vpop.permute.xlu0 %246  ;;  %v1119_v32 = vld [vmem:[%s5525_s2 + $0x40] sm:$0xff] }
  0xab   : > { %816 = vperm.xlu1 %2642, %v2867_v36   ;;  %v2963_v14 = vpop.permute.xlu1 %255  ;;  %978 = vperm.xlu0 %2644, %v2891_v48   ;;  %v2966_v15 = vpop.permute.xlu0 %252  ;;  %v5547_v36 = vmov 8  }
  0xaf   : > { %822 = vperm.xlu1 %2642, %v2875_v40   ;;  %v2969_v16 = vpop.permute.xlu1 %261  ;;  %2649 = vset.pattern.permute.xlu0 %v5529_v17  ;;  %v2972_v18 = vpop.permute.xlu0 %258  ;;  %v1113_v17 = vld [vmem:[%s5525_s2 + $0x10] sm:$0xff]  ;;  %v1118_v40 = vld [vmem:[%s5525_s2 + $0x38] sm:$0xff] }
  0xb0   : > { %1247 = vperm.xlu0 %2649, %v2843_v24   ;;  %v2580_v45 = vpack.c.bf16 %v1114_v0, %v1113_v17  ;;  %v1117_v17 = vld [vmem:[%s5525_s2 + $0x30] sm:$0xff] }
  0xb3   : > { %828 = vperm.xlu1 %2642, %v2883_v44   ;;  %v2976_v21 = vpop.permute.xlu1 %363  ;;  %v2978_v22 = vpop.permute.xlu0 %360 }
  0xb4   : > { %1256 = vperm.xlu0 %2649, %v2849_v27  }
  0xb7   : > { %834 = vperm.xlu1 %2642, %v2891_v48   ;;  %v2982_v25 = vpop.permute.xlu1 %369  ;;  %v2984_v26 = vpop.permute.xlu0 %366  ;;  %v1116_v48 = vld [vmem:[%s5525_s2 + $0x28] sm:$0xff] }
  0xb8   : > { %2660 = vset.pattern.permute.xlu0 %v5527_v29  ;;  %v5560_v29 = vmov 0.0|0.0  }
  0xb9   : > { %1385 = vperm.xlu0 %2660, %v2835_v20   ;;  %2576 = vmatprep.subr.bf16.mxu0 %v5560_v29 }
  0xba   : > { %2578 = vmatpush1.bf16.msra.mxu0 %v2577_v51  ;;  %2552 = vmatprep.subr.bf16.mxu1 %v5560_v29 }
  0xbb   : > { %2643 = vset.pattern.permute.xlu1 %v2727_v52  ;;  %v2988_v30 = vpop.permute.xlu1 %375  ;;  %v2990_v33 = vpop.permute.xlu0 %372  ;;  %v5535_v52 = vmov 7   ;;  %2579 = vmatprep.subr.bf16.mxu0 %v5560_v29 }
  0xbc   : > { %936 = vperm.xlu1 %2643, %v2835_v20  }
  0xbd   : > { %1388 = vperm.xlu0 %2660, %v2833_v19  }
  0xbe   : > { %2581 = vmatpush1.bf16.msra.mxu0 %v2580_v45  ;;  %v2586_v45 = vpack.c.bf16 %v1118_v40, %v1117_v17 }
  0xbf   : > { %v2994_v34 = vpop.permute.xlu1 %381  ;;  %v2996_v37 = vpop.permute.xlu0 %378  ;;  %2582 = vmatprep.subr.bf16.mxu0 %v5560_v29 }
  0xc0   : > { %942 = vperm.xlu1 %2643, %v2843_v24  }
  0xc1   : > { %1391 = vperm.xlu0 %2660, %v2843_v24  }
  0xc3   : > { %v3000_v38 = vpop.permute.xlu1 %387  ;;  %v3002_v41 = vpop.permute.xlu0 %384 }
  0xc4   : > { %945 = vperm.xlu1 %2643, %v2841_v23  }
  0xc5   : > { %1400 = vperm.xlu0 %2660, %v2849_v27  }
  0xc7   : > { %v3012_v46 = vpop.permute.xlu1 %393  ;;  %v3014_v50 = vpop.permute.xlu0 %390 }
  0xc8   : > { %951 = vperm.xlu1 %2643, %v2849_v27  }
  0xc9   : > { %2663 = vset.pattern.permute.xlu0 %v5535_v52  ;;  %v1115_v52 = vld [vmem:[%s5525_s2 + $0x20] sm:$0xff] }
  0xca   : > { %1535 = vperm.xlu0 %2663, %v2843_v24   ;;  %v2583_v0 = vpack.c.bf16 %v1116_v48, %v1115_v52 }
  0xcb   : > { %v3026_v49 = vpop.permute.xlu1 %399  ;;  %v3028_v42 = vpop.permute.xlu0 %396 }
  0xcc   : > { %957 = vperm.xlu1 %2643, %v2857_v31   ;;  %2584 = vmatpush1.bf16.msra.mxu0 %v2583_v0 }
  0xcd   : > { %2585 = vmatprep.subr.bf16.mxu0 %v5560_v29 }
  0xce   : > { %1544 = vperm.xlu0 %2663, %v2849_v27  }
  0xcf   : > { %v3040_v44 = vpop.permute.xlu1 %405  ;;  %v3042_v51 = vpop.permute.xlu0 %402 }
  0xd0   : > { %5619 = vst [vmem:[#allocation16_spill] sm:$0xff] %v3042_v51  ;;  %963 = vperm.xlu1 %2643, %v2865_v35   ;;  %2587 = vmatpush1.bf16.msra.mxu0 %v2586_v45 }
  0xd1   : > { %2588 = vmatprep.subr.bf16.mxu0 %v5560_v29 }
  0xd2   : > { %2666 = vset.pattern.permute.xlu0 %v5547_v36  ;;  %v1120_v36 = vld [vmem:[%s5525_s2 + $0x48] sm:$0xff] }
  0xd3   : > { %1679 = vperm.xlu0 %2666, %v2843_v24   ;;  %v2589_v40 = vpack.c.bf16 %v1120_v36, %v1119_v32  ;;  %v1121_v24 = vld [vmem:[%s5525_s2 + $0x50] sm:$0xff] }
  0xd4   : > { %969 = vperm.xlu1 %2643, %v2873_v39   ;;  %v3055_v48 = vpop.permute.xlu1 %507  ;;  %v3057_v52 = vpop.permute.xlu0 %651  ;;  %v2592_v45 = vpack.c.bf16 %v1122_v28, %v1121_v24  ;;  %v1125_v24 = vld [vmem:[%s5525_s2 + $0x70] sm:$0xff]  ;;  %v1126_v28 = vld [vmem:[%s5525_s2 + $0x78] sm:$0xff] }
  0xd5   : > { %5620 = vst [vmem:[#allocation17_spill] sm:$0xff] %v3057_v52  ;;  %v5623_v52 = vmov 1   ;;  %2590 = vmatpush1.bf16.msra.mxu0 %v2589_v40 }
  0xd6   : > { %2591 = vmatprep.subr.bf16.mxu0 %v5560_v29 }
  0xd7   : > { %1688 = vperm.xlu0 %2666, %v2849_v27  }
  0xd8   : > { %975 = vperm.xlu1 %2643, %v2881_v43   ;;  %v3068_v0 = vpop.permute.xlu1 %510  ;;  %v3070_v17 = vpop.permute.xlu0 %660 }
  0xd9   : > { %5621 = vst [vmem:[#allocation18_spill] sm:$0xff] %v3068_v0  ;;  %5622 = vst [vmem:[#allocation19_spill] sm:$0xff] %v3070_v17  ;;  %v1123_v17 = vld [vmem:[%s5525_s2 + $0x60] sm:$0xff]  ;;  %v1124_v0 = vld [vmem:[%s5525_s2 + $0x68] sm:$0xff]  ;;  %2593 = vmatpush1.bf16.msra.mxu0 %v2592_v45  ;;  %v196_v45 = vlaneseq }
  0xda   : > { %v2595_v40 = vpack.c.bf16 %v1124_v0, %v1123_v17  ;;  %2594 = vmatprep.subr.bf16.mxu0 %v5560_v29 }
  0xdb   : > { %2669 = vset.pattern.permute.xlu0 %v5623_v52  ;;  %v3114_v17 = vand.u32 127, %v196_v45 }
  0xdc   : > { %981 = vperm.xlu1 %2643, %v2889_v47   ;;  %v3081_v32 = vpop.permute.xlu1 %516  ;;  %504 = vperm.xlu0 %2669, %v2835_v20   ;;  %v3084_v36 = vpop.permute.xlu0 %666 }
  0xdd   : > { %5624 = vst [vmem:[#allocation20_spill] sm:$0xff] %v3081_v32  ;;  %5625 = vst [vmem:[#allocation21_spill] sm:$0xff] %v3084_v36  ;;  %2596 = vmatpush1.bf16.msra.mxu0 %v2595_v40  ;;  %v1127_v40 = vld [vmem:[%s5525_s2 + $0x80] sm:$0xf]  ;;  %vm267_vm1 = vcmp.eq.s32.totalorder %v3114_v17, %v2927_v53  ;;  %vm263_vm3 = vcmp.eq.s32.totalorder %v3114_v17, %v2930_v54  ;;  %vm269_vm5 = vcmp.eq.s32.totalorder %v3114_v17, %v2933_v55 }
  0xde   : > { %2597 = vmatprep.subr.bf16.mxu0 %v5560_v29  ;;  %vm265_vm7 = vcmp.eq.s32.totalorder %v3114_v17, %v2936_v56  ;;  %vm273_vm9 = vcmp.eq.s32.totalorder %v3114_v17, %v2939_v57  ;;  %vm271_vm11 = vcmp.eq.s32.totalorder %v3114_v17, %v2942_v58  ;;  %vm277_vm13 = vcmp.eq.s32.totalorder %v3114_v17, %v2945_v59 }
  0xdf   : > { %vm275_vm15 = vcmp.eq.s32.totalorder %v3114_v17, %v2948_v60 }
  0xe0   : > { %2645 = vset.pattern.permute.xlu1 %v5623_v52  ;;  %v3094_v32 = vpop.permute.xlu1 %522  ;;  %513 = vperm.xlu0 %2669, %v2841_v23   ;;  %v3097_v36 = vpop.permute.xlu0 %672 }
  0xe1   : > { %5626 = vst [vmem:[#allocation22_spill] sm:$0xff] %v3094_v32  ;;  %5627 = vst [vmem:[#allocation23_spill] sm:$0xff] %v3097_v36  ;;  %1132 = vperm.xlu1 %2645, %v2785_v4   ;;  %v2598_v4 = vpack.c.bf16 %v1126_v28, %v1125_v24  ;;  %v3126_v24 = vadd.s32 128, %v3114_v17 }
  0xe3   : > { %2599 = vmatpush1.bf16.msra.mxu0 %v2598_v4  ;;  %vm268_vm2 = vcmp.eq.s32.totalorder %v3126_v24, %v2927_v53  ;;  %vm264_vm4 = vcmp.eq.s32.totalorder %v3126_v24, %v2930_v54  ;;  %v5635_v4 = vmov 0   ;;  %v5636_v53 = vmov 5   ;;  %v2499_v54 = vld [vmem:[%s5525_s2 + $0x88] sm:$0xff] }
  0xe4   : > { %v3107_v52 = vpop.permute.xlu1 %528  ;;  %519 = vperm.xlu0 %2669, %v2849_v27   ;;  %v3110_v0 = vpop.permute.xlu0 %678  ;;  %vm270_vm6 = vcmp.eq.s32.totalorder %v3126_v24, %v2933_v55  ;;  %vm266_vm8 = vcmp.eq.s32.totalorder %v3126_v24, %v2936_v56  ;;  %vm274_vm10 = vcmp.eq.s32.totalorder %v3126_v24, %v2939_v57  ;;  %v2500_v55 = vld [vmem:[%s5525_s2 + $0x90] sm:$0xff]  ;;  %vm272_vm12 = vcmp.eq.s32.totalorder %v3126_v24, %v2942_v58 }
  0xe5   : > { %5628 = vst [vmem:[#allocation24_spill] sm:$0xff] %v3107_v52  ;;  %5629 = vst [vmem:[#allocation25_spill] sm:$0xff] %v3110_v0  ;;  %1135 = vperm.xlu1 %2645, %v2774_v1   ;;  %v5559_v1 = vmov 0.0   ;;  %vm278_vm14 = vcmp.eq.s32.totalorder %v3126_v24, %v2945_v59  ;;  %v3194_v27 = vsel %vm270_vm6, 1, %v5635_v4  ;;  %v3234_v56 = vsel %vm272_vm12, 1, %v5635_v4 }
  0xe6   : > { %2291 = vmatprep.subr.mxu0 %v5559_v1  ;;  %v3154_v1 = vsel %vm263_vm3, 1, %v5635_v4  ;;  %v3240_v57 = vsel %vm277_vm13, 1, %v5635_v4  ;;  %v3251_v58 = vsel %vm275_vm15, 1, %v5635_v4  ;;  %vm282_vm3 = vcmp.eq.s32.totalorder %v3126_v24, %v2951_v61 }
  0xe7   : > { %2533 = vmatpush1.msk.msra.mxu0 %vm2059_vm0, %v1127_v40  ;;  %v3148_v40 = vsel %vm267_vm1, 1, %v5635_v4  ;;  %vm276_vm1 = vcmp.eq.s32.totalorder %v3126_v24, %v2948_v60  ;;  %v5640_v59 = vmov 0.0|0.0   ;;  %vm285_vm6 = vcmp.eq.s32.totalorder %v3114_v17, %v2957_v63 }
  0xe8   : > { %v3116_v36 = vpop.permute.xlu1 %534  ;;  %525 = vperm.xlu0 %2669, %v2857_v31   ;;  %v3119_v32 = vpop.permute.xlu0 %684  ;;  %v3191_v31 = vsel %vm269_vm5, 1, %v5635_v4  ;;  %vm280_vm5 = vcmp.eq.s32.totalorder %v3126_v24, %v2954_v62  ;;  %v5643_v52 = vmov 7   ;;  %v3300_v60 = vsel %vm282_vm3, 1, %v5635_v4 }
  0xe9   : > { %5630 = vst [vmem:[#allocation26_spill] sm:$0xff] %v3116_v36  ;;  %5631 = vst [vmem:[#allocation27_spill] sm:$0xff] %v3119_v32  ;;  %1141 = vperm.xlu1 %2645, %v2793_v6   ;;  %v2502_v32 = vld [vmem:[%s5525_s2 + $0xa0] sm:$0xff]  ;;  %v3281_v36 = vsel %vm276_vm1, 1, %v5635_v4  ;;  %vm287_vm12 = vcmp.eq.s32.totalorder %v3114_v17, %v2966_v15  ;;  %vm288_vm13 = vcmp.eq.s32.totalorder %v3126_v24, %v2966_v15  ;;  %v2503_v15 = vld [vmem:[%s5525_s2 + $0xa8] sm:$0xff] }
  0xea   : > { %vm294_vm15 = vcmp.eq.s32.totalorder %v3126_v24, %v2969_v16  ;;  %vm409_vm1 = vcmp.eq.s32.totalorder %v3114_v17, %v2976_v21  ;;  %vm410_vm3 = vcmp.eq.s32.totalorder %v3126_v24, %v2976_v21 }
  0xec   : > { %v3130_v28 = vpop.permute.xlu1 %540  ;;  %531 = vperm.xlu0 %2669, %v2865_v35   ;;  %v3133_v45 = vpop.permute.xlu0 %690  ;;  %v3160_v35 = vsel %vm264_vm4, 1, %v5635_v4  ;;  %vm279_vm4 = vcmp.eq.s32.totalorder %v3114_v17, %v2954_v62 }
  0xed   : > { %5632 = vst [vmem:[#allocation28_spill] sm:$0xff] %v3130_v28  ;;  %5633 = vst [vmem:[#allocation29_spill] sm:$0xff] %v3133_v45  ;;  %1147 = vperm.xlu1 %2645, %v2801_v8   ;;  %v3151_v8 = vsel %vm268_vm2, 1, %v5635_v4  ;;  %vm281_vm2 = vcmp.eq.s32.totalorder %v3114_v17, %v2951_v61  ;;  %v3321_v61 = vsel %vm285_vm6, 1, %v5635_v4  ;;  %vm408_vm6 = vcmp.eq.s32.totalorder %v3126_v24, %v2978_v22 }
  0xee   : > { %v440_v21 = vsel %vm408_vm6, 1, %v5635_v4  ;;  %vm423_vm6 = vcmp.eq.s32.totalorder %v3114_v17, %v3002_v41 }
  0xf0   : > { %v3144_v6 = vpop.permute.xlu1 %546  ;;  %537 = vperm.xlu0 %2669, %v2873_v39   ;;  %v2553_v39 = vpack.c.bf16 %v2500_v55, %v2499_v54  ;;  %v3209_v54 = vsel %vm266_vm8, 1, %v5635_v4  ;;  %v3215_v55 = vsel %vm273_vm9, 1, %v5635_v4  ;;  %vm283_vm8 = vcmp.eq.s32.totalorder %v3114_v17, %v2960_v13 }
  0xf1   : > { %5634 = vst [vmem:[#allocation30_spill] sm:$0xff] %v3144_v6  ;;  %2646 = vset.pattern.permute.xlu1 %v5636_v53  ;;  %v3157_v29 = vpop.permute.xlu0 %792  ;;  %vm284_vm9 = vcmp.eq.s32.totalorder %v3126_v24, %v2960_v13  ;;  %v3337_v62 = vsel %vm283_vm8, 1, %v5635_v4  ;;  %v3367_v13 = vsel %vm287_vm12, 1, %v5635_v4  ;;  %vm414_vm8 = vcmp.eq.s32.totalorder %v3126_v24, %v2982_v25 }
  0xf2   : > { %5637 = vst [vmem:[#allocation31_spill] sm:$0xff] %v3157_v29  ;;  %1241 = vperm.xlu1 %2646, %v2835_v20   ;;  %v3197_v29 = vsel %vm265_vm7, 1, %v5635_v4  ;;  %2554 = vmatpush1.bf16.msra.mxu1 %v2553_v39  ;;  %v2501_v39 = vld [vmem:[%s5525_s2 + $0x98] sm:$0xff]  ;;  %vm286_vm7 = vcmp.eq.s32.totalorder %v3126_v24, %v2957_v63  ;;  %v3343_v63 = vsel %vm284_vm9, 1, %v5635_v4  ;;  %5649 = vst [vmem:[#allocation41_spill] sm:$0xff] %v3367_v13 }
  0xf3   : > { %2555 = vmatprep.subr.bf16.mxu1 %v5640_v59  ;;  %v2556_v28 = vpack.c.bf16 %v2502_v32, %v2501_v39  ;;  %v3294_v32 = vsel %vm281_vm2, 1, %v5635_v4  ;;  %v3306_v39 = vsel %vm279_vm4, 1, %v5635_v4  ;;  %5644 = vst [vmem:[#allocation36_spill] sm:$0xff] %v3343_v63  ;;  %vm291_vm2 = vcmp.eq.s32.totalorder %v3114_v17, %v2972_v18 }
  0xf4   : > { %543 = vperm.xlu0 %2669, %v2881_v43   ;;  %v3221_v43 = vsel %vm274_vm10, 1, %v5635_v4  ;;  %vm289_vm10 = vcmp.eq.s32.totalorder %v3114_v17, %v2963_v14  ;;  %vm407_vm4 = vcmp.eq.s32.totalorder %v3114_v17, %v2978_v22  ;;  %vm411_vm9 = vcmp.eq.s32.totalorder %v3114_v17, %v2984_v26 }
  0xf5   : > { %v3201_v45 = vpop.permute.xlu1 %648  ;;  %v3203_v6 = vpop.permute.xlu0 %801  ;;  %vm418_vm12 = vcmp.eq.s32.totalorder %v3126_v24, %v2988_v30 }
  0xf6   : > { %5638 = vst [vmem:[#allocation32_spill] sm:$0xff] %v3201_v45  ;;  %5639 = vst [vmem:[#allocation33_spill] sm:$0xff] %v3203_v6  ;;  %v3227_v6 = vsel %vm271_vm11, 1, %v5635_v4  ;;  %1244 = vperm.xlu1 %2646, %v2833_v19   ;;  %v3246_v45 = vsel %vm278_vm14, 1, %v5635_v4  ;;  %vm290_vm11 = vcmp.eq.s32.totalorder %v3126_v24, %v2963_v14  ;;  %2557 = vmatpush1.bf16.msra.mxu1 %v2556_v28  ;;  %v3349_v28 = vsel %vm289_vm10, 1, %v5635_v4 }
  0xf7   : > { %2558 = vmatprep.subr.bf16.mxu1 %v5640_v59  ;;  %5645 = vst [vmem:[#allocation37_spill] sm:$0xff] %v3349_v28  ;;  %v3358_v51 = vsel %vm290_vm11, 1, %v5635_v4  ;;  %vm293_vm14 = vcmp.eq.s32.totalorder %v3114_v17, %v2969_v16  ;;  %v5650_v14 = vmov 8   ;;  %v2506_v28 = vld [vmem:[%s5525_s2 + $0xc0] sm:$0xff]  ;;  %v439_v16 = vsel %vm407_vm4, 1, %v5635_v4 }
  0xf8   : > { %549 = vperm.xlu0 %2669, %v2889_v47   ;;  %5648 = vst [vmem:[#allocation40_spill] sm:$0xff] %v3358_v51  ;;  %v2505_v51 = vld [vmem:[%s5525_s2 + $0xb8] sm:$0xff]  ;;  %vm412_vm10 = vcmp.eq.s32.totalorder %v3126_v24, %v2984_v26  ;;  %vm417_vm11 = vcmp.eq.s32.totalorder %v3114_v17, %v2988_v30  ;;  %v2510_v30 = vld [vmem:[%s5525_s2 + $0xe0] sm:$0xff]  ;;  %vm425_vm4 = vcmp.eq.s32.totalorder %v3114_v17, %v3000_v38 }
  0xf9   : > { %v3273_v47 = vpop.permute.xlu1 %654  ;;  %v3275_v0 = vpop.permute.xlu0 %807 }
  0xfa   : > { %5641 = vst [vmem:[#allocation34_spill] sm:$0xff] %v3273_v47  ;;  %5642 = vst [vmem:[#allocation35_spill] sm:$0xff] %v3275_v0  ;;  %2647 = vset.pattern.permute.xlu1 %v5643_v52  ;;  %v3315_v0 = vsel %vm280_vm5, 1, %v5635_v4  ;;  %v3327_v47 = vsel %vm286_vm7, 1, %v5635_v4  ;;  %vm292_vm5 = vcmp.eq.s32.totalorder %v3126_v24, %v2972_v18  ;;  %vm413_vm7 = vcmp.eq.s32.totalorder %v3114_v17, %v2982_v25  ;;  %v2508_v18 = vld [vmem:[%s5525_s2 + $0xd0] sm:$0xff] }
  0xfb   : > { %1529 = vperm.xlu1 %2647, %v2835_v20   ;;  %v445_v22 = vsel %vm413_vm7, 1, %v5635_v4  ;;  %v444_v25 = vsel %vm412_vm10, 1, %v5635_v4  ;;  %vm424_vm7 = vcmp.eq.s32.totalorder %v3126_v24, %v3002_v41  ;;  %vm427_vm10 = vcmp.eq.s32.totalorder %v3114_v17, %v3014_v50 }
  0xfc   : > { %1129 = vperm.xlu0 %2669, %v2777_v2  }
  0xfd   : > { %v3353_v2 = vpop.permute.xlu1 %657  ;;  %v3355_v11 = vpop.permute.xlu0 %813 }
  0xfe   : > { %5646 = vst [vmem:[#allocation38_spill] sm:$0xff] %v3353_v2  ;;  %5647 = vst [vmem:[#allocation39_spill] sm:$0xff] %v3355_v11  ;;  %v2504_v11 = vld [vmem:[%s5525_s2 + $0xb0] sm:$0xff]  ;;  %v3383_v2 = vsel %vm288_vm13, 1, %v5635_v4  ;;  %vm415_vm13 = vcmp.eq.s32.totalorder %v3114_v17, %v2990_v33 }
  0xff   : > { %2648 = vset.pattern.permute.xlu1 %v5650_v14  ;;  %5651 = vst [vmem:[#allocation42_spill] sm:$0xff] %v3383_v2  ;;  %v2559_v13 = vpack.c.bf16 %v2504_v11, %v2503_v15  ;;  %v3401_v2 = vsel %vm293_vm14, 1, %v5635_v4  ;;  %v441_v11 = vsel %vm409_vm1, 1, %v5635_v4  ;;  %vm416_vm14 = vcmp.eq.s32.totalorder %v3126_v24, %v2990_v33 }
 0x100   : > { %1673 = vperm.xlu1 %2648, %v2835_v20   ;;  %1138 = vperm.xlu0 %2669, %v2782_v3   ;;  %5652 = vst [vmem:[#allocation43_spill] sm:$0xff] %v3401_v2  ;;  %v3407_v3 = vsel %vm294_vm15, 1, %v5635_v4  ;;  %v442_v2 = vsel %vm410_vm3, 1, %v5635_v4  ;;  %vm421_vm15 = vcmp.eq.s32.totalorder %v3114_v17, %v2994_v34  ;;  %vm422_vm1 = vcmp.eq.s32.totalorder %v3126_v24, %v2994_v34  ;;  %v2511_v34 = vld [vmem:[%s5525_s2 + $0xe8] sm:$0xff] }
 0x101   : > { %5653 = vst [vmem:[#allocation44_spill] sm:$0xff] %v3407_v3  ;;  %v3415_v15 = vpop.permute.xlu1 %663  ;;  %v3417_v63 = vpop.permute.xlu0 %819  ;;  %2560 = vmatpush1.bf16.msra.mxu1 %v2559_v13  ;;  %v2562_v3 = vpack.c.bf16 %v2506_v28, %v2505_v51  ;;  %v3448_v51 = vsel %vm292_vm5, 1, %v5635_v4  ;;  %v3451_v28 = vadd.s32 %v441_v11, %v3197_v29  ;;  %v2507_v13 = vld [vmem:[%s5525_s2 + $0xc8] sm:$0xff]  ;;  %v3465_v29 = vadd.s32 %v442_v2, %v3209_v54 }
 0x102   : > { %5654 = vst [vmem:[#allocation45_spill] sm:$0xff] %v3415_v15  ;;  %5655 = vst [vmem:[#allocation46_spill] sm:$0xff] %v3417_v63  ;;  %v3433_v63 = vsel %vm291_vm2, 1, %v5635_v4  ;;  %2561 = vmatprep.subr.bf16.mxu1 %v5640_v59  ;;  %v3468_v11 = vadd.s32 %v439_v16, %v3154_v1  ;;  %v446_v15 = vsel %vm414_vm8, 1, %v5635_v4  ;;  %v3482_v54 = vadd.s32 %v440_v21, %v3160_v35 }
 0x103   : > { %v443_v1 = vsel %vm411_vm9, 1, %v5635_v4  ;;  %v3495_v2 = vadd.s32 %v445_v22, %v3191_v31  ;;  %v449_v35 = vsel %vm417_vm11, 1, %v5635_v4  ;;  %v2565_v16 = vpack.c.bf16 %v2508_v18, %v2507_v13  ;;  %v2509_v31 = vld [vmem:[%s5525_s2 + $0xd8] sm:$0xff] }
 0x104   : > { %2650 = vset.pattern.permute.xlu1 %v5643_v52  ;;  %1144 = vperm.xlu0 %2669, %v2790_v5   ;;  %5656 = vst [vmem:[#allocation47_spill] sm:$0xff] %v3482_v54  ;;  %v3505_v26 = vadd.s32 %v446_v15, %v3194_v27  ;;  %v450_v21 = vsel %vm418_vm12, 1, %v5635_v4  ;;  %v3520_v27 = vadd.s32 %v443_v1, %v3148_v40  ;;  %v5592_v15 = vmov 9  }
 0x105   : > { %v3476_v5 = vpop.permute.xlu1 %669  ;;  %1532 = vperm.xlu1 %2650, %v2833_v19   ;;  %v3479_v52 = vpop.permute.xlu0 %825  ;;  %2563 = vmatpush1.bf16.msra.mxu1 %v2562_v3  ;;  %5657 = vst [vmem:[#allocation48_spill] sm:$0xff] %v3495_v2  ;;  %v447_v3 = vsel %vm415_vm13, 1, %v5635_v4  ;;  %vm419_vm2 = vcmp.eq.s32.totalorder %v3114_v17, %v2996_v37  ;;  %vm420_vm3 = vcmp.eq.s32.totalorder %v3126_v24, %v2996_v37  ;;  %v448_v18 = vsel %vm416_vm14, 1, %v5635_v4 }
 0x106   : > { %2564 = vmatprep.subr.bf16.mxu1 %v5640_v59  ;;  %5658 = vst [vmem:[#allocation49_spill] sm:$0xff] %v3505_v26  ;;  %v3533_v13 = vadd.s32 %v444_v25, %v3151_v8  ;;  %v3536_v40 = vadd.s32 %v449_v35, %v3215_v55  ;;  %v3546_v1 = vadd.s32 %v450_v21, %v3221_v43  ;;  %v453_v8 = vsel %vm421_vm15, 1, %v5635_v4 }
 0x107   : > { %v454_v55 = vsel %vm422_vm1, 1, %v5635_v4  ;;  %v2568_v33 = vpack.c.bf16 %v2510_v30, %v2509_v31  ;;  %v3557_v25 = vadd.s32 %v447_v3, %v3227_v6  ;;  %v452_v43 = vsel %vm420_vm3, 1, %v5635_v4  ;;  %v2512_v6 = vld [vmem:[%s5525_s2 + $0xf0] sm:$0xff] }
 0x108   : > { %1150 = vperm.xlu0 %2669, %v2798_v7   ;;  %5659 = vst [vmem:[#allocation50_spill] sm:$0xff] %v3536_v40  ;;  %5660 = vst [vmem:[#allocation51_spill] sm:$0xff] %v3546_v1  ;;  %vm426_vm5 = vcmp.eq.s32.totalorder %v3126_v24, %v3000_v38  ;;  %v3578_v35 = vadd.s32 %v448_v18, %v3234_v56  ;;  %v457_v37 = vsel %vm425_vm4, 1, %v5635_v4  ;;  %v2513_v38 = vld [vmem:[%s5525_s2 + $0xf8] sm:$0xff]  ;;  %v5698_v54 = vmov 9  }
 0x109   : > { %v3527_v7 = vpop.permute.xlu1 %675  ;;  %2651 = vset.pattern.permute.xlu1 %v5592_v15  ;;  %v3530_v22 = vpop.permute.xlu0 %831  ;;  %2566 = vmatpush1.bf16.msra.mxu1 %v2565_v16  ;;  %v3593_v21 = vadd.s32 %v453_v8, %v3240_v57  ;;  %v3596_v56 = vadd.s32 %v454_v55, %v3246_v45  ;;  %vm429_vm8 = vcmp.eq.s32.totalorder %v3114_v17, %v3012_v46  ;;  %v458_v45 = vsel %vm426_vm5, 1, %v5635_v4 }
 0x10a   : > { %1817 = vperm.xlu1 %2651, %v2835_v20   ;;  %v451_v20 = vsel %vm419_vm2, 1, %v5635_v4  ;;  %2567 = vmatprep.subr.bf16.mxu1 %v5640_v59  ;;  %vm430_vm9 = vcmp.eq.s32.totalorder %v3126_v24, %v3012_v46  ;;  %v3607_v30 = vadd.s32 %v452_v43, %v3281_v36  ;;  %v2571_v57 = vpack.c.bf16 %v2512_v6, %v2511_v34 }
 0x10b   : > { %5661 = vst [vmem:[#allocation52_spill] sm:$0xff] %v3593_v21  ;;  %5662 = vst [vmem:[#allocation53_spill] sm:$0xff] %v3596_v56  ;;  %v3604_v31 = vadd.s32 %v451_v20, %v3251_v58  ;;  %v3615_v3 = vadd.s32 %v457_v37, %v3294_v32  ;;  %v455_v58 = vsel %vm423_vm6, 1, %v5635_v4  ;;  %v456_v36 = vsel %vm424_vm7, 1, %v5635_v4  ;;  %v2514_v32 = vld [vmem:[%s5525_s2 + $0x100] sm:$0xff]  ;;  %v5695_v56 = vld [vmem:[#allocation27_spill] sm:$0xff] }
 0x10c   : > { %1153 = vperm.xlu0 %2669, %v2809_v10   ;;  %v461_v41 = vsel %vm429_vm8, 1, %v5635_v4  ;;  %vm428_vm11 = vcmp.eq.s32.totalorder %v3126_v24, %v3014_v50  ;;  %vm433_vm12 = vcmp.eq.s32.totalorder %v3114_v17, %v3026_v49  ;;  %v3650_v8 = vadd.s32 %v458_v45, %v3300_v60  ;;  %v5668_v45 = vld [vmem:[#allocation37_spill] sm:$0xff] }
 0x10d   : > { %v3588_v10 = vpop.permute.xlu1 %681  ;;  %v3590_v16 = vpop.permute.xlu0 %837  ;;  %2569 = vmatpush1.bf16.msra.mxu1 %v2568_v33  ;;  %5663 = vst [vmem:[#allocation54_spill] sm:$0xff] %v3615_v3  ;;  %vm434_vm13 = vcmp.eq.s32.totalorder %v3126_v24, %v3026_v49  ;;  %vm431_vm14 = vcmp.eq.s32.totalorder %v3114_v17, %v3028_v42  ;;  %vm432_vm15 = vcmp.eq.s32.totalorder %v3126_v24, %v3028_v42  ;;  %v459_v60 = vsel %vm427_vm10, 1, %v5635_v4  ;;  %v5667_v42 = vld [vmem:[#allocation36_spill] sm:$0xff] }
 0x10e   : > { %2652 = vset.pattern.permute.xlu1 %v5650_v14  ;;  %2570 = vmatprep.subr.bf16.mxu1 %v5640_v59  ;;  %5664 = vst [vmem:[#allocation55_spill] sm:$0xff] %v3650_v8  ;;  %v3661_v55 = vadd.s32 %v455_v58, %v3306_v39  ;;  %v3664_v33 = vadd.s32 %v456_v36, %v3315_v0  ;;  %v460_v0 = vsel %vm428_vm11, 1, %v5635_v4  ;;  %v465_v39 = vsel %vm433_vm12, 1, %v5635_v4  ;;  %v5673_v36 = vld [vmem:[#allocation41_spill] sm:$0xff] }
 0x10f   : > { %1676 = vperm.xlu1 %2652, %v2833_v19   ;;  %v2574_v20 = vpack.c.bf16 %v2514_v32, %v2513_v38  ;;  %v3672_v43 = vadd.s32 %v461_v41, %v3321_v61  ;;  %v463_v50 = vsel %vm431_vm14, 1, %v5635_v4  ;;  %v464_v61 = vsel %vm432_vm15, 1, %v5635_v4  ;;  %v5674_v32 = vld [vmem:[#allocation42_spill] sm:$0xff]  ;;  %v2714_v8 = vld [vmem:[%s2771_s18 + $0x78] sm:$0xff] }
 0x110   : > { %1156 = vperm.xlu0 %2669, %v2806_v9   ;;  %v462_v9 = vsel %vm430_vm9, 1, %v5635_v4  ;;  %vm553_vm1 = vcmp.eq.s32.totalorder %v3114_v17, %v3055_v48  ;;  %vm437_vm2 = vcmp.eq.s32.totalorder %v3114_v17, %v3040_v44  ;;  %vm438_vm3 = vcmp.eq.s32.totalorder %v3126_v24, %v3040_v44 }
 0x111   : > { %v3647_v18 = vpop.permute.xlu1 %687  ;;  %2572 = vmatpush1.bf16.msra.mxu1 %v2571_v57  ;;  %5665 = vst [vmem:[#allocation56_spill] sm:$0xff] %v3672_v43  ;;  %v3675_v34 = vadd.s32 %v462_v9, %v3327_v47  ;;  %v466_v47 = vsel %vm434_vm13, 1, %v5635_v4  ;;  %vm554_vm4 = vcmp.eq.s32.totalorder %v3126_v24, %v3055_v48  ;;  %v3716_v37 = vadd.s32 %v460_v0, %v5667_v42  ;;  %v5678_v48 = vld [vmem:[#allocation20_spill] sm:$0xff] }
 0x112   : > { %v3658_v46 = vpop.permute.xlu0 %939  ;;  %2573 = vmatprep.subr.bf16.mxu1 %v5640_v59  ;;  %v3719_v57 = vadd.s32 %v465_v39, %v5668_v45  ;;  %v5670_v59 = vld [vmem:[#allocation16_spill] sm:$0xff]  ;;  %v3729_v38 = vadd.s32 %v463_v50, %v5673_v36  ;;  %v3732_v41 = vadd.s32 %v464_v61, %v5674_v32  ;;  %v585_v9 = vsel %vm553_vm1, 1, %v5635_v4  ;;  %v5676_v50 = vld [vmem:[#allocation17_spill] sm:$0xff]  ;;  %v5679_v36 = vld [vmem:[#allocation18_spill] sm:$0xff] }
 0x113   : > { %2653 = vset.pattern.permute.xlu1 %v5636_v53  ;;  %5666 = vst [vmem:[#allocation57_spill] sm:$0xff] %v3675_v34  ;;  %vm435_vm5 = vcmp.eq.s32.totalorder %v3114_v17, %v5670_v59  ;;  %vm436_vm6 = vcmp.eq.s32.totalorder %v3126_v24, %v5670_v59  ;;  %v469_v0 = vsel %vm437_vm2, 1, %v5635_v4  ;;  %v470_v39 = vsel %vm438_vm3, 1, %v5635_v4  ;;  %v5680_v59 = vld [vmem:[#allocation43_spill] sm:$0xff] }
 0x114   : > { %1250 = vperm.xlu1 %2653, %v2841_v23   ;;  %1159 = vperm.xlu0 %2669, %v2817_v12   ;;  %v3705_v12 = vadd.s32 %v459_v60, %v3337_v62  ;;  %5669 = vst [vmem:[#allocation36_spill] sm:$0xff] %v3719_v57  ;;  %v5671_v62 = vld [vmem:[#allocation40_spill] sm:$0xff]  ;;  %v5675_v60 = vld [vmem:[#allocation2_spill] sm:$0xff]  ;;  %vm697_vm7 = vcmp.eq.s32.totalorder %v3114_v17, %v5676_v50  ;;  %v5677_v61 = vmov 0.0   ;;  %v467_v42 = vsel %vm435_vm5, 1, %v5635_v4 }
 0x115   : > { %v3701_v6 = vpop.permute.xlu1 %693  ;;  %2575 = vmatpush1.bf16.msra.mxu1 %v2574_v20  ;;  %v3726_v58 = vadd.s32 %v466_v47, %v5671_v62  ;;  %v2515_v20 = vld [vmem:[%s5525_s2 + $0x108] sm:$0xf]  ;;  %v586_v47 = vsel %vm554_vm4, 1, %v5635_v4  ;;  %v468_v44 = vsel %vm436_vm6, 1, %v5635_v4  ;;  %vm698_vm8 = vcmp.eq.s32.totalorder %v3126_v24, %v5676_v50  ;;  %v2713_v57 = vld [vmem:[%s2771_s18 + $0x70] sm:$0xff] }
 0x116   : > { %v3713_v49 = vpop.permute.xlu0 %948  ;;  %2095 = vmatprep.subr.mxu1 %v5677_v61  ;;  %vm559_vm9 = vcmp.eq.s32.totalorder %v3114_v17, %v5678_v48  ;;  %v617_v62 = vadd.s32 %v585_v9, %v3451_v28  ;;  %vm555_vm10 = vcmp.eq.s32.totalorder %v3114_v17, %v5679_v36  ;;  %vm556_vm11 = vcmp.eq.s32.totalorder %v3126_v24, %v5679_v36  ;;  %v2711_v9 = vld [vmem:[%s2771_s18 + $0x60] sm:$0xff] }
 0x117   : > { %5672 = vst [vmem:[#allocation37_spill] sm:$0xff] %v3726_v58  ;;  %vm560_vm12 = vcmp.eq.s32.totalorder %v3126_v24, %v5678_v48  ;;  %v3784_v32 = vadd.s32 %v469_v0, %v5680_v59  ;;  %v729_v28 = vsel %vm697_vm7, 1, %v5635_v4  ;;  %v3796_v36 = vadd.s32 %v467_v42, %v3433_v63  ;;  %v5685_v42 = vld [vmem:[#allocation19_spill] sm:$0xff]  ;;  %v5686_v59 = vld [vmem:[#allocation21_spill] sm:$0xff] }
 0x118   : > { %2654 = vset.pattern.permute.xlu1 %v5592_v15  ;;  %1162 = vperm.xlu0 %2669, %v5675_v60   ;;  %v5682_v60 = vld [vmem:[#allocation44_spill] sm:$0xff]  ;;  %v618_v15 = vadd.s32 %v586_v47, %v3465_v29  ;;  %v730_v0 = vsel %vm698_vm8, 1, %v5635_v4  ;;  %v591_v29 = vsel %vm559_vm9, 1, %v5635_v4  ;;  %v587_v47 = vsel %vm555_vm10, 1, %v5635_v4 }
 0x119   : > { %1820 = vperm.xlu1 %2654, %v2833_v19   ;;  %2516 = vmatpush1.msk.msra.mxu1 %vm2059_vm0, %v2515_v20  ;;  %5681 = vst [vmem:[#allocation16_spill] sm:$0xff] %v3784_v32  ;;  %v3787_v61 = vadd.s32 %v470_v39, %v5682_v60  ;;  %v3799_v20 = vadd.s32 %v468_v44, %v3448_v51  ;;  %v5684_v39 = vmov 6   ;;  %v588_v63 = vsel %vm556_vm11, 1, %v5635_v4  ;;  %v5687_v32 = vld [vmem:[#allocation22_spill] sm:$0xff] }
 0x11a   : > { %v3771_v19 = vpop.permute.xlu1 %795  ;;  %v3773_v45 = vpop.permute.xlu0 %954  ;;  %v592_v51 = vsel %vm560_vm12, 1, %v5635_v4  ;;  %vm703_vm0 = vcmp.eq.s32.totalorder %v3114_v17, %v5685_v42  ;;  %v3820_v48 = vadd.s32 %v729_v28, %v617_v62  ;;  %vm704_vm13 = vcmp.eq.s32.totalorder %v3126_v24, %v5685_v42  ;;  %v2712_v62 = vld [vmem:[%s2771_s18 + $0x68] sm:$0xff] }
 0x11b   : > { %5683 = vst [vmem:[#allocation40_spill] sm:$0xff] %v3787_v61  ;;  %vm707_vm14 = vcmp.eq.s32.totalorder %v3114_v17, %v5686_v59  ;;  %vm708_vm15 = vcmp.eq.s32.totalorder %v3126_v24, %v5686_v59  ;;  %v3828_v60 = vadd.s32 %v730_v0, %v618_v15  ;;  %vm563_vm1 = vcmp.eq.s32.totalorder %v3114_v17, %v5687_v32 }
 0x11c   : > { %1165 = vperm.xlu0 %2669, %v2711_v9   ;;  %v623_v9 = vadd.s32 %v591_v29, %v3557_v25  ;;  %vm564_vm2 = vcmp.eq.s32.totalorder %v3126_v24, %v5687_v32  ;;  %v3837_v28 = vadd.s32 %v587_v47, %v3520_v27  ;;  %v3840_v61 = vadd.s32 %v588_v63, %v3533_v13  ;;  %v5688_v29 = vld [vmem:[#allocation24_spill] sm:$0xff]  ;;  %v5689_v63 = vld [vmem:[#allocation23_spill] sm:$0xff] }
 0x11d   : > { %2655 = vset.pattern.permute.xlu1 %v5684_v39  ;;  %v624_v59 = vadd.s32 %v592_v51, %v3578_v35  ;;  %v735_v15 = vsel %vm703_vm0, 1, %v5635_v4  ;;  %v736_v25 = vsel %vm704_vm13, 1, %v5635_v4  ;;  %v739_v32 = vsel %vm707_vm14, 1, %v5635_v4  ;;  %v5690_v51 = vld [vmem:[#allocation5_spill] sm:$0xff] }
 0x11e   : > { %v3815_v44 = vpop.permute.xlu1 %798  ;;  %1394 = vperm.xlu1 %2655, %v2841_v23   ;;  %v3818_v50 = vpop.permute.xlu0 %960  ;;  %v740_v0 = vsel %vm708_vm15, 1, %v5635_v4  ;;  %vm567_vm3 = vcmp.eq.s32.totalorder %v3114_v17, %v5688_v29  ;;  %v595_v35 = vsel %vm563_vm1, 1, %v5635_v4  ;;  %v596_v47 = vsel %vm564_vm2, 1, %v5635_v4 }
 0x11f   : > { %vm568_vm4 = vcmp.eq.s32.totalorder %v3126_v24, %v5688_v29  ;;  %vm711_vm5 = vcmp.eq.s32.totalorder %v3114_v17, %v5689_v63  ;;  %v3864_v42 = vadd.s32 %v735_v15, %v623_v9  ;;  %vm712_vm6 = vcmp.eq.s32.totalorder %v3126_v24, %v5689_v63  ;;  %v5692_v9 = vld [vmem:[#allocation28_spill] sm:$0xff] }
 0x120   : > { %1168 = vperm.xlu0 %2669, %v2712_v62   ;;  %v5691_v62 = vld [vmem:[#allocation26_spill] sm:$0xff]  ;;  %v3873_v58 = vadd.s32 %v736_v25, %v624_v59  ;;  %v599_v34 = vsel %vm567_vm3, 1, %v5635_v4  ;;  %vm575_vm9 = vcmp.eq.s32.totalorder %v3114_v17, %v5692_v9  ;;  %vm576_vm10 = vcmp.eq.s32.totalorder %v3126_v24, %v5692_v9  ;;  %v5693_v9 = vld [vmem:[#allocation25_spill] sm:$0xff] }
 0x121   : > { %vm571_vm7 = vcmp.eq.s32.totalorder %v3114_v17, %v5691_v62  ;;  %vm572_vm8 = vcmp.eq.s32.totalorder %v3126_v24, %v5691_v62  ;;  %v627_v15 = vadd.s32 %v595_v35, %v3604_v31  ;;  %v628_v63 = vadd.s32 %v596_v47, %v3607_v30 }
 0x122   : > { %v3852_v27 = vpop.permute.xlu1 %804  ;;  %2656 = vset.pattern.permute.xlu1 %v5636_v53  ;;  %v3855_v13 = vpop.permute.xlu0 %966  ;;  %v743_v59 = vsel %vm711_vm5, 1, %v5635_v4  ;;  %v744_v29 = vsel %vm712_vm6, 1, %v5635_v4  ;;  %v603_v43 = vsel %vm571_vm7, 1, %v5635_v4  ;;  %v604_v3 = vsel %vm572_vm8, 1, %v5635_v4 }
 0x123   : > { %1253 = vperm.xlu1 %2656, %v5690_v51   ;;  %vm715_vm11 = vcmp.eq.s32.totalorder %v3114_v17, %v5693_v9  ;;  %v5694_v31 = vmov 7   ;;  %v631_v30 = vadd.s32 %v599_v34, %v3661_v55  ;;  %vm716_vm12 = vcmp.eq.s32.totalorder %v3126_v24, %v5693_v9  ;;  %v5696_v55 = vld [vmem:[#allocation30_spill] sm:$0xff] }
 0x124   : > { %1171 = vperm.xlu0 %2669, %v2713_v57   ;;  %v600_v57 = vsel %vm568_vm4, 1, %v5635_v4  ;;  %v607_v35 = vsel %vm575_vm9, 1, %v5635_v4  ;;  %v608_v47 = vsel %vm576_vm10, 1, %v5635_v4  ;;  %vm719_vm0 = vcmp.eq.s32.totalorder %v3114_v17, %v5695_v56 }
 0x125   : > { %v632_v21 = vadd.s32 %v600_v57, %v3664_v33  ;;  %vm720_vm13 = vcmp.eq.s32.totalorder %v3126_v24, %v5695_v56  ;;  %vm579_vm14 = vcmp.eq.s32.totalorder %v3114_v17, %v5696_v55  ;;  %v635_v34 = vadd.s32 %v603_v43, %v3705_v12  ;;  %v5697_v12 = vld [vmem:[#allocation29_spill] sm:$0xff] }
 0x126   : > { %v3887_v25 = vpop.permute.xlu1 %810  ;;  %v3889_v62 = vpop.permute.xlu0 %972  ;;  %v636_v40 = vadd.s32 %v604_v3, %v3716_v37  ;;  %v747_v1 = vsel %vm715_vm11, 1, %v5635_v4  ;;  %vm580_vm15 = vcmp.eq.s32.totalorder %v3126_v24, %v5696_v55  ;;  %v748_v56 = vsel %vm716_vm12, 1, %v5635_v4  ;;  %v5701_v55 = vld [vmem:[#allocation31_spill] sm:$0xff] }
 0x127   : > { %2657 = vset.pattern.permute.xlu1 %v5694_v31  ;;  %v639_v57 = vadd.s32 %v607_v35, %v3729_v38  ;;  %v640_v43 = vadd.s32 %v608_v47, %v3732_v41  ;;  %vm723_vm1 = vcmp.eq.s32.totalorder %v3114_v17, %v5697_v12  ;;  %v3928_v3 = vadd.s32 %v739_v32, %v627_v15  ;;  %v5699_v15 = vld [vmem:[#allocation3_spill] sm:$0xff] }
 0x128   : > { %1538 = vperm.xlu1 %2657, %v2841_v23   ;;  %1174 = vperm.xlu0 %2669, %v2714_v8   ;;  %v751_v37 = vsel %vm719_vm0, 1, %v5635_v4  ;;  %v752_v2 = vsel %vm720_vm13, 1, %v5635_v4  ;;  %v611_v26 = vsel %vm579_vm14, 1, %v5635_v4  ;;  %v3935_v9 = vadd.s32 %v740_v0, %v628_v63 }
 0x129   : > { %v3937_v38 = vadd.s32 %v743_v59, %v631_v30  ;;  %v3939_v41 = vadd.s32 %v744_v29, %v632_v21  ;;  %v612_v32 = vsel %vm580_vm15, 1, %v5635_v4  ;;  %v3947_v35 = vadd.s32 %v747_v1, %v635_v34  ;;  %v5700_v1 = vld [vmem:[#allocation34_spill] sm:$0xff]  ;;  %v5702_v34 = vld [vmem:[#allocation32_spill] sm:$0xff] }
 0x12a   : > { %v3916_v8 = vpop.permute.xlu1 %816  ;;  %v3918_v33 = vpop.permute.xlu0 %978  ;;  %v3949_v47 = vadd.s32 %v748_v56, %v636_v40  ;;  %vm724_vm2 = vcmp.eq.s32.totalorder %v3126_v24, %v5697_v12  ;;  %v755_v21 = vsel %vm723_vm1, 1, %v5635_v4  ;;  %v3959_v63 = vadd.s32 %v751_v37, %v639_v57  ;;  %v5705_v56 = vld [vmem:[#allocation35_spill] sm:$0xff] }
 0x12b   : > { %v3961_v59 = vadd.s32 %v752_v2, %v640_v43  ;;  %v643_v29 = vadd.s32 %v611_v26, %v3796_v36  ;;  %vm699_vm3 = vcmp.eq.s32.totalorder %v3114_v17, %v5700_v1  ;;  %v644_v30 = vadd.s32 %v612_v32, %v3799_v20  ;;  %v5703_v26 = vld [vmem:[#allocation33_spill] sm:$0xff]  ;;  %v5704_v36 = vld [vmem:[#allocation4_spill] sm:$0xff] }
 0x12c   : > { %2658 = vset.pattern.permute.xlu1 %v5684_v39  ;;  %2702 = vset.pattern.permute.xlu0 %v5698_v54  ;;  %vm839_vm4 = vcmp.eq.s32.totalorder %v3114_v17, %v5701_v55  ;;  %vm840_vm5 = vcmp.eq.s32.totalorder %v3126_v24, %v5701_v55  ;;  %vm700_vm6 = vcmp.eq.s32.totalorder %v3126_v24, %v5700_v1  ;;  %v756_v2 = vsel %vm724_vm2, 1, %v5635_v4 }
 0x12d   : > { %1397 = vperm.xlu1 %2658, %v5690_v51   ;;  %1823 = vperm.xlu0 %2702, %v5699_v15   ;;  %vm695_vm7 = vcmp.eq.s32.totalorder %v3114_v17, %v5702_v34  ;;  %vm696_vm8 = vcmp.eq.s32.totalorder %v3126_v24, %v5702_v34  ;;  %vm845_vm9 = vcmp.eq.s32.totalorder %v3114_v17, %v5703_v26  ;;  %v731_v20 = vsel %vm699_vm3, 1, %v5635_v4  ;;  %v5711_v34 = vld [vmem:[#allocation7_spill] sm:$0xff] }
 0x12e   : > { %v3957_v0 = vpop.permute.xlu1 %822  ;;  %vm846_vm10 = vcmp.eq.s32.totalorder %v3126_v24, %v5703_v26  ;;  %vm849_vm11 = vcmp.eq.s32.totalorder %v3114_v17, %v5705_v56  ;;  %vm850_vm12 = vcmp.eq.s32.totalorder %v3126_v24, %v5705_v56  ;;  %v3994_v43 = vadd.s32 %v755_v21, %v643_v29  ;;  %v5712_v26 = vld [vmem:[#allocation38_spill] sm:$0xff] }
 0x12f   : > { %v3966_v40 = vpop.permute.xlu0 %1247  ;;  %v4000_v12 = vsel %vm839_vm4, 1, %v5635_v4  ;;  %v4006_v37 = vsel %vm840_vm5, 1, %v5635_v4  ;;  %v732_v32 = vsel %vm700_vm6, 1, %v5635_v4  ;;  %v4014_v21 = vadd.s32 %v756_v2, %v644_v30 }
 0x130   : > { %5706 = vst [vmem:[#allocation41_spill] sm:$0xff] %v3994_v43  ;;  %v4020_v29 = vsel %vm695_vm7, 1, %v5635_v4  ;;  %v4026_v55 = vsel %vm696_vm8, 1, %v5635_v4  ;;  %v4032_v1 = vsel %vm845_vm9, 1, %v5635_v4  ;;  %v4035_v30 = vadd.s32 %v731_v20, %v3837_v28  ;;  %v5713_v28 = vld [vmem:[#allocation39_spill] sm:$0xff] }
 0x131   : > { %2659 = vset.pattern.permute.xlu1 %v5650_v14  ;;  %1832 = vperm.xlu0 %2702, %v5704_v36   ;;  %5707 = vst [vmem:[#allocation42_spill] sm:$0xff] %v4032_v1  ;;  %v4038_v2 = vsel %vm846_vm10, 1, %v5635_v4  ;;  %v4041_v36 = vsel %vm849_vm11, 1, %v5635_v4  ;;  %v4044_v56 = vsel %vm850_vm12, 1, %v5635_v4  ;;  %v4048_v43 = vadd.s32 %v732_v32, %v3840_v61  ;;  %v5715_v61 = vld [vmem:[#allocation46_spill] sm:$0xff] }
 0x132   : > { %v3991_v57 = vpop.permute.xlu1 %828  ;;  %1682 = vperm.xlu1 %2659, %v2841_v23   ;;  %5708 = vst [vmem:[#allocation2_spill] sm:$0xff] %v4038_v2  ;;  %5709 = vst [vmem:[#allocation17_spill] sm:$0xff] %v4041_v36  ;;  %vm701_vm0 = vcmp.eq.s32.totalorder %v3114_v17, %v5712_v26  ;;  %vm702_vm13 = vcmp.eq.s32.totalorder %v3126_v24, %v5712_v26  ;;  %vm853_vm14 = vcmp.eq.s32.totalorder %v3114_v17, %v5713_v28  ;;  %v5714_v36 = vld [vmem:[#allocation45_spill] sm:$0xff] }
 0x133   : > { %v4012_v15 = vpop.permute.xlu0 %1256  ;;  %5710 = vst [vmem:[#allocation20_spill] sm:$0xff] %v4044_v56  ;;  %vm705_vm15 = vcmp.eq.s32.totalorder %v3114_v17, %v5714_v36  ;;  %vm706_vm1 = vcmp.eq.s32.totalorder %v3126_v24, %v5714_v36  ;;  %vm854_vm2 = vcmp.eq.s32.totalorder %v3126_v24, %v5713_v28  ;;  %vm857_vm3 = vcmp.eq.s32.totalorder %v3114_v17, %v5715_v61 }
 0x134   : > { %vm709_vm4 = vcmp.eq.s32.totalorder %v3114_v17, %v3476_v5  ;;  %vm710_vm5 = vcmp.eq.s32.totalorder %v3126_v24, %v3476_v5  ;;  %vm858_vm6 = vcmp.eq.s32.totalorder %v3126_v24, %v5715_v61  ;;  %vm861_vm7 = vcmp.eq.s32.totalorder %v3114_v17, %v3479_v52  ;;  %v5719_v5 = vld [vmem:[#allocation6_spill] sm:$0xff] }
 0x135   : > { %1835 = vperm.xlu0 %2702, %v5711_v34   ;;  %v4079_v36 = vsel %vm701_vm0, 1, %v5635_v4  ;;  %v4082_v26 = vsel %vm702_vm13, 1, %v5635_v4  ;;  %v4085_v28 = vsel %vm853_vm14, 1, %v5635_v4  ;;  %vm862_vm8 = vcmp.eq.s32.totalorder %v3126_v24, %v3479_v52 }
 0x136   : > { %v4056_v20 = vpop.permute.xlu1 %834  ;;  %2661 = vset.pattern.permute.xlu1 %v5694_v31  ;;  %5716 = vst [vmem:[#allocation18_spill] sm:$0xff] %v4079_v36  ;;  %5717 = vst [vmem:[#allocation43_spill] sm:$0xff] %v4082_v26  ;;  %v4091_v61 = vsel %vm705_vm15, 1, %v5635_v4  ;;  %v4094_v56 = vsel %vm706_vm1, 1, %v5635_v4  ;;  %v4097_v1 = vsel %vm854_vm2, 1, %v5635_v4  ;;  %v4100_v2 = vsel %vm857_vm3, 1, %v5635_v4 }
 0x137   : > { %1541 = vperm.xlu1 %2661, %v5690_v51   ;;  %5718 = vst [vmem:[#allocation44_spill] sm:$0xff] %v4085_v28  ;;  %5720 = vst [vmem:[#allocation19_spill] sm:$0xff] %v4091_v61  ;;  %v4103_v36 = vsel %vm709_vm4, 1, %v5635_v4  ;;  %v4106_v28 = vsel %vm710_vm5, 1, %v5635_v4  ;;  %v4109_v52 = vsel %vm858_vm6, 1, %v5635_v4  ;;  %v4112_v61 = vsel %vm861_vm7, 1, %v5635_v4 }
 0x138   : > { %v4076_v32 = vpop.permute.xlu0 %1385  ;;  %5721 = vst [vmem:[#allocation21_spill] sm:$0xff] %v4094_v56  ;;  %5722 = vst [vmem:[#allocation22_spill] sm:$0xff] %v4097_v1  ;;  %vm713_vm9 = vcmp.eq.s32.totalorder %v3114_v17, %v3527_v7  ;;  %vm714_vm10 = vcmp.eq.s32.totalorder %v3126_v24, %v3527_v7  ;;  %vm865_vm11 = vcmp.eq.s32.totalorder %v3114_v17, %v3530_v22  ;;  %v5729_v7 = vld [vmem:[#allocation9_spill] sm:$0xff] }
 0x139   : > { %1838 = vperm.xlu0 %2702, %v5719_v5   ;;  %5723 = vst [vmem:[#allocation24_spill] sm:$0xff] %v4100_v2  ;;  %5724 = vst [vmem:[#allocation23_spill] sm:$0xff] %v4103_v36  ;;  %v4122_v2 = vsel %vm862_vm8, 1, %v5635_v4  ;;  %vm717_vm12 = vcmp.eq.s32.totalorder %v3114_v17, %v3588_v10  ;;  %vm718_vm0 = vcmp.eq.s32.totalorder %v3126_v24, %v3588_v10  ;;  %v4153_v10 = vsel %vm865_vm11, 1, %v5635_v4 }
 0x13a   : > { %5725 = vst [vmem:[#allocation5_spill] sm:$0xff] %v4106_v28  ;;  %5726 = vst [vmem:[#allocation26_spill] sm:$0xff] %v4109_v52  ;;  %vm866_vm13 = vcmp.eq.s32.totalorder %v3126_v24, %v3530_v22  ;;  %vm869_vm14 = vcmp.eq.s32.totalorder %v3114_v17, %v3590_v16  ;;  %vm721_vm15 = vcmp.eq.s32.totalorder %v3114_v17, %v3647_v18  ;;  %v4150_v22 = vsel %vm714_vm10, 1, %v5635_v4 }
 0x13b   : > { %5727 = vst [vmem:[#allocation28_spill] sm:$0xff] %v4112_v61  ;;  %v4114_v26 = vpop.permute.xlu1 %936  ;;  %2662 = vset.pattern.permute.xlu1 %v5698_v54  ;;  %5728 = vst [vmem:[#allocation25_spill] sm:$0xff] %v4122_v2  ;;  %vm722_vm1 = vcmp.eq.s32.totalorder %v3126_v24, %v3647_v18  ;;  %vm870_vm2 = vcmp.eq.s32.totalorder %v3126_v24, %v3590_v16  ;;  %vm842_vm3 = vcmp.eq.s32.totalorder %v3126_v24, %v3771_v19 }
 0x13c   : > { %1826 = vperm.xlu1 %2662, %v2841_v23   ;;  %v4127_v52 = vpop.permute.xlu0 %1388  ;;  %v4147_v23 = vsel %vm713_vm9, 1, %v5635_v4  ;;  %5731 = vst [vmem:[#allocation30_spill] sm:$0xff] %v4150_v22  ;;  %5732 = vst [vmem:[#allocation29_spill] sm:$0xff] %v4153_v10  ;;  %vm985_vm4 = vcmp.eq.s32.totalorder %v3114_v17, %v3658_v46  ;;  %v4160_v18 = vsel %vm717_vm12, 1, %v5635_v4  ;;  %v4163_v16 = vsel %vm718_vm0, 1, %v5635_v4 }
 0x13d   : > { %1841 = vperm.xlu0 %2702, %v5729_v7   ;;  %5730 = vst [vmem:[#allocation27_spill] sm:$0xff] %v4147_v23  ;;  %5733 = vst [vmem:[#allocation3_spill] sm:$0xff] %v4160_v18  ;;  %v4166_v2 = vsel %vm866_vm13, 1, %v5635_v4  ;;  %v4169_v23 = vsel %vm869_vm14, 1, %v5635_v4  ;;  %v4175_v22 = vsel %vm721_vm15, 1, %v5635_v4  ;;  %v4178_v1 = vsel %vm722_vm1, 1, %v5635_v4 }
 0x13e   : > { %5734 = vst [vmem:[#allocation34_spill] sm:$0xff] %v4163_v16  ;;  %5735 = vst [vmem:[#allocation31_spill] sm:$0xff] %v4166_v2  ;;  %v4181_v18 = vsel %vm870_vm2, 1, %v5635_v4  ;;  %v874_v16 = vsel %vm842_vm3, 1, %v5635_v4  ;;  %v5740_v2 = vld [vmem:[#allocation8_spill] sm:$0xff]  ;;  %vm725_vm5 = vcmp.eq.s32.totalorder %v3114_v17, %v3701_v6  ;;  %vm986_vm6 = vcmp.eq.s32.totalorder %v3126_v24, %v3658_v46 }
 0x13f   : > { %v4157_v61 = vpop.permute.xlu1 %942  ;;  %5736 = vst [vmem:[#allocation32_spill] sm:$0xff] %v4169_v23  ;;  %5737 = vst [vmem:[#allocation33_spill] sm:$0xff] %v4175_v22  ;;  %v1017_v23 = vsel %vm985_vm4, 1, %v5635_v4  ;;  %vm841_vm7 = vcmp.eq.s32.totalorder %v3114_v17, %v3771_v19  ;;  %vm726_vm8 = vcmp.eq.s32.totalorder %v3126_v24, %v3701_v6  ;;  %vm991_vm9 = vcmp.eq.s32.totalorder %v3114_v17, %v3713_v49 }
 0x140   : > { %2664 = vset.pattern.permute.xlu1 %v5650_v14  ;;  %v4172_v10 = vpop.permute.xlu0 %1391  ;;  %5738 = vst [vmem:[#allocation4_spill] sm:$0xff] %v4178_v1  ;;  %5739 = vst [vmem:[#allocation35_spill] sm:$0xff] %v4181_v18  ;;  %vm992_vm10 = vcmp.eq.s32.totalorder %v3126_v24, %v3713_v49  ;;  %vm843_vm11 = vcmp.eq.s32.totalorder %v3114_v17, %v3815_v44  ;;  %v906_v46 = vadd.s32 %v874_v16, %v3828_v60  ;;  %v5743_v60 = vld [vmem:[#allocation11_spill] sm:$0xff] }
 0x141   : > { %1685 = vperm.xlu1 %2664, %v5690_v51   ;;  %1844 = vperm.xlu0 %2702, %v5740_v2   ;;  %vm844_vm12 = vcmp.eq.s32.totalorder %v3126_v24, %v3815_v44  ;;  %vm995_vm0 = vcmp.eq.s32.totalorder %v3114_v17, %v3773_v45  ;;  %vm996_vm13 = vcmp.eq.s32.totalorder %v3126_v24, %v3773_v45  ;;  %v4216_v22 = vsel %vm725_vm5, 1, %v5635_v4 }
 0x142   : > { %5742 = vst [vmem:[#allocation38_spill] sm:$0xff] %v4216_v22  ;;  %v1018_v1 = vsel %vm986_vm6, 1, %v5635_v4  ;;  %v873_v2 = vsel %vm841_vm7, 1, %v5635_v4  ;;  %vm848_vm14 = vcmp.eq.s32.totalorder %v3126_v24, %v3852_v27  ;;  %v4228_v16 = vsel %vm726_vm8, 1, %v5635_v4 }
 0x143   : > { %v4204_v18 = vpop.permute.xlu1 %945  ;;  %5744 = vst [vmem:[#allocation39_spill] sm:$0xff] %v4228_v16  ;;  %v4234_v22 = vsel %vm991_vm9, 1, %v5635_v4  ;;  %v875_v36 = vsel %vm843_vm11, 1, %v5635_v4  ;;  %vm999_vm15 = vcmp.eq.s32.totalorder %v3114_v17, %v3818_v50  ;;  %v1024_v6 = vsel %vm992_vm10, 1, %v5635_v4 }
 0x144   : > { %v4213_v19 = vpop.permute.xlu0 %1400  ;;  %v876_v16 = vsel %vm844_vm12, 1, %v5635_v4  ;;  %v1028_v28 = vsel %vm996_vm13, 1, %v5635_v4  ;;  %v905_v49 = vadd.s32 %v873_v2, %v3820_v48  ;;  %v4261_v7 = vadd.s32 %v1018_v1, %v906_v46  ;;  %v5746_v1 = vld [vmem:[#allocation10_spill] sm:$0xff] }
 0x145   : > { %5741 = vst [vmem:[#allocation7_spill] sm:$0xff] %v4213_v19  ;;  %2665 = vset.pattern.permute.xlu1 %v5636_v53  ;;  %1847 = vperm.xlu0 %2702, %v5743_v60   ;;  %v4252_v60 = vsel %vm995_vm0, 1, %v5635_v4  ;;  %vm847_vm1 = vcmp.eq.s32.totalorder %v3114_v17, %v3852_v27  ;;  %v880_v44 = vsel %vm848_vm14, 1, %v5635_v4  ;;  %v4270_v19 = vadd.s32 %v875_v36, %v4035_v30 }
 0x146   : > { %1259 = vperm.xlu1 %2665, %v5711_v34   ;;  %5745 = vst [vmem:[#allocation45_spill] sm:$0xff] %v4261_v7  ;;  %vm1000_vm2 = vcmp.eq.s32.totalorder %v3126_v24, %v3818_v50  ;;  %v4275_v45 = vsel %vm999_vm15, 1, %v5635_v4  ;;  %vm852_vm3 = vcmp.eq.s32.totalorder %v3126_v24, %v3887_v25  ;;  %v4283_v2 = vadd.s32 %v876_v16, %v4048_v43  ;;  %v5748_v50 = vld [vmem:[#allocation13_spill] sm:$0xff] }
 0x147   : > { %v4258_v56 = vpop.permute.xlu1 %951  ;;  %vm851_vm4 = vcmp.eq.s32.totalorder %v3114_v17, %v3887_v25  ;;  %vm1003_vm5 = vcmp.eq.s32.totalorder %v3114_v17, %v3855_v13  ;;  %vm856_vm6 = vcmp.eq.s32.totalorder %v3126_v24, %v3916_v8  ;;  %v879_v27 = vsel %vm847_vm1, 1, %v5635_v4 }
 0x148   : > { %v912_v30 = vadd.s32 %v880_v44, %v3873_v58  ;;  %vm1004_vm7 = vcmp.eq.s32.totalorder %v3126_v24, %v3855_v13  ;;  %vm855_vm8 = vcmp.eq.s32.totalorder %v3114_v17, %v3916_v8  ;;  %v1032_v25 = vsel %vm1000_vm2, 1, %v5635_v4 }
 0x149   : > { %v4279_v48 = vpop.permute.xlu0 %1535  ;;  %1850 = vperm.xlu0 %2702, %v5746_v1   ;;  %v884_v36 = vsel %vm852_vm3, 1, %v5635_v4  ;;  %vm859_vm9 = vcmp.eq.s32.totalorder %v3114_v17, %v3957_v0  ;;  %vm860_vm10 = vcmp.eq.s32.totalorder %v3126_v24, %v3957_v0  ;;  %v883_v58 = vsel %vm851_vm4, 1, %v5635_v4 }
 0x14a   : > { %2667 = vset.pattern.permute.xlu1 %v5698_v54  ;;  %v888_v46 = vsel %vm856_vm6, 1, %v5635_v4  ;;  %v4315_v44 = vadd.s32 %v1017_v23, %v905_v49  ;;  %v911_v1 = vadd.s32 %v879_v27, %v3864_v42  ;;  %v1036_v0 = vsel %vm1004_vm7, 1, %v5635_v4 }
 0x14b   : > { %v4298_v43 = vpop.permute.xlu1 %957  ;;  %1829 = vperm.xlu1 %2667, %v5690_v51   ;;  %v887_v23 = vsel %vm855_vm8, 1, %v5635_v4  ;;  %v4331_v49 = vadd.s32 %v1024_v6, %v912_v30  ;;  %v916_v51 = vadd.s32 %v884_v36, %v3935_v9  ;;  %v891_v42 = vsel %vm859_vm9, 1, %v5635_v4  ;;  %v5749_v9 = vld [vmem:[#allocation12_spill] sm:$0xff] }
 0x14c   : > { %5747 = vst [vmem:[#allocation46_spill] sm:$0xff] %v4298_v43  ;;  %v1035_v43 = vsel %vm1003_vm5, 1, %v5635_v4  ;;  %v892_v27 = vsel %vm860_vm10, 1, %v5635_v4  ;;  %v915_v13 = vadd.s32 %v883_v58, %v3928_v3  ;;  %v920_v7 = vadd.s32 %v888_v46, %v3939_v41 }
 0x14d   : > { %v4312_v16 = vpop.permute.xlu0 %1544  ;;  %1853 = vperm.xlu0 %2702, %v5748_v50   ;;  %vm1007_vm11 = vcmp.eq.s32.totalorder %v3114_v17, %v3889_v62  ;;  %vm1008_vm12 = vcmp.eq.s32.totalorder %v3126_v24, %v3889_v62  ;;  %v919_v8 = vadd.s32 %v887_v23, %v3937_v38  ;;  %vm863_vm0 = vcmp.eq.s32.totalorder %v3114_v17, %v3991_v57 }
 0x14e   : > { %vm864_vm13 = vcmp.eq.s32.totalorder %v3126_v24, %v3991_v57  ;;  %v923_v41 = vadd.s32 %v891_v42, %v3947_v35  ;;  %v924_v6 = vadd.s32 %v892_v27, %v3949_v47  ;;  %vm1012_vm14 = vcmp.eq.s32.totalorder %v3126_v24, %v3918_v33  ;;  %v5752_v42 = vld [vmem:[#allocation14_spill] sm:$0xff] }
 0x14f   : > { %v4336_v50 = vpop.permute.xlu1 %963  ;;  %2668 = vset.pattern.permute.xlu1 %v5684_v39  ;;  %v4360_v38 = vadd.s32 %v4234_v22, %v911_v1  ;;  %v4362_v30 = vadd.s32 %v1028_v28, %v916_v51  ;;  %v1039_v57 = vsel %vm1007_vm11, 1, %v5635_v4  ;;  %v1040_v36 = vsel %vm1008_vm12, 1, %v5635_v4 }
 0x150   : > { %1403 = vperm.xlu1 %2668, %v5711_v34   ;;  %v4369_v46 = vadd.s32 %v1032_v25, %v920_v7  ;;  %v895_v47 = vsel %vm863_vm0, 1, %v5635_v4  ;;  %v896_v23 = vsel %vm864_vm13, 1, %v5635_v4  ;;  %v4375_v22 = vadd.s32 %v4252_v60, %v915_v13 }
 0x151   : > { %1856 = vperm.xlu0 %2702, %v5749_v9   ;;  %v4378_v28 = vsel %vm1012_vm14, 1, %v5635_v4  ;;  %vm1292_vm15 = vcmp.eq.s32.totalorder %v3114_v17, %v3966_v40  ;;  %vm1293_vm1 = vcmp.eq.s32.totalorder %v3126_v24, %v3966_v40  ;;  %v4386_v7 = vadd.s32 %v4275_v45, %v919_v8  ;;  %v5774_v9 = vld [vmem:[#allocation21_spill] sm:$0xff] }
 0x152   : > { %v4357_v62 = vpop.permute.xlu0 %1679  ;;  %5750 = vst [vmem:[#allocation6_spill] sm:$0xff] %v4378_v28  ;;  %v4389_v1 = vadd.s32 %v1036_v0, %v924_v6  ;;  %vm1298_vm2 = vcmp.eq.s32.totalorder %v3114_v17, %v4012_v15  ;;  %v4396_v51 = vadd.s32 %v1035_v43, %v923_v41  ;;  %v927_v27 = vadd.s32 %v895_v47, %v3959_v63  ;;  %v5762_v28 = vld [vmem:[#allocation7_spill] sm:$0xff] }
 0x153   : > { %v4366_v58 = vpop.permute.xlu1 %969  ;;  %v928_v45 = vadd.s32 %v896_v23, %v3961_v59  ;;  %vm868_vm3 = vcmp.eq.s32.totalorder %v3126_v24, %v4056_v20  ;;  %vm1299_vm4 = vcmp.eq.s32.totalorder %v3126_v24, %v4012_v15  ;;  %v4411_v43 = vsel %vm1292_vm15, 1, %v5635_v4 }
 0x154   : > { %2670 = vset.pattern.permute.xlu1 %v5636_v53  ;;  %5751 = vst [vmem:[#allocation58_spill] sm:$0xff] %v4396_v51  ;;  %v4417_v63 = vsel %vm1293_vm1, 1, %v5635_v4  ;;  %vm867_vm5 = vcmp.eq.s32.totalorder %v3114_v17, %v4056_v20  ;;  %v4424_v15 = vsel %vm1298_vm2, 1, %v5635_v4  ;;  %v900_v40 = vsel %vm868_vm3, 1, %v5635_v4 }
 0x155   : > { %1262 = vperm.xlu1 %2670, %v5719_v5   ;;  %2707 = vset.pattern.permute.xlu0 %v5694_v31  ;;  %v4431_v6 = vsel %vm1299_vm4, 1, %v5635_v4  ;;  %vm1432_vm6 = vcmp.eq.s32.totalorder %v3114_v17, %v4076_v32  ;;  %v4438_v23 = vadd.s32 %v1040_v36, %v928_v45  ;;  %vm1433_vm7 = vcmp.eq.s32.totalorder %v3126_v24, %v4076_v32 }
 0x156   : > { %v4393_v60 = vpop.permute.xlu0 %1688  ;;  %1574 = vperm.xlu0 %2707, %v5752_v42   ;;  %v4445_v59 = vadd.s32 %v1039_v57, %v927_v27  ;;  %v4452_v47 = vsel %vm867_vm5, 1, %v5635_v4  ;;  %vm988_vm8 = vcmp.eq.s32.totalorder %v3126_v24, %v4157_v61  ;;  %v4459_v36 = vadd.s32 %v900_v40, %v4014_v21  ;;  %v5758_v21 = vld [vmem:[#allocation47_spill] sm:$0xff] }
 0x157   : > { %v4405_v0 = vpop.permute.xlu1 %975  ;;  %5753 = vst [vmem:[#allocation59_spill] sm:$0xff] %v4438_v23  ;;  %5756 = vst [vmem:[#allocation62_spill] sm:$0xff] %v4452_v47  ;;  %v4465_v57 = vsel %vm1432_vm6, 1, %v5635_v4  ;;  %v4470_v45 = vsel %vm1433_vm7, 1, %v5635_v4  ;;  %vm987_vm11 = vcmp.eq.s32.totalorder %v3114_v17, %v4157_v61  ;;  %vm983_vm12 = vcmp.eq.s32.totalorder %v3114_v17, %v4114_v26 }
 0x158   : > { %5755 = vst [vmem:[#allocation61_spill] sm:$0xff] %v4445_v59  ;;  %5757 = vst [vmem:[#allocation63_spill] sm:$0xff] %v4459_v36  ;;  %vm984_vm0 = vcmp.eq.s32.totalorder %v3126_v24, %v4114_v26  ;;  %v1020_v32 = vsel %vm988_vm8, 1, %v5635_v4  ;;  %vm1434_vm13 = vcmp.eq.s32.totalorder %v3114_v17, %v4127_v52  ;;  %vm1435_vm14 = vcmp.eq.s32.totalorder %v3126_v24, %v4127_v52  ;;  %v5763_v36 = vld [vmem:[#allocation43_spill] sm:$0xff] }
 0x159   : > { %2671 = vset.pattern.permute.xlu1 %v5694_v31  ;;  %vm1436_vm1 = vcmp.eq.s32.totalorder %v3114_v17, %v4172_v10  ;;  %vm1437_vm2 = vcmp.eq.s32.totalorder %v3126_v24, %v4172_v10  ;;  %v1015_v25 = vsel %vm983_vm12, 1, %v5635_v4  ;;  %vm2010_vm4 = vcmask 31744  }
 0x15a   : > { %1547 = vperm.xlu1 %2671, %v5711_v34   ;;  %2710 = vset.pattern.permute.xlu0 %v5698_v54  ;;  %v4511_v10 = vsel %vm1435_vm14, 1, %v5635_v4  ;;  %v1469_v13 = vsel %vm1437_vm2, 1, %v5635_v4  ;;  %vm989_vm7 = vcmp.eq.s32.totalorder %v3114_v17, %v4204_v18  ;;  %vm990_vm8 = vcmp.eq.s32.totalorder %v3126_v24, %v4204_v18 }
 0x15b   : > { %v4442_v41 = vpop.permute.xlu1 %981  ;;  %v505_v8 = vpop.permute.xlu0 %504  ;;  %1862 = vperm.xlu0 %2710, %v5752_v42   ;;  %vm993_vm12 = vcmp.eq.s32.totalorder %v3114_v17, %v4258_v56  ;;  %vm1580_vm14 = vcmp.eq.s32.totalorder %v3114_v17, %v4279_v48 }
 0x15c   : > { %5754 = vst [vmem:[#allocation60_spill] sm:$0xff] %v4442_v41  ;;  %vm551_vm9 = vcmp.eq.s32.totalorder %v3114_v17, %v505_v8  ;;  %vm552_vm10 = vcmp.eq.s32.totalorder %v3126_v24, %v505_v8  ;;  %v1021_v41 = vsel %vm989_vm7, 1, %v5635_v4 }
 0x15d   : > { %v583_v20 = vsel %vm551_vm9, 1, %v5635_v4  ;;  %v584_v27 = vsel %vm552_vm10, 1, %v5635_v4  ;;  %vm1442_vm10 = vcmp.eq.s32.totalorder %v3114_v17, %v5762_v28 }
 0x15e   : > { %v615_v8 = vadd.s32 %v583_v20, %v3468_v11  ;;  %v616_v40 = vadd.s32 %v584_v27, %v5758_v21  ;;  %2672 = vset.pattern.permute.xlu1 %v5684_v39  ;;  %v1019_v21 = vsel %vm987_vm11, 1, %v5635_v4 }
 0x15f   : > { %1406 = vperm.xlu1 %2672, %v5719_v5   ;;  %v514_v61 = vpop.permute.xlu0 %513  ;;  %v4524_v3 = vadd.s32 %v1019_v21, %v4270_v19 }
 0x160   : > { %v759_v11 = vadd.s32 %v4020_v29, %v615_v8  ;;  %v760_v20 = vadd.s32 %v4026_v55, %v616_v40  ;;  %vm558_vm15 = vcmp.eq.s32.totalorder %v3126_v24, %v514_v61  ;;  %v4490_v27 = vpop.permute.xlu1 %1132  ;;  %v4500_v29 = vadd.s32 %v1020_v32, %v4283_v2 }
 0x161   : > { %vm557_vm3 = vcmp.eq.s32.totalorder %v3114_v17, %v514_v61  ;;  %v590_v55 = vsel %vm558_vm15, 1, %v5635_v4  ;;  %v4508_v8 = vsel %vm1434_vm13, 1, %v5635_v4  ;;  %v1016_v32 = vsel %vm984_vm0, 1, %v5635_v4 }
 0x162   : > { %v904_v2 = vadd.s32 %v4006_v37, %v760_v20  ;;  %v1468_v61 = vsel %vm1436_vm1, 1, %v5635_v4  ;;  %v903_v35 = vadd.s32 %v4000_v12, %v759_v11  ;;  %v589_v54 = vsel %vm557_vm3, 1, %v5635_v4  ;;  %v5759_v37 = vld [vmem:[#allocation49_spill] sm:$0xff] }
 0x163   : > { %2673 = vset.pattern.permute.xlu1 %v5650_v14  ;;  %v520_v40 = vpop.permute.xlu0 %519  ;;  %v622_v20 = vadd.s32 %v590_v55, %v5759_v37  ;;  %v5760_v55 = vld [vmem:[#allocation48_spill] sm:$0xff]  ;;  %vm994_vm0 = vcmp.eq.s32.totalorder %v3126_v24, %v4258_v56  ;;  %vm1443_vm13 = vcmp.eq.s32.totalorder %v3126_v24, %v5762_v28  ;;  %vm1581_vm1 = vcmp.eq.s32.totalorder %v3126_v24, %v4279_v48  ;;  %v5770_v28 = vld [vmem:[#allocation45_spill] sm:$0xff]  ;;  %v5773_v48 = vld [vmem:[#allocation42_spill] sm:$0xff] }
 0x164   : > { %1691 = vperm.xlu1 %2673, %v5711_v34   ;;  %v1136_v52 = vpop.permute.xlu1 %1135  ;;  %vm562_vm9 = vcmp.eq.s32.totalorder %v3126_v24, %v520_v40  ;;  %v1048_v21 = vadd.s32 %v1016_v32, %v904_v2  ;;  %v1047_v42 = vadd.s32 %v1015_v25, %v903_v35  ;;  %v5764_v2 = vld [vmem:[#allocation9_spill] sm:$0xff]  ;;  %vm561_vm11 = vcmp.eq.s32.totalorder %v3114_v17, %v520_v40 }
 0x165   : > { %vm1180_vm5 = vcmp.eq.s32.totalorder %v3114_v17, %v1136_v52  ;;  %vm1181_vm6 = vcmp.eq.s32.totalorder %v3126_v24, %v1136_v52  ;;  %v621_v52 = vadd.s32 %v589_v54, %v5760_v55  ;;  %v1022_v54 = vsel %vm990_vm8, 1, %v5635_v4  ;;  %v5768_v55 = vld [vmem:[#allocation51_spill] sm:$0xff] }
 0x166   : > { %v1212_v12 = vsel %vm1180_vm5, 1, %v5635_v4  ;;  %v1213_v34 = vsel %vm1181_vm6, 1, %v5635_v4  ;;  %v594_v35 = vsel %vm562_vm9, 1, %v5635_v4  ;;  %v1079_v32 = vcvt.s32.f32 %v1047_v42 }
 0x167   : > { %v1356_v19 = vadd.s32 %v4411_v43, %v1212_v12  ;;  %v526_v11 = vpop.permute.xlu0 %525  ;;  %v1357_v37 = vadd.s32 %v4417_v63, %v1213_v34  ;;  %v766_v43 = vadd.s32 %v5763_v36, %v622_v20  ;;  %v1080_v63 = vcvt.s32.f32 %v1048_v21  ;;  %v5767_v20 = vld [vmem:[#allocation2_spill] sm:$0xff] }
 0x168   : > { %2674 = vset.pattern.permute.xlu1 %v5636_v53  ;;  %v4542_v26 = vpop.permute.xlu1 %1141  ;;  %v4571_v36 = vsel %vm1442_vm10, 1, %v5635_v4  ;;  %vm566_vm15 = vcmp.eq.s32.totalorder %v3126_v24, %v526_v11  ;;  %v4588_v21 = vsel %vm993_vm12, 1, %v5635_v4  ;;  %v1026_v42 = vsel %vm994_vm0, 1, %v5635_v4 }
 0x169   : > { %5761 = vst [vmem:[#allocation47_spill] sm:$0xff] %v4542_v26  ;;  %v4549_v12 = vadd.s32 %v1468_v61, %v1356_v19  ;;  %1265 = vperm.xlu1 %2674, %v5764_v2   ;;  %v4560_v25 = vadd.s32 %v1469_v13, %v1357_v37  ;;  %v5765_v13 = vld [vmem:[#allocation18_spill] sm:$0xff]  ;;  %v910_v34 = vadd.s32 %v5767_v20, %v766_v43  ;;  %v593_v19 = vsel %vm561_vm11, 1, %v5635_v4 }
 0x16a   : > { %v765_v40 = vadd.s32 %v5765_v13, %v621_v52  ;;  %v626_v37 = vadd.s32 %v594_v35, %v5768_v55  ;;  %2534 = vmatprep.mubr.msk.f32.mxu0 %vm2010_vm4, %v1080_v63  ;;  %v4598_v52 = vsel %vm1443_vm13, 1, %v5635_v4  ;;  %v5769_v43 = vld [vmem:[#allocation46_spill] sm:$0xff]  ;;  %v4611_v56 = vsel %vm1580_vm14, 1, %v5635_v4 }
 0x16b   : > { %v4568_v18 = vpop.permute.xlu0 %531  ;;  %2324 = vmatmul.mubr.f32.vlgmr.msra.gmra.mrb[0].mxu0 %v1079_v32  ;;  %vm997_vm2 = vcmp.eq.s32.totalorder %v3114_v17, %v5769_v43  ;;  %vm998_vm3 = vcmp.eq.s32.totalorder %v3126_v24, %v5769_v43  ;;  %vm1586_vm5 = vcmp.eq.s32.totalorder %v3114_v17, %v4312_v16  ;;  %v5771_v35 = vcvt.s32.f32 %v5770_v28  ;;  %v5772_v13 = vld [vmem:[#allocation50_spill] sm:$0xff] }
 0x16c   : > { %v4576_v61 = vpop.permute.xlu1 %1147  ;;  %v625_v32 = vadd.s32 %v593_v19, %v5772_v13  ;;  %vm565_vm6 = vcmp.eq.s32.totalorder %v3114_v17, %v526_v11  ;;  %v598_v20 = vsel %vm566_vm15, 1, %v5635_v4  ;;  %v909_v55 = vadd.s32 %v5773_v48, %v765_v40  ;;  %v5776_v40 = vld [vmem:[#allocation53_spill] sm:$0xff]  ;;  %v5778_v48 = vld [vmem:[#allocation19_spill] sm:$0xff] }
 0x16d   : > { %5766 = vst [vmem:[#allocation49_spill] sm:$0xff] %v4576_v61  ;;  %2675 = vset.pattern.permute.xlu1 %v5694_v31  ;;  %2535 = vmatprep.mubr.msk.f32.mxu0 %vm2010_vm4, %v5771_v35  ;;  %v4627_v43 = vsel %vm1581_vm1, 1, %v5635_v4  ;;  %v770_v61 = vadd.s32 %v5774_v9, %v626_v37  ;;  %vm570_vm7 = vcmp.eq.s32.totalorder %v3126_v24, %v4568_v18  ;;  %v4633_v19 = vsel %vm997_vm2, 1, %v5635_v4 }
 0x16e   : > { %1550 = vperm.xlu1 %2675, %v5719_v5   ;;  %v1054_v35 = vadd.s32 %v1022_v54, %v910_v34  ;;  %v4636_v13 = vsel %vm998_vm3, 1, %v5635_v4  ;;  %vm1001_vm8 = vcmp.eq.s32.totalorder %v3114_v17, %v4336_v50  ;;  %vm1587_vm9 = vcmp.eq.s32.totalorder %v3126_v24, %v4312_v16 }
 0x16f   : > { %v4618_v63 = vpop.permute.xlu0 %537  ;;  %v5775_v11 = vcvt.s32.f32 %v4315_v44  ;;  %vm1002_vm10 = vcmp.eq.s32.totalorder %v3126_v24, %v4336_v50  ;;  %v4650_v9 = vsel %vm1586_vm5, 1, %v5635_v4  ;;  %v597_v54 = vsel %vm565_vm6, 1, %v5635_v4 }
 0x170   : > { %v630_v34 = vadd.s32 %v598_v20, %v5776_v40  ;;  %v5777_v37 = vcvt.s32.f32 %v4500_v29  ;;  %vm569_vm11 = vcmp.eq.s32.totalorder %v3114_v17, %v4568_v18  ;;  %v602_v16 = vsel %vm570_vm7, 1, %v5635_v4 }
 0x171   : > { %v1242_v28 = vpop.permute.xlu1 %1241  ;;  %2329 = vmatmul.mubr.f32.gmra.mrb[2].mxu0 %v5775_v11  ;;  %v769_v11 = vadd.s32 %v5778_v48, %v625_v32  ;;  %v1053_v20 = vadd.s32 %v1021_v41, %v909_v55  ;;  %v4669_v29 = vsel %vm1001_vm8, 1, %v5635_v4  ;;  %v4672_v40 = vsel %vm1587_vm9, 1, %v5635_v4  ;;  %v5780_v41 = vld [vmem:[#allocation52_spill] sm:$0xff] }
 0x172   : > { %2536 = vmatprep.mubr.msk.f32.mxu0 %vm2010_vm4, %v5777_v37  ;;  %2676 = vset.pattern.permute.xlu1 %v5684_v39  ;;  %v5779_v37 = vld [vmem:[#allocation20_spill] sm:$0xff]  ;;  %v1086_v32 = vcvt.s32.f32 %v1054_v35  ;;  %v4681_v59 = vsel %vm1002_vm10, 1, %v5635_v4  ;;  %vm1724_vm12 = vcmp.eq.s32.totalorder %v3114_v17, %v4357_v62  ;;  %vm1725_vm0 = vcmp.eq.s32.totalorder %v3126_v24, %v4357_v62 }
 0x173   : > { %v4658_v44 = vpop.permute.xlu0 %543  ;;  %1409 = vperm.xlu1 %2676, %v5764_v2   ;;  %v914_v26 = vadd.s32 %v5779_v37, %v770_v61  ;;  %v629_v55 = vadd.s32 %v597_v54, %v5780_v41  ;;  %v5781_v23 = vcvt.s32.f32 %v4524_v3  ;;  %vm1005_vm13 = vcmp.eq.s32.totalorder %v3114_v17, %v4366_v58  ;;  %v5782_v61 = vld [vmem:[#allocation5_spill] sm:$0xff]  ;;  %v5783_v37 = vld [vmem:[#allocation55_spill] sm:$0xff]  ;;  %v5788_v41 = vld [vmem:[#allocation54_spill] sm:$0xff] }
 0x174   : > { %v774_v35 = vadd.s32 %v5782_v61, %v630_v34  ;;  %v601_v50 = vsel %vm569_vm11, 1, %v5635_v4  ;;  %v634_v47 = vadd.s32 %v602_v16, %v5783_v37  ;;  %vm1006_vm14 = vcmp.eq.s32.totalorder %v3126_v24, %v4366_v58  ;;  %v5789_v37 = vld [vmem:[#allocation22_spill] sm:$0xff] }
 0x175   : > { %v4675_v48 = vpop.permute.xlu1 %1244  ;;  %2334 = vmatmul.mubr.f32.gmra.mrb[4].mxu0 %v5781_v23  ;;  %vm573_vm15 = vcmp.eq.s32.totalorder %v3114_v17, %v4618_v63  ;;  %v1085_v3 = vcvt.s32.f32 %v1053_v20  ;;  %v5784_v23 = vld [vmem:[#allocation17_spill] sm:$0xff]  ;;  %v4708_v18 = vsel %vm1724_vm12, 1, %v5635_v4  ;;  %v4711_v34 = vsel %vm1725_vm0, 1, %v5635_v4 }
 0x176   : > { %2537 = vmatprep.mubr.msk.f32.mxu0 %vm2010_vm4, %v1086_v32  ;;  %v913_v54 = vadd.s32 %v5784_v23, %v769_v11  ;;  %5785 = vst [vmem:[#allocation48_spill] sm:$0xff] %v4708_v18  ;;  %5786 = vst [vmem:[#allocation7_spill] sm:$0xff] %v4711_v34  ;;  %vm1288_vm1 = vcmp.eq.s32.totalorder %v3114_v17, %v1242_v28  ;;  %v1058_v16 = vadd.s32 %v1026_v42, %v914_v26  ;;  %v5787_v32 = vld [vmem:[#allocation23_spill] sm:$0xff]  ;;  %v5790_v18 = vld [vmem:[#allocation30_spill] sm:$0xff] }
 0x177   : > { %v4699_v62 = vpop.permute.xlu0 %549  ;;  %2677 = vset.pattern.permute.xlu1 %v5650_v14  ;;  %vm1730_vm2 = vcmp.eq.s32.totalorder %v3114_v17, %v4393_v60  ;;  %v773_v20 = vadd.s32 %v5787_v32, %v629_v55  ;;  %v633_v61 = vadd.s32 %v601_v50, %v5788_v41  ;;  %vm1289_vm3 = vcmp.eq.s32.totalorder %v3126_v24, %v1242_v28 }
 0x178   : > { %1694 = vperm.xlu1 %2677, %v5719_v5   ;;  %v918_v23 = vadd.s32 %v5789_v37, %v774_v35  ;;  %v778_v34 = vadd.s32 %v5790_v18, %v634_v47  ;;  %vm574_vm5 = vcmp.eq.s32.totalorder %v3126_v24, %v4618_v63  ;;  %v605_v5 = vsel %vm573_vm15, 1, %v5635_v4 }
 0x179   : > { %2339 = vmatmul.mubr.f32.gmra.mrb[6].mxu0 %v1085_v3  ;;  %v5791_v26 = vcvt.s32.f32 %v4331_v49  ;;  %v1320_v28 = vsel %vm1288_vm1, 1, %v5635_v4  ;;  %v1057_v47 = vadd.s32 %v4588_v21, %v913_v54  ;;  %v1321_v55 = vsel %vm1289_vm3, 1, %v5635_v4  ;;  %v5792_v3 = vld [vmem:[#allocation56_spill] sm:$0xff] }
 0x17a   : > { %v1530_v11 = vpop.permute.xlu1 %1529  ;;  %v1090_v35 = vcvt.s32.f32 %v1058_v16  ;;  %v606_v49 = vsel %vm574_vm5, 1, %v5635_v4  ;;  %v637_v18 = vadd.s32 %v605_v5, %v5792_v3  ;;  %v5793_v32 = vcvt.s32.f32 %v4360_v38 }
 0x17b   : > { %2538 = vmatprep.mubr.msk.f32.mxu0 %vm2010_vm4, %v5791_v26  ;;  %v1130_v42 = vpop.permute.xlu0 %1129  ;;  %v5794_v26 = vld [vmem:[#allocation8_spill] sm:$0xff]  ;;  %v4748_v21 = vsel %vm1005_vm13, 1, %v5635_v4  ;;  %v4754_v54 = vsel %vm1006_vm14, 1, %v5635_v4  ;;  %vm1178_vm8 = vcmp.eq.s32.totalorder %v3114_v17, %v4490_v27  ;;  %v1062_v5 = vadd.s32 %v4636_v13, %v918_v23  ;;  %v5800_v23 = vld [vmem:[#allocation3_spill] sm:$0xff] }
 0x17c   : > { %vm1176_vm6 = vcmp.eq.s32.totalorder %v3114_v17, %v1130_v42  ;;  %vm1177_vm7 = vcmp.eq.s32.totalorder %v3126_v24, %v1130_v42  ;;  %2678 = vset.pattern.permute.xlu1 %v5636_v53  ;;  %vm1576_vm9 = vcmp.eq.s32.totalorder %v3114_v17, %v1530_v11  ;;  %vm1577_vm10 = vcmp.eq.s32.totalorder %v3126_v24, %v1530_v11 }
 0x17d   : > { %v1208_v50 = vsel %vm1176_vm6, 1, %v5635_v4  ;;  %v1209_v63 = vsel %vm1177_vm7, 1, %v5635_v4  ;;  %2344 = vmatmul.mubr.f32.gmra.mrb[8].mxu0 %v5793_v32  ;;  %1268 = vperm.xlu1 %2678, %v5794_v26   ;;  %v1089_v42 = vcvt.s32.f32 %v1057_v47  ;;  %v4769_v58 = vsel %vm1730_vm2, 1, %v5635_v4  ;;  %v5799_v32 = vld [vmem:[#allocation57_spill] sm:$0xff] }
 0x17e   : > { %v1352_v41 = vadd.s32 %v1320_v28, %v1208_v50  ;;  %v1353_v37 = vadd.s32 %v1321_v55, %v1209_v63  ;;  %2539 = vmatprep.mubr.msk.f32.mxu0 %vm2010_vm4, %v1090_v35  ;;  %v5796_v28 = vld [vmem:[#allocation44_spill] sm:$0xff]  ;;  %v5797_v50 = vld [vmem:[#allocation27_spill] sm:$0xff]  ;;  %v5798_v63 = vld [vmem:[#allocation26_spill] sm:$0xff]  ;;  %v4775_v13 = vsel %vm1178_vm8, 1, %v5635_v4  ;;  %v4778_v51 = vadd.s32 %v5800_v23, %v637_v18 }
 0x17f   : > { %v1674_v38 = vpop.permute.xlu1 %1673  ;;  %v4759_v16 = vpop.permute.xlu0 %1138  ;;  %v917_v55 = vadd.s32 %v5796_v28, %v773_v20  ;;  %v777_v35 = vadd.s32 %v5797_v50, %v633_v61  ;;  %v922_v3 = vadd.s32 %v5798_v63, %v778_v34  ;;  %vm577_vm11 = vcmp.eq.s32.totalorder %v3114_v17, %v4658_v44  ;;  %v5803_v63 = vld [vmem:[#allocation34_spill] sm:$0xff] }
 0x180   : > { %5795 = vst [vmem:[#allocation43_spill] sm:$0xff] %v4759_v16  ;;  %v638_v16 = vadd.s32 %v606_v49, %v5799_v32  ;;  %v1496_v20 = vadd.s32 %v4465_v57, %v1352_v41  ;;  %v1497_v47 = vadd.s32 %v4470_v45, %v1353_v37  ;;  %vm578_vm12 = vcmp.eq.s32.totalorder %v3126_v24, %v4658_v44  ;;  %v5804_v44 = vld [vmem:[#allocation24_spill] sm:$0xff] }
 0x181   : > { %2349 = vmatmul.mubr.f32.gmra.mrb[10].mxu0 %v1089_v42  ;;  %2679 = vset.pattern.permute.xlu1 %v5694_v31  ;;  %v1608_v34 = vsel %vm1576_vm9, 1, %v5635_v4  ;;  %v1609_v61 = vsel %vm1577_vm10, 1, %v5635_v4  ;;  %v5801_v57 = vcvt.s32.f32 %v4362_v30  ;;  %vm1179_vm0 = vcmp.eq.s32.totalorder %v3126_v24, %v4490_v27 }
 0x182   : > { %1553 = vperm.xlu1 %2679, %v5764_v2   ;;  %v1094_v49 = vcvt.s32.f32 %v1062_v5  ;;  %v1061_v11 = vadd.s32 %v4633_v19, %v917_v55  ;;  %vm1720_vm15 = vcmp.eq.s32.totalorder %v3114_v17, %v1674_v38  ;;  %vm1721_vm1 = vcmp.eq.s32.totalorder %v3126_v24, %v1674_v38 }
 0x183   : > { %2540 = vmatprep.mubr.msk.f32.mxu0 %vm2010_vm4, %v5801_v57  ;;  %v1145_v45 = vpop.permute.xlu0 %1144  ;;  %v1640_v37 = vadd.s32 %v1608_v34, %v1496_v20  ;;  %v5802_v42 = vcvt.s32.f32 %v4375_v22  ;;  %v1641_v50 = vadd.s32 %v1609_v61, %v1497_v47  ;;  %v782_v32 = vadd.s32 %v5803_v63, %v638_v16  ;;  %v5805_v61 = vld [vmem:[#allocation37_spill] sm:$0xff] }
 0x184   : > { %v4799_v18 = vpop.permute.xlu1 %1532  ;;  %vm1186_vm13 = vcmp.eq.s32.totalorder %v3114_v17, %v1145_v45  ;;  %vm1187_vm14 = vcmp.eq.s32.totalorder %v3126_v24, %v1145_v45  ;;  %v609_v19 = vsel %vm577_vm11, 1, %v5635_v4  ;;  %v610_v55 = vsel %vm578_vm12, 1, %v5635_v4 }
 0x185   : > { %v1218_v30 = vsel %vm1186_vm13, 1, %v5635_v4  ;;  %v1219_v41 = vsel %vm1187_vm14, 1, %v5635_v4  ;;  %2354 = vmatmul.mubr.f32.gmra.mrb[12].mxu0 %v5802_v42  ;;  %vm1290_vm2 = vcmp.eq.s32.totalorder %v3114_v17, %v4675_v48  ;;  %v1093_v16 = vcvt.s32.f32 %v1061_v11 }
 0x186   : > { %v1362_v5 = vadd.s32 %v4424_v15, %v1218_v30  ;;  %v1363_v28 = vadd.s32 %v4431_v6, %v1219_v41  ;;  %2541 = vmatprep.mubr.msk.f32.mxu0 %vm2010_vm4, %v1094_v49  ;;  %2680 = vset.pattern.permute.xlu1 %v5684_v39  ;;  %v921_v23 = vadd.s32 %v5804_v44, %v777_v35  ;;  %v1752_v20 = vsel %vm1720_vm15, 1, %v5635_v4  ;;  %v5807_v49 = vld [vmem:[#allocation25_spill] sm:$0xff] }
 0x187   : > { %v4825_v22 = vpop.permute.xlu0 %1150  ;;  %1412 = vperm.xlu1 %2680, %v5794_v26   ;;  %vm1291_vm3 = vcmp.eq.s32.totalorder %v3126_v24, %v4675_v48  ;;  %vm1731_vm5 = vcmp.eq.s32.totalorder %v3126_v24, %v4393_v60  ;;  %v1784_v34 = vadd.s32 %v1752_v20, %v1640_v37  ;;  %v642_v57 = vadd.s32 %v610_v55, %v5805_v61  ;;  %v5810_v48 = vld [vmem:[#allocation4_spill] sm:$0xff] }
 0x188   : > { %v4828_v15 = vadd.s32 %v4571_v36, %v1362_v5  ;;  %v4831_v6 = vadd.s32 %v4598_v52, %v1363_v28  ;;  %v1753_v36 = vsel %vm1721_vm1, 1, %v5635_v4  ;;  %v1066_v52 = vadd.s32 %v4681_v59, %v922_v3  ;;  %v5811_v20 = vld [vmem:[#allocation28_spill] sm:$0xff] }
 0x189   : > { %v1818_v47 = vpop.permute.xlu1 %1817  ;;  %2359 = vmatmul.mubr.f32.gmra.mrb[14].mxu0 %v1093_v16  ;;  %v1785_v35 = vadd.s32 %v1753_v36, %v1641_v50  ;;  %vm582_vm8 = vcmp.eq.s32.totalorder %v3126_v24, %v4699_v62  ;;  %v5806_v38 = vcvt.s32.f32 %v4369_v46  ;;  %vm1010_vm9 = vcmp.eq.s32.totalorder %v3126_v24, %v4405_v0  ;;  %v5808_v46 = vld [vmem:[#allocation36_spill] sm:$0xff] }
 0x18a   : > { %vm1864_vm6 = vcmp.eq.s32.totalorder %v3114_v17, %v1818_v47  ;;  %vm1865_vm7 = vcmp.eq.s32.totalorder %v3126_v24, %v1818_v47  ;;  %v926_v11 = vadd.s32 %v5807_v49, %v782_v32  ;;  %v1065_v30 = vadd.s32 %v4669_v29, %v921_v23  ;;  %v5812_v47 = vld [vmem:[#allocation33_spill] sm:$0xff] }
 0x18b   : > { %2542 = vmatprep.mubr.msk.f32.mxu0 %vm2010_vm4, %v5806_v38  ;;  %v1896_v59 = vsel %vm1864_vm6, 1, %v5635_v4  ;;  %v4855_v3 = vpop.permute.xlu0 %1153  ;;  %v1897_v45 = vsel %vm1865_vm7, 1, %v5635_v4  ;;  %2681 = vset.pattern.permute.xlu1 %v5650_v14  ;;  %v641_v42 = vadd.s32 %v609_v19, %v5808_v46  ;;  %v1322_v5 = vsel %vm1290_vm2, 1, %v5635_v4  ;;  %v5818_v46 = vld [vmem:[#allocation39_spill] sm:$0xff] }
 0x18c   : > { %v1929_v41 = vadd.s32 %v1897_v45, %v1785_v35  ;;  %v1928_v37 = vadd.s32 %v1896_v59, %v1784_v34  ;;  %v1323_v28 = vsel %vm1291_vm3, 1, %v5635_v4  ;;  %v1098_v50 = vcvt.s32.f32 %v1066_v52  ;;  %1697 = vperm.xlu1 %2681, %v5764_v2   ;;  %v5813_v35 = vld [vmem:[#allocation40_spill] sm:$0xff] }
 0x18d   : > { %vm581_vm10 = vcmp.eq.s32.totalorder %v3114_v17, %v4699_v62  ;;  %v614_v29 = vsel %vm582_vm8, 1, %v5635_v4  ;;  %v5809_v63 = vcvt.s32.f32 %v4386_v7  ;;  %vm1011_vm11 = vcmp.eq.s32.totalorder %v3114_v17, %v3918_v33  ;;  %v5814_v62 = vld [vmem:[#allocation11_spill] sm:$0xff]  ;;  %v5828_v33 = vld [vmem:[#allocation61_spill] sm:$0xff] }
 0x18e   : > { %v1677_v32 = vpop.permute.xlu1 %1676  ;;  %v1961_v19 = vcvt.s32.f32 %v1929_v41  ;;  %v1960_v55 = vcvt.s32.f32 %v1928_v37  ;;  %v1211_v2 = vsel %vm1179_vm0, 1, %v5635_v4  ;;  %v786_v16 = vadd.s32 %v5810_v48, %v642_v57  ;;  %v5823_v48 = vld [vmem:[#allocation29_spill] sm:$0xff] }
 0x18f   : > { %2364 = vmatmul.mubr.f32.gmra.mrb[16].mxu0 %v5809_v63  ;;  %vm1578_vm12 = vcmp.eq.s32.totalorder %v3114_v17, %v4799_v18  ;;  %vm1579_vm13 = vcmp.eq.s32.totalorder %v3126_v24, %v4799_v18  ;;  %v4893_v7 = vpop.permute.xlu0 %1156  ;;  %vm1009_vm14 = vcmp.eq.s32.totalorder %v3114_v17, %v4405_v0  ;;  %v1354_v44 = vadd.s32 %v1322_v5, %v4775_v13  ;;  %v5832_v0 = vld [vmem:[#allocation38_spill] sm:$0xff] }
 0x190   : > { %2543 = vmatprep.mubr.msk.f32.mxu0 %vm2010_vm4, %v1098_v50  ;;  %v1355_v23 = vadd.s32 %v1323_v28, %v1211_v2  ;;  %v1097_v27 = vcvt.s32.f32 %v1065_v30  ;;  %2517 = vmatprep.mubr.msk.f32.mxu1 %vm2010_vm4, %v1961_v19  ;;  %v925_v36 = vadd.s32 %v5811_v20, %v4778_v51  ;;  %v785_v52 = vadd.s32 %v5812_v47, %v641_v42  ;;  %v5821_v28 = vld [vmem:[#allocation48_spill] sm:$0xff] }
 0x191   : > { %v613_v34 = vsel %vm581_vm10, 1, %v5635_v4  ;;  %v646_v61 = vadd.s32 %v614_v29, %v5813_v35  ;;  %2682 = vset.pattern.permute.xlu1 %v5636_v53  ;;  %2128 = vmatmul.mubr.f32.vlgmr.msra.gmra.mrb[0].mxu1 %v1960_v55  ;;  %v1070_v13 = vadd.s32 %v4754_v54, %v926_v11  ;;  %v1610_v57 = vsel %vm1578_vm12, 1, %v5635_v4  ;;  %v5822_v29 = vld [vmem:[#allocation7_spill] sm:$0xff] }
 0x192   : > { %v1611_v51 = vsel %vm1579_vm13, 1, %v5635_v4  ;;  %vm1722_vm0 = vcmp.eq.s32.totalorder %v3114_v17, %v1677_v32  ;;  %1271 = vperm.xlu1 %2682, %v5814_v62   ;;  %v1644_v38 = vadd.s32 %v4611_v56, %v4549_v12  ;;  %vm1723_vm15 = vcmp.eq.s32.totalorder %v3126_v24, %v1677_v32  ;;  %v5816_v12 = vld [vmem:[#allocation31_spill] sm:$0xff] }
 0x193   : > { %2369 = vmatmul.mubr.f32.gmra.mrb[18].mxu0 %v1097_v27  ;;  %v5815_v54 = vcvt.s32.f32 %v4389_v1  ;;  %v4925_v59 = vpop.permute.xlu1 %1250  ;;  %v4927_v45 = vpop.permute.xlu0 %1159  ;;  %v1645_v18 = vadd.s32 %v4627_v43, %v4560_v25  ;;  %v1650_v49 = vadd.s32 %v4650_v9, %v4828_v15  ;;  %v1651_v11 = vadd.s32 %v4672_v40, %v4831_v6  ;;  %v5817_v25 = vld [vmem:[#allocation16_spill] sm:$0xff] }
 0x194   : > { %v930_v56 = vadd.s32 %v5816_v12, %v786_v16  ;;  %v1498_v30 = vadd.s32 %v4508_v8, %v1354_v44  ;;  %v1499_v1 = vadd.s32 %v4511_v10, %v1355_v23  ;;  %v1069_v41 = vadd.s32 %v4748_v21, %v925_v36  ;;  %v5819_v21 = vld [vmem:[#allocation58_spill] sm:$0xff]  ;;  %v5831_v12 = vld [vmem:[#allocation60_spill] sm:$0xff] }
 0x195   : > { %2544 = vmatprep.mubr.msk.f32.mxu0 %vm2010_vm4, %v5815_v54  ;;  %v1763_v37 = vsel %vm1731_vm5, 1, %v5635_v4  ;;  %v645_v43 = vadd.s32 %v613_v34, %v5817_v25  ;;  %v790_v9 = vadd.s32 %v5818_v46, %v646_v61  ;;  %v1102_v15 = vcvt.s32.f32 %v1070_v13  ;;  %v5825_v36 = vld [vmem:[#allocation62_spill] sm:$0xff]  ;;  %v5826_v61 = vld [vmem:[#allocation59_spill] sm:$0xff] }
 0x196   : > { %v1642_v42 = vadd.s32 %v1610_v57, %v1498_v30  ;;  %v1643_v40 = vadd.s32 %v1611_v51, %v1499_v1  ;;  %v1754_v8 = vsel %vm1722_vm0, 1, %v5635_v4  ;;  %v1755_v10 = vsel %vm1723_vm15, 1, %v5635_v4  ;;  %2683 = vset.pattern.permute.xlu1 %v5694_v31  ;;  %v5833_v1 = vld [vmem:[#allocation35_spill] sm:$0xff] }
 0x197   : > { %v5820_v6 = vcvt.s32.f32 %v5819_v21  ;;  %v1042_v60 = vsel %vm1010_vm9, 1, %v5635_v4  ;;  %1556 = vperm.xlu1 %2683, %v5794_v26   ;;  %v4960_v5 = vpop.permute.xlu0 %1162  ;;  %v4963_v50 = vadd.s32 %v5821_v28, %v1644_v38  ;;  %v4966_v63 = vadd.s32 %v5822_v29, %v1645_v18  ;;  %v5829_v18 = vld [vmem:[#allocation63_spill] sm:$0xff] }
 0x198   : > { %v4969_v32 = vadd.s32 %v4769_v58, %v1650_v49  ;;  %v1101_v19 = vcvt.s32.f32 %v1069_v41  ;;  %v1821_v55 = vpop.permute.xlu1 %1820  ;;  %v1074_v2 = vadd.s32 %v1042_v60, %v930_v56  ;;  %v929_v16 = vadd.s32 %v5823_v48, %v785_v52  ;;  %v5824_v58 = vld [vmem:[#allocation41_spill] sm:$0xff]  ;;  %v5830_v49 = vld [vmem:[#allocation6_spill] sm:$0xff] }
 0x199   : > { %2374 = vmatmul.mubr.f32.gmra.mrb[20].mxu0 %v5820_v6  ;;  %v4972_v44 = vadd.s32 %v1763_v37, %v1651_v11  ;;  %v1786_v23 = vadd.s32 %v1754_v8, %v1642_v42  ;;  %v1787_v27 = vadd.s32 %v1755_v10, %v1643_v40  ;;  %vm1866_vm1 = vcmp.eq.s32.totalorder %v3114_v17, %v1821_v55  ;;  %v5835_v48 = vld [vmem:[#allocation10_spill] sm:$0xff] }
 0x19a   : > { %2545 = vmatprep.mubr.msk.f32.mxu0 %vm2010_vm4, %v1102_v15  ;;  %vm1867_vm2 = vcmp.eq.s32.totalorder %v3126_v24, %v1821_v55  ;;  %v1043_v20 = vsel %vm1011_vm11, 1, %v5635_v4  ;;  %v931_v47 = vadd.s32 %v5825_v36, %v5824_v58  ;;  %v1898_v34 = vsel %vm1866_vm1, 1, %v5635_v4 }
 0x19b   : > { %v1899_v52 = vsel %vm1867_vm2, 1, %v5635_v4  ;;  %v1041_v35 = vsel %vm1009_vm14, 1, %v5635_v4  ;;  %v5827_v13 = vcvt.s32.f32 %v5826_v61  ;;  %v1103_v51 = vcvt.s32.f32 %v5828_v33  ;;  %2684 = vset.pattern.permute.xlu1 %v5684_v39  ;;  %v4993_v38 = vpop.permute.xlu0 %1165 }
 0x19c   : > { %v1931_v57 = vadd.s32 %v1899_v52, %v1787_v27  ;;  %v1930_v54 = vadd.s32 %v1898_v34, %v1786_v23  ;;  %v1076_v11 = vadd.s32 %v5830_v49, %v5829_v18  ;;  %vm1014_vm3 = vcmp.eq.s32.totalorder %v3126_v24, %v5831_v12  ;;  %1415 = vperm.xlu1 %2684, %v5814_v62   ;;  %v5836_v52 = vld [vmem:[#allocation43_spill] sm:$0xff] }
 0x19d   : > { %2379 = vmatmul.mubr.f32.gmra.mrb[22].mxu0 %v1101_v19  ;;  %v789_v56 = vadd.s32 %v5832_v0, %v645_v43  ;;  %v1073_v30 = vadd.s32 %v1041_v35, %v929_v16  ;;  %v934_v41 = vadd.s32 %v5833_v1, %v790_v9  ;;  %v1106_v25 = vcvt.s32.f32 %v1074_v2  ;;  %v5002_v46 = vpop.permute.xlu1 %1394  ;;  %v5834_v9 = vld [vmem:[#allocation32_spill] sm:$0xff] }
 0x19e   : > { %2546 = vmatprep.mubr.msk.f32.mxu0 %vm2010_vm4, %v5827_v13  ;;  %v1963_v37 = vcvt.s32.f32 %v1931_v57  ;;  %v1962_v15 = vcvt.s32.f32 %v1930_v54  ;;  %v1075_v40 = vadd.s32 %v1043_v20, %v931_v47  ;;  %vm1013_vm5 = vcmp.eq.s32.totalorder %v3114_v17, %v5831_v12 }
 0x19f   : > { %v5006_v42 = vpop.permute.xlu0 %1168  ;;  %v1046_v43 = vsel %vm1014_vm3, 1, %v5635_v4  ;;  %v1105_v8 = vcvt.s32.f32 %v1073_v30  ;;  %v933_v10 = vadd.s32 %v5834_v9, %v789_v56  ;;  %v1108_v21 = vcvt.s32.f32 %v1076_v11 }
 0x1a0   : > { %2518 = vmatprep.mubr.msk.f32.mxu1 %vm2010_vm4, %v1963_v37  ;;  %2685 = vset.pattern.permute.xlu1 %v5650_v14  ;;  %v1078_v6 = vadd.s32 %v1046_v43, %v934_v41  ;;  %v1045_v28 = vsel %vm1013_vm5, 1, %v5635_v4  ;;  %v1107_v19 = vcvt.s32.f32 %v1075_v40  ;;  %vm1182_vm8 = vcmp.eq.s32.totalorder %v3114_v17, %v5836_v52  ;;  %v5837_v37 = vld [vmem:[#allocation13_spill] sm:$0xff] }
 0x1a1   : > { %2384 = vmatmul.mubr.f32.gmra.mrb[24].mxu0 %v1103_v51  ;;  %2133 = vmatmul.mubr.f32.gmra.mrb[2].mxu1 %v1962_v15  ;;  %v1077_v55 = vadd.s32 %v1045_v28, %v933_v10  ;;  %vm1183_vm9 = vcmp.eq.s32.totalorder %v3126_v24, %v5836_v52  ;;  %vm1294_vm10 = vcmp.eq.s32.totalorder %v3114_v17, %v4925_v59  ;;  %v5838_v10 = vld [vmem:[#allocation47_spill] sm:$0xff] }
 0x1a2   : > { %2547 = vmatprep.mubr.msk.f32.mxu0 %vm2010_vm4, %v1106_v25  ;;  %1700 = vperm.xlu1 %2685, %v5794_v26   ;;  %v5014_v60 = vpop.permute.xlu1 %1253  ;;  %v1110_v2 = vcvt.s32.f32 %v1078_v6  ;;  %vm1295_vm11 = vcmp.eq.s32.totalorder %v3126_v24, %v4925_v59  ;;  %vm1438_vm12 = vcmp.eq.s32.totalorder %v3114_v17, %v5002_v46  ;;  %vm1439_vm13 = vcmp.eq.s32.totalorder %v3126_v24, %v5002_v46 }
 0x1a3   : > { %v5018_v29 = vpop.permute.xlu0 %1171  ;;  %v1109_v23 = vcvt.s32.f32 %v1077_v55  ;;  %v1215_v13 = vsel %vm1183_vm9, 1, %v5635_v4  ;;  %v1326_v57 = vsel %vm1294_vm10, 1, %v5635_v4  ;;  %v1327_v33 = vsel %vm1295_vm11, 1, %v5635_v4 }
 0x1a4   : > { %v1470_v59 = vsel %vm1438_vm12, 1, %v5635_v4  ;;  %v1471_v51 = vsel %vm1439_vm13, 1, %v5635_v4  ;;  %v1359_v18 = vadd.s32 %v1327_v33, %v1215_v13  ;;  %vm1296_vm5 = vcmp.eq.s32.totalorder %v3114_v17, %v5014_v60 }
 0x1a5   : > { %2389 = vmatmul.mubr.f32.gmra.mrb[26].mxu0 %v1105_v8 }
 0x1a6   : > { %2548 = vmatprep.mubr.msk.f32.mxu0 %vm2010_vm4, %v1108_v21  ;;  %2686 = vset.pattern.permute.xlu1 %v5636_v53  ;;  %v1503_v56 = vadd.s32 %v1471_v51, %v1359_v18 }
 0x1a7   : > { %1274 = vperm.xlu1 %2686, %v5835_v48   ;;  %v1539_v26 = vpop.permute.xlu1 %1538  ;;  %v5023_v16 = vpop.permute.xlu0 %1174 }
 0x1a8   : > { %vm1582_vm14 = vcmp.eq.s32.totalorder %v3114_v17, %v1539_v26  ;;  %vm1583_vm0 = vcmp.eq.s32.totalorder %v3126_v24, %v1539_v26 }
 0x1a9   : > { %2394 = vmatmul.mubr.f32.gmra.mrb[28].mxu0 %v1107_v19  ;;  %v1614_v11 = vsel %vm1582_vm14, 1, %v5635_v4  ;;  %v1615_v12 = vsel %vm1583_vm0, 1, %v5635_v4 }
 0x1aa   : > { %2549 = vmatprep.mubr.msk.f32.mxu0 %vm2010_vm4, %v1110_v2  ;;  %v1647_v41 = vadd.s32 %v1615_v12, %v1503_v56 }
 0x1ab   : > { %2687 = vset.pattern.permute.xlu1 %v5694_v31 }
 0x1ac   : > { %1559 = vperm.xlu1 %2687, %v5814_v62   ;;  %v5027_v27 = vpop.permute.xlu1 %1397  ;;  %v1824_v20 = vpop.permute.xlu0 %1823 }
 0x1ad   : > { %2399 = vmatmul.mubr.f32.gmra.mrb[30].mxu0 %v1109_v23  ;;  %vm1868_vm6 = vcmp.eq.s32.totalorder %v3114_v17, %v1824_v20  ;;  %vm1869_vm7 = vcmp.eq.s32.totalorder %v3126_v24, %v1824_v20  ;;  %vm1440_vm9 = vcmp.eq.s32.totalorder %v3114_v17, %v5027_v27  ;;  %vm1441_vm10 = vcmp.eq.s32.totalorder %v3126_v24, %v5027_v27 }
 0x1ae   : > { %v1900_v58 = vsel %vm1868_vm6, 1, %v5635_v4  ;;  %v1901_v36 = vsel %vm1869_vm7, 1, %v5635_v4  ;;  %vm1297_vm6 = vcmp.eq.s32.totalorder %v3126_v24, %v5014_v60  ;;  %vm1184_vm7 = vcmp.eq.s32.totalorder %v3114_v17, %v5838_v10 }
 0x1af   : > { %v1932_v47 = vadd.s32 %v1900_v58, %v4963_v50  ;;  %v1933_v34 = vadd.s32 %v1901_v36, %v4966_v63  ;;  %v1214_v63 = vsel %vm1182_vm8, 1, %v5635_v4  ;;  %vm1185_vm8 = vcmp.eq.s32.totalorder %v3126_v24, %v5838_v10 }
 0x1b0   : > { %2688 = vset.pattern.permute.xlu1 %v5684_v39  ;;  %v1358_v54 = vadd.s32 %v1326_v57, %v1214_v63  ;;  %v1833_v19 = vpop.permute.xlu0 %1832  ;;  %v1328_v60 = vsel %vm1296_vm5, 1, %v5635_v4  ;;  %v1329_v55 = vsel %vm1297_vm6, 1, %v5635_v4  ;;  %v1216_v2 = vsel %vm1184_vm7, 1, %v5635_v4 }
 0x1b1   : > { %1418 = vperm.xlu1 %2688, %v5835_v48   ;;  %v1965_v35 = vcvt.s32.f32 %v1933_v34  ;;  %v1683_v50 = vpop.permute.xlu1 %1682  ;;  %v1964_v61 = vcvt.s32.f32 %v1932_v47  ;;  %v1217_v26 = vsel %vm1185_vm8, 1, %v5635_v4  ;;  %v1472_v23 = vsel %vm1440_vm9, 1, %v5635_v4 }
 0x1b2   : > { %vm1726_vm15 = vcmp.eq.s32.totalorder %v3114_v17, %v1683_v50  ;;  %vm1727_vm1 = vcmp.eq.s32.totalorder %v3126_v24, %v1683_v50  ;;  %v1502_v0 = vadd.s32 %v1470_v59, %v1358_v54  ;;  %v1473_v27 = vsel %vm1441_vm10, 1, %v5635_v4 }
 0x1b3   : > { %2519 = vmatprep.mubr.msk.f32.mxu1 %vm2010_vm4, %v1965_v35  ;;  %v1758_v30 = vsel %vm1726_vm15, 1, %v5635_v4  ;;  %v1759_v1 = vsel %vm1727_vm1, 1, %v5635_v4  ;;  %vm1875_vm13 = vcmp.eq.s32.totalorder %v3126_v24, %v1833_v19  ;;  %v1360_v20 = vadd.s32 %v1328_v60, %v1216_v2 }
 0x1b4   : > { %2138 = vmatmul.mubr.f32.gmra.mrb[4].mxu1 %v1964_v61  ;;  %v1791_v15 = vadd.s32 %v1759_v1, %v1647_v41  ;;  %v1361_v58 = vadd.s32 %v1329_v55, %v1217_v26  ;;  %vm1874_vm15 = vcmp.eq.s32.totalorder %v3114_v17, %v1833_v19  ;;  %v1907_v50 = vsel %vm1875_vm13, 1, %v5635_v4  ;;  %v5841_v26 = vld [vmem:[#allocation15_spill] sm:$0xff] }
 0x1b5   : > { %2689 = vset.pattern.permute.xlu1 %v5650_v14  ;;  %v1504_v52 = vadd.s32 %v1472_v23, %v1360_v20  ;;  %v1906_v59 = vsel %vm1874_vm15, 1, %v5635_v4  ;;  %v1939_v51 = vadd.s32 %v1907_v50, %v4972_v44  ;;  %vm1190_vm15 = vcmp.eq.s32.totalorder %v3114_v17, %v4825_v22 }
 0x1b6   : > { %1703 = vperm.xlu1 %2689, %v5814_v62   ;;  %v1542_v49 = vpop.permute.xlu1 %1541  ;;  %v1646_v62 = vadd.s32 %v1614_v11, %v1502_v0  ;;  %v1505_v35 = vadd.s32 %v1473_v27, %v1361_v58  ;;  %v1938_v56 = vadd.s32 %v1906_v59, %v4969_v32  ;;  %v1222_v59 = vsel %vm1190_vm15, 1, %v5635_v4 }
 0x1b7   : > { %vm1584_vm11 = vcmp.eq.s32.totalorder %v3114_v17, %v1542_v49  ;;  %vm1585_vm12 = vcmp.eq.s32.totalorder %v3126_v24, %v1542_v49  ;;  %v1971_v44 = vcvt.s32.f32 %v1939_v51 }
 0x1b8   : > { %v1790_v46 = vadd.s32 %v1758_v30, %v1646_v62  ;;  %v1616_v47 = vsel %vm1584_vm11, 1, %v5635_v4  ;;  %v1617_v34 = vsel %vm1585_vm12, 1, %v5635_v4  ;;  %v1970_v41 = vcvt.s32.f32 %v1938_v56 }
 0x1b9   : > { %v1648_v13 = vadd.s32 %v1616_v47, %v1504_v52  ;;  %v1649_v57 = vadd.s32 %v1617_v34, %v1505_v35 }
 0x1ba   : > { %2690 = vset.pattern.permute.xlu1 %v5636_v53 }
 0x1bb   : > { %1277 = vperm.xlu1 %2690, %v5837_v37   ;;  %v1827_v25 = vpop.permute.xlu1 %1826 }
 0x1bc   : > { %vm1870_vm2 = vcmp.eq.s32.totalorder %v3114_v17, %v1827_v25  ;;  %vm1871_vm3 = vcmp.eq.s32.totalorder %v3126_v24, %v1827_v25 }
 0x1bd   : > { %v1902_v40 = vsel %vm1870_vm2, 1, %v5635_v4  ;;  %v1903_v43 = vsel %vm1871_vm3, 1, %v5635_v4 }
 0x1be   : > { %v1934_v8 = vadd.s32 %v1902_v40, %v1790_v46  ;;  %v1935_v9 = vadd.s32 %v1903_v43, %v1791_v15  ;;  %v5840_v46 = vld [vmem:[#allocation49_spill] sm:$0xff] }
 0x1bf   : > { %2691 = vset.pattern.permute.xlu1 %v5694_v31  ;;  %vm1188_vm6 = vcmp.eq.s32.totalorder %v3114_v17, %v5840_v46  ;;  %vm1189_vm7 = vcmp.eq.s32.totalorder %v3126_v24, %v5840_v46 }
 0x1c0   : > { %1562 = vperm.xlu1 %2691, %v5835_v48   ;;  %v1967_v21 = vcvt.s32.f32 %v1935_v9  ;;  %v1686_v6 = vpop.permute.xlu1 %1685  ;;  %v1966_v28 = vcvt.s32.f32 %v1934_v8  ;;  %v1220_v8 = vsel %vm1188_vm6, 1, %v5635_v4  ;;  %v1221_v9 = vsel %vm1189_vm7, 1, %v5635_v4 }
 0x1c1   : > { %vm1728_vm14 = vcmp.eq.s32.totalorder %v3114_v17, %v1686_v6  ;;  %vm1729_vm0 = vcmp.eq.s32.totalorder %v3126_v24, %v1686_v6  ;;  %v1836_v6 = vpop.permute.xlu0 %1835 }
 0x1c2   : > { %2520 = vmatprep.mubr.msk.f32.mxu1 %vm2010_vm4, %v1967_v21  ;;  %v1760_v61 = vsel %vm1728_vm14, 1, %v5635_v4  ;;  %v1761_v63 = vsel %vm1729_vm0, 1, %v5635_v4  ;;  %vm1876_vm12 = vcmp.eq.s32.totalorder %v3114_v17, %v1836_v6  ;;  %vm1877_vm13 = vcmp.eq.s32.totalorder %v3126_v24, %v1836_v6 }
 0x1c3   : > { %2143 = vmatmul.mubr.f32.gmra.mrb[6].mxu1 %v1966_v28  ;;  %v1792_v54 = vadd.s32 %v1760_v61, %v1648_v13  ;;  %v1793_v18 = vadd.s32 %v1761_v63, %v1649_v57  ;;  %v1908_v47 = vsel %vm1876_vm12, 1, %v5635_v4  ;;  %v1909_v34 = vsel %vm1877_vm13, 1, %v5635_v4 }
 0x1c4   : > { %2692 = vset.pattern.permute.xlu1 %v5684_v39  ;;  %vm1192_vm13 = vcmp.eq.s32.totalorder %v3114_v17, %v4855_v3 }
 0x1c5   : > { %1421 = vperm.xlu1 %2692, %v5837_v37   ;;  %v1260_v36 = vpop.permute.xlu1 %1259 }
 0x1c6   : > { %vm1300_vm3 = vcmp.eq.s32.totalorder %v3114_v17, %v1260_v36  ;;  %vm1301_vm5 = vcmp.eq.s32.totalorder %v3126_v24, %v1260_v36 }
 0x1c7   : > { %v1332_v15 = vsel %vm1300_vm3, 1, %v5635_v4  ;;  %v1333_v40 = vsel %vm1301_vm5, 1, %v5635_v4 }
 0x1c8   : > { %v1364_v28 = vadd.s32 %v1332_v15, %v1220_v8  ;;  %v1365_v19 = vadd.s32 %v1333_v40, %v1221_v9 }
 0x1c9   : > { %2693 = vset.pattern.permute.xlu1 %v5650_v14 }
 0x1ca   : > { %1706 = vperm.xlu1 %2693, %v5835_v48   ;;  %v1830_v33 = vpop.permute.xlu1 %1829  ;;  %v5839_v48 = vld [vmem:[#allocation12_spill] sm:$0xff] }
 0x1cb   : > { %vm1872_vm1 = vcmp.eq.s32.totalorder %v3114_v17, %v1830_v33  ;;  %vm1873_vm2 = vcmp.eq.s32.totalorder %v3126_v24, %v1830_v33 }
 0x1cc   : > { %v1904_v49 = vsel %vm1872_vm1, 1, %v5635_v4  ;;  %v1905_v11 = vsel %vm1873_vm2, 1, %v5635_v4  ;;  %vm1191_vm1 = vcmp.eq.s32.totalorder %v3126_v24, %v4825_v22 }
 0x1cd   : > { %v1936_v12 = vadd.s32 %v1904_v49, %v1792_v54  ;;  %v1937_v0 = vadd.s32 %v1905_v11, %v1793_v18  ;;  %v1223_v51 = vsel %vm1191_vm1, 1, %v5635_v4 }
 0x1ce   : > { %2694 = vset.pattern.permute.xlu1 %v5636_v53 }
 0x1cf   : > { %1280 = vperm.xlu1 %2694, %v5839_v48   ;;  %v1969_v30 = vcvt.s32.f32 %v1937_v0  ;;  %v1404_v1 = vpop.permute.xlu1 %1403  ;;  %v1968_v62 = vcvt.s32.f32 %v1936_v12  ;;  %v1839_v12 = vpop.permute.xlu0 %1838 }
 0x1d0   : > { %vm1444_vm8 = vcmp.eq.s32.totalorder %v3114_v17, %v1404_v1  ;;  %vm1445_vm9 = vcmp.eq.s32.totalorder %v3126_v24, %v1404_v1 }
 0x1d1   : > { %2521 = vmatprep.mubr.msk.f32.mxu1 %vm2010_vm4, %v1969_v30  ;;  %v1476_v10 = vsel %vm1444_vm8, 1, %v5635_v4  ;;  %v1477_v21 = vsel %vm1445_vm9, 1, %v5635_v4  ;;  %vm1878_vm9 = vcmp.eq.s32.totalorder %v3114_v17, %v1839_v12 }
 0x1d2   : > { %2148 = vmatmul.mubr.f32.gmra.mrb[8].mxu1 %v1968_v62  ;;  %v1508_v55 = vadd.s32 %v1476_v10, %v1364_v28  ;;  %v1509_v2 = vadd.s32 %v1477_v21, %v1365_v19  ;;  %v1910_v15 = vsel %vm1878_vm9, 1, %v5635_v4 }
 0x1d3   : > { %2695 = vset.pattern.permute.xlu1 %v5694_v31  ;;  %2522 = vmatprep.mubr.msk.f32.mxu1 %vm2010_vm4, %v1971_v44  ;;  %v5842_v44 = vld [vmem:[#allocation14_spill] sm:$0xff] }
 0x1d4   : > { %1565 = vperm.xlu1 %2695, %v5837_v37   ;;  %v5121_v25 = vpop.permute.xlu1 %1262 }
 0x1d5   : > { %vm1302_vm2 = vcmp.eq.s32.totalorder %v3114_v17, %v5121_v25  ;;  %vm1303_vm3 = vcmp.eq.s32.totalorder %v3126_v24, %v5121_v25 }
 0x1d6   : > { %2153 = vmatmul.mubr.f32.gmra.mrb[10].mxu1 %v1970_v41  ;;  %v1334_v22 = vsel %vm1302_vm2, 1, %v5635_v4  ;;  %v1335_v54 = vsel %vm1303_vm3, 1, %v5635_v4 }
 0x1d7   : > { %v1366_v0 = vadd.s32 %v1334_v22, %v1222_v59 }
 0x1d8   : > { %2696 = vset.pattern.permute.xlu1 %v5684_v39 }
 0x1d9   : > { %1424 = vperm.xlu1 %2696, %v5839_v48   ;;  %v1548_v32 = vpop.permute.xlu1 %1547 }
 0x1da   : > { %vm1588_vm10 = vcmp.eq.s32.totalorder %v3114_v17, %v1548_v32  ;;  %vm1589_vm11 = vcmp.eq.s32.totalorder %v3126_v24, %v1548_v32 }
 0x1db   : > { %v1620_v60 = vsel %vm1588_vm10, 1, %v5635_v4  ;;  %vm1879_vm10 = vcmp.eq.s32.totalorder %v3126_v24, %v1839_v12 }
 0x1dc   : > { %v1652_v27 = vadd.s32 %v1620_v60, %v1508_v55  ;;  %v1911_v40 = vsel %vm1879_vm10, 1, %v5635_v4  ;;  %vm1194_vm10 = vcmp.eq.s32.totalorder %v3114_v17, %v4893_v7 }
 0x1dd   : > { %2697 = vset.pattern.permute.xlu1 %v5650_v14 }
 0x1de   : > { %1709 = vperm.xlu1 %2697, %v5837_v37   ;;  %v1407_v43 = vpop.permute.xlu1 %1406  ;;  %v1621_v37 = vsel %vm1589_vm11, 1, %v5635_v4 }
 0x1df   : > { %v1653_v20 = vadd.s32 %v1621_v37, %v1509_v2  ;;  %vm1446_vm5 = vcmp.eq.s32.totalorder %v3114_v17, %v1407_v43  ;;  %vm1447_vm6 = vcmp.eq.s32.totalorder %v3126_v24, %v1407_v43 }
 0x1e0   : > { %v1478_v49 = vsel %vm1446_vm5, 1, %v5635_v4  ;;  %v1479_v11 = vsel %vm1447_vm6, 1, %v5635_v4 }
 0x1e1   : > { %v1510_v1 = vadd.s32 %v1478_v49, %v1366_v0 }
 0x1e2   : > { %2698 = vset.pattern.permute.xlu1 %v5636_v53 }
 0x1e3   : > { %1283 = vperm.xlu1 %2698, %v5841_v26   ;;  %v1692_v23 = vpop.permute.xlu1 %1691 }
 0x1e4   : > { %vm1732_vm14 = vcmp.eq.s32.totalorder %v3114_v17, %v1692_v23  ;;  %vm1733_vm0 = vcmp.eq.s32.totalorder %v3126_v24, %v1692_v23  ;;  %v1842_v23 = vpop.permute.xlu0 %1841 }
 0x1e5   : > { %v1764_v58 = vsel %vm1732_vm14, 1, %v5635_v4  ;;  %v1765_v36 = vsel %vm1733_vm0, 1, %v5635_v4  ;;  %vm1193_vm14 = vcmp.eq.s32.totalorder %v3126_v24, %v4855_v3  ;;  %vm1880_vm6 = vcmp.eq.s32.totalorder %v3114_v17, %v1842_v23 }
 0x1e6   : > { %v1796_v52 = vadd.s32 %v1764_v58, %v1652_v27  ;;  %v1797_v35 = vadd.s32 %v1765_v36, %v1653_v20  ;;  %v1225_v19 = vsel %vm1193_vm14, 1, %v5635_v4  ;;  %v5843_v58 = vmov 9  }
 0x1e7   : > { %2699 = vset.pattern.permute.xlu1 %v5694_v31 }
 0x1e8   : > { %1568 = vperm.xlu1 %2699, %v5839_v48   ;;  %v1940_v50 = vadd.s32 %v1908_v47, %v1796_v52  ;;  %v1941_v61 = vadd.s32 %v1909_v34, %v1797_v35  ;;  %v5157_v63 = vpop.permute.xlu1 %1265 }
 0x1e9   : > { %vm1304_vm0 = vcmp.eq.s32.totalorder %v3114_v17, %v5157_v63  ;;  %vm1305_vm15 = vcmp.eq.s32.totalorder %v3126_v24, %v5157_v63 }
 0x1ea   : > { %v1973_v13 = vcvt.s32.f32 %v1941_v61  ;;  %v1972_v57 = vcvt.s32.f32 %v1940_v50  ;;  %v1336_v3 = vsel %vm1304_vm0, 1, %v5635_v4  ;;  %v1337_v60 = vsel %vm1305_vm15, 1, %v5635_v4 }
 0x1eb   : > { %v1369_v20 = vadd.s32 %v1337_v60, %v1225_v19 }
 0x1ec   : > { %2700 = vset.pattern.permute.xlu1 %v5684_v39  ;;  %2523 = vmatprep.mubr.msk.f32.mxu1 %vm2010_vm4, %v1973_v13 }
 0x1ed   : > { %1427 = vperm.xlu1 %2700, %v5841_v26   ;;  %v1551_v33 = vpop.permute.xlu1 %1550  ;;  %2158 = vmatmul.mubr.f32.gmra.mrb[12].mxu1 %v1972_v57 }
 0x1ee   : > { %vm1590_vm7 = vcmp.eq.s32.totalorder %v3114_v17, %v1551_v33  ;;  %vm1591_vm8 = vcmp.eq.s32.totalorder %v3126_v24, %v1551_v33 }
 0x1ef   : > { %v1622_v56 = vsel %vm1590_vm7, 1, %v5635_v4  ;;  %v1623_v30 = vsel %vm1591_vm8, 1, %v5635_v4  ;;  %vm1881_vm7 = vcmp.eq.s32.totalorder %v3126_v24, %v1842_v23 }
 0x1f0   : > { %v1654_v25 = vadd.s32 %v1622_v56, %v1510_v1  ;;  %v1913_v57 = vsel %vm1881_vm7, 1, %v5635_v4 }
 0x1f1   : > { %2701 = vset.pattern.permute.xlu1 %v5650_v14 }
 0x1f2   : > { %1712 = vperm.xlu1 %2701, %v5839_v48   ;;  %v1410_v18 = vpop.permute.xlu1 %1409  ;;  %v1367_v48 = vadd.s32 %v1335_v54, %v1223_v51 }
 0x1f3   : > { %vm1448_vm1 = vcmp.eq.s32.totalorder %v3114_v17, %v1410_v18  ;;  %vm1449_vm2 = vcmp.eq.s32.totalorder %v3126_v24, %v1410_v18 }
 0x1f4   : > { %v1511_v62 = vadd.s32 %v1479_v11, %v1367_v48  ;;  %v1480_v55 = vsel %vm1448_vm1, 1, %v5635_v4  ;;  %v1481_v2 = vsel %vm1449_vm2, 1, %v5635_v4 }
 0x1f5   : > { %v1513_v52 = vadd.s32 %v1481_v2, %v1369_v20 }
 0x1f6   : > { %2703 = vset.pattern.permute.xlu1 %v5636_v53  ;;  %v1655_v32 = vadd.s32 %v1623_v30, %v1511_v62 }
 0x1f7   : > { %1286 = vperm.xlu1 %2703, %v5842_v44   ;;  %v1695_v41 = vpop.permute.xlu1 %1694 }
 0x1f8   : > { %vm1734_vm11 = vcmp.eq.s32.totalorder %v3114_v17, %v1695_v41  ;;  %vm1735_vm12 = vcmp.eq.s32.totalorder %v3126_v24, %v1695_v41 }
 0x1f9   : > { %v1766_v53 = vsel %vm1734_vm11, 1, %v5635_v4  ;;  %v1767_v46 = vsel %vm1735_vm12, 1, %v5635_v4  ;;  %vm1195_vm11 = vcmp.eq.s32.totalorder %v3126_v24, %v4893_v7 }
 0x1fa   : > { %v1798_v43 = vadd.s32 %v1766_v53, %v1654_v25  ;;  %v1799_v8 = vadd.s32 %v1767_v46, %v1655_v32  ;;  %v1227_v12 = vsel %vm1195_vm11, 1, %v5635_v4 }
 0x1fb   : > { %2704 = vset.pattern.permute.xlu1 %v5694_v31 }
 0x1fc   : > { %1571 = vperm.xlu1 %2704, %v5841_v26   ;;  %v1942_v9 = vadd.s32 %v1910_v15, %v1798_v43  ;;  %v1943_v10 = vadd.s32 %v1911_v40, %v1799_v8  ;;  %v5196_v21 = vpop.permute.xlu1 %1268 }
 0x1fd   : > { %vm1306_vm12 = vcmp.eq.s32.totalorder %v3114_v17, %v5196_v21 }
 0x1fe   : > { %v1975_v6 = vcvt.s32.f32 %v1943_v10  ;;  %v1974_v28 = vcvt.s32.f32 %v1942_v9  ;;  %v1338_v0 = vsel %vm1306_vm12, 1, %v5635_v4 }
 0x200   : > { %2705 = vset.pattern.permute.xlu1 %v5684_v39  ;;  %2524 = vmatprep.mubr.msk.f32.mxu1 %vm2010_vm4, %v1975_v6  ;;  %v1224_v39 = vsel %vm1192_vm13, 1, %v5635_v4  ;;  %vm1307_vm13 = vcmp.eq.s32.totalorder %v3126_v24, %v5196_v21 }
 0x201   : > { %1430 = vperm.xlu1 %2705, %v5842_v44   ;;  %v1554_v31 = vpop.permute.xlu1 %1553  ;;  %2163 = vmatmul.mubr.f32.gmra.mrb[14].mxu1 %v1974_v28  ;;  %v1368_v27 = vadd.s32 %v1336_v3, %v1224_v39  ;;  %v1339_v48 = vsel %vm1307_vm13, 1, %v5635_v4 }
 0x202   : > { %vm1592_vm3 = vcmp.eq.s32.totalorder %v3114_v17, %v1554_v31  ;;  %vm1593_vm5 = vcmp.eq.s32.totalorder %v3126_v24, %v1554_v31  ;;  %v1371_v62 = vadd.s32 %v1339_v48, %v1227_v12 }
 0x203   : > { %v1624_v36 = vsel %vm1592_vm3, 1, %v5635_v4  ;;  %v1625_v47 = vsel %vm1593_vm5, 1, %v5635_v4  ;;  %v1512_v34 = vadd.s32 %v1480_v55, %v1368_v27 }
 0x204   : > { %v1657_v61 = vadd.s32 %v1625_v47, %v1513_v52 }
 0x205   : > { %2706 = vset.pattern.permute.xlu1 %v5650_v14  ;;  %v1656_v50 = vadd.s32 %v1624_v36, %v1512_v34 }
 0x206   : > { %1715 = vperm.xlu1 %2706, %v5841_v26   ;;  %v1413_v37 = vpop.permute.xlu1 %1412 }
 0x207   : > { %vm1450_vm14 = vcmp.eq.s32.totalorder %v3114_v17, %v1413_v37  ;;  %vm1451_vm0 = vcmp.eq.s32.totalorder %v3126_v24, %v1413_v37 }
 0x208   : > { %v1482_v56 = vsel %vm1450_vm14, 1, %v5635_v4  ;;  %v1483_v30 = vsel %vm1451_vm0, 1, %v5635_v4 }
 0x209   : > { %v1515_v53 = vadd.s32 %v1483_v30, %v1371_v62 }
 0x20a   : > { %2708 = vset.pattern.permute.xlu1 %v5843_v58 }
 0x20b   : > { %1859 = vperm.xlu1 %2708, %v5841_v26   ;;  %v1698_v35 = vpop.permute.xlu1 %1697  ;;  %v1912_v26 = vsel %vm1880_vm6, 1, %v5635_v4 }
 0x20c   : > { %vm1736_vm8 = vcmp.eq.s32.totalorder %v3114_v17, %v1698_v35  ;;  %vm1737_vm9 = vcmp.eq.s32.totalorder %v3126_v24, %v1698_v35 }
 0x20d   : > { %v1768_v63 = vsel %vm1736_vm8, 1, %v5635_v4  ;;  %v1769_v13 = vsel %vm1737_vm9, 1, %v5635_v4  ;;  %vm1196_vm9 = vcmp.eq.s32.totalorder %v3114_v17, %v4927_v45 }
 0x20e   : > { %v1800_v33 = vadd.s32 %v1768_v63, %v1656_v50  ;;  %v1801_v59 = vadd.s32 %v1769_v13, %v1657_v61  ;;  %v1228_v23 = vsel %vm1196_vm9, 1, %v5635_v4 }
 0x20f   : > { %2709 = vset.pattern.permute.xlu1 %v5650_v14  ;;  %v1226_v14 = vsel %vm1194_vm10, 1, %v5635_v4  ;;  %vm1197_vm10 = vcmp.eq.s32.totalorder %v3126_v24, %v4927_v45 }
 0x210   : > { %1718 = vperm.xlu1 %2709, %v5842_v44   ;;  %v1944_v51 = vadd.s32 %v1912_v26, %v1800_v33  ;;  %v1945_v22 = vadd.s32 %v1913_v57, %v1801_v59  ;;  %v1845_v44 = vpop.permute.xlu0 %1844  ;;  %v1370_v1 = vadd.s32 %v1338_v0, %v1226_v14  ;;  %v1229_v27 = vsel %vm1197_vm10, 1, %v5635_v4 }
 0x211   : > { %v1272_v54 = vpop.permute.xlu1 %1271  ;;  %vm1882_vm2 = vcmp.eq.s32.totalorder %v3114_v17, %v1845_v44  ;;  %vm1883_vm3 = vcmp.eq.s32.totalorder %v3126_v24, %v1845_v44 }
 0x212   : > { %v1977_v18 = vcvt.s32.f32 %v1945_v22  ;;  %v1976_v49 = vcvt.s32.f32 %v1944_v51  ;;  %v1514_v32 = vadd.s32 %v1482_v56, %v1370_v1  ;;  %v1914_v9 = vsel %vm1882_vm2, 1, %v5635_v4 }
 0x213   : > { %v1915_v10 = vsel %vm1883_vm3, 1, %v5635_v4  ;;  %vm1308_vm7 = vcmp.eq.s32.totalorder %v3114_v17, %v1272_v54  ;;  %vm1309_vm8 = vcmp.eq.s32.totalorder %v3126_v24, %v1272_v54 }
 0x214   : > { %2525 = vmatprep.mubr.msk.f32.mxu1 %vm2010_vm4, %v1977_v18  ;;  %v1340_v37 = vsel %vm1308_vm7, 1, %v5635_v4  ;;  %v1341_v55 = vsel %vm1309_vm8, 1, %v5635_v4  ;;  %v1848_v58 = vpop.permute.xlu0 %1847  ;;  %vm1199_vm7 = vcmp.eq.s32.totalorder %v3126_v24, %v4960_v5 }
 0x215   : > { %2168 = vmatmul.mubr.f32.gmra.mrb[16].mxu1 %v1976_v49  ;;  %v1372_v36 = vadd.s32 %v1340_v37, %v1228_v23  ;;  %v1373_v47 = vadd.s32 %v1341_v55, %v1229_v27  ;;  %vm1884_vm0 = vcmp.eq.s32.totalorder %v3114_v17, %v1848_v58 }
 0x216   : > { %v1557_v11 = vpop.permute.xlu1 %1556  ;;  %v1916_v33 = vsel %vm1884_vm0, 1, %v5635_v4 }
 0x217   : > { %vm1594_vm15 = vcmp.eq.s32.totalorder %v3114_v17, %v1557_v11  ;;  %vm1595_vm1 = vcmp.eq.s32.totalorder %v3126_v24, %v1557_v11 }
 0x218   : > { %v1626_v41 = vsel %vm1594_vm15, 1, %v5635_v4  ;;  %v1627_v25 = vsel %vm1595_vm1, 1, %v5635_v4  ;;  %vm1885_vm15 = vcmp.eq.s32.totalorder %v3126_v24, %v1848_v58 }
 0x219   : > { %v1658_v15 = vadd.s32 %v1626_v41, %v1514_v32  ;;  %v1659_v40 = vadd.s32 %v1627_v25, %v1515_v53  ;;  %v1917_v59 = vsel %vm1885_vm15, 1, %v5635_v4  ;;  %v1851_v41 = vpop.permute.xlu0 %1850 }
 0x21b   : > { %v1416_v7 = vpop.permute.xlu1 %1415 }
 0x21c   : > { %vm1452_vm11 = vcmp.eq.s32.totalorder %v3114_v17, %v1416_v7  ;;  %vm1453_vm12 = vcmp.eq.s32.totalorder %v3126_v24, %v1416_v7 }
 0x21d   : > { %v1484_v20 = vsel %vm1452_vm11, 1, %v5635_v4  ;;  %v1485_v45 = vsel %vm1453_vm12, 1, %v5635_v4  ;;  %vm1886_vm12 = vcmp.eq.s32.totalorder %v3114_v17, %v1851_v41 }
 0x21e   : > { %v1516_v35 = vadd.s32 %v1484_v20, %v1372_v36  ;;  %v1517_v50 = vadd.s32 %v1485_v45, %v1373_v47 }
 0x221   : > { %v1701_v46 = vpop.permute.xlu1 %1700 }
 0x222   : > { %vm1738_vm5 = vcmp.eq.s32.totalorder %v3114_v17, %v1701_v46  ;;  %vm1739_vm6 = vcmp.eq.s32.totalorder %v3126_v24, %v1701_v46 }
 0x223   : > { %v1770_v43 = vsel %vm1738_vm5, 1, %v5635_v4  ;;  %v1771_v8 = vsel %vm1739_vm6, 1, %v5635_v4  ;;  %vm1198_vm6 = vcmp.eq.s32.totalorder %v3114_v17, %v4960_v5  ;;  %v1231_v5 = vsel %vm1199_vm7, 1, %v5635_v4 }
 0x224   : > { %v1802_v21 = vadd.s32 %v1770_v43, %v1658_v15  ;;  %v1803_v6 = vadd.s32 %v1771_v8, %v1659_v40  ;;  %v1230_v44 = vsel %vm1198_vm6, 1, %v5635_v4 }
 0x226   : > { %v1946_v28 = vadd.s32 %v1914_v9, %v1802_v21  ;;  %v1947_v31 = vadd.s32 %v1915_v10, %v1803_v6  ;;  %v1275_v39 = vpop.permute.xlu1 %1274 }
 0x227   : > { %vm1310_vm3 = vcmp.eq.s32.totalorder %v3114_v17, %v1275_v39  ;;  %vm1311_vm5 = vcmp.eq.s32.totalorder %v3126_v24, %v1275_v39 }
 0x228   : > { %v1979_v19 = vcvt.s32.f32 %v1947_v31  ;;  %v1978_v3 = vcvt.s32.f32 %v1946_v28  ;;  %v1342_v48 = vsel %vm1310_vm3, 1, %v5635_v4  ;;  %v1343_v7 = vsel %vm1311_vm5, 1, %v5635_v4 }
 0x229   : > { %v1374_v25 = vadd.s32 %v1342_v48, %v1230_v44  ;;  %v1375_v32 = vadd.s32 %v1343_v7, %v1231_v5  ;;  %vm1201_vm3 = vcmp.eq.s32.totalorder %v3126_v24, %v4993_v38 }
 0x22a   : > { %2526 = vmatprep.mubr.msk.f32.mxu1 %vm2010_vm4, %v1979_v19  ;;  %v1918_v19 = vsel %vm1886_vm12, 1, %v5635_v4 }
 0x22b   : > { %v1560_v60 = vpop.permute.xlu1 %1559  ;;  %2173 = vmatmul.mubr.f32.gmra.mrb[18].mxu1 %v1978_v3 }
 0x22c   : > { %vm1596_vm13 = vcmp.eq.s32.totalorder %v3114_v17, %v1560_v60  ;;  %vm1597_vm14 = vcmp.eq.s32.totalorder %v3126_v24, %v1560_v60 }
 0x22d   : > { %v1628_v34 = vsel %vm1596_vm13, 1, %v5635_v4  ;;  %v1629_v52 = vsel %vm1597_vm14, 1, %v5635_v4  ;;  %vm1887_vm13 = vcmp.eq.s32.totalorder %v3126_v24, %v1851_v41 }
 0x22e   : > { %v1660_v63 = vadd.s32 %v1628_v34, %v1516_v35  ;;  %v1661_v13 = vadd.s32 %v1629_v52, %v1517_v50  ;;  %v1919_v3 = vsel %vm1887_vm13, 1, %v5635_v4 }
 0x230   : > { %v1419_v2 = vpop.permute.xlu1 %1418 }
 0x231   : > { %vm1454_vm8 = vcmp.eq.s32.totalorder %v3114_v17, %v1419_v2  ;;  %vm1455_vm9 = vcmp.eq.s32.totalorder %v3126_v24, %v1419_v2 }
 0x232   : > { %v1486_v1 = vsel %vm1454_vm8, 1, %v5635_v4  ;;  %v1487_v62 = vsel %vm1455_vm9, 1, %v5635_v4 }
 0x233   : > { %v1518_v43 = vadd.s32 %v1486_v1, %v1374_v25  ;;  %v1519_v8 = vadd.s32 %v1487_v62, %v1375_v32 }
 0x235   : > { %v1704_v61 = vpop.permute.xlu1 %1703 }
 0x236   : > { %vm1740_vm1 = vcmp.eq.s32.totalorder %v3114_v17, %v1704_v61  ;;  %vm1741_vm2 = vcmp.eq.s32.totalorder %v3126_v24, %v1704_v61 }
 0x237   : > { %v1772_v26 = vsel %vm1740_vm1, 1, %v5635_v4  ;;  %v1773_v57 = vsel %vm1741_vm2, 1, %v5635_v4  ;;  %vm1200_vm2 = vcmp.eq.s32.totalorder %v3114_v17, %v4993_v38  ;;  %v1233_v38 = vsel %vm1201_vm3, 1, %v5635_v4 }
 0x238   : > { %v1804_v51 = vadd.s32 %v1772_v26, %v1660_v63  ;;  %v1805_v22 = vadd.s32 %v1773_v57, %v1661_v13  ;;  %v1232_v13 = vsel %vm1200_vm2, 1, %v5635_v4 }
 0x23a   : > { %v1948_v54 = vadd.s32 %v1916_v33, %v1804_v51  ;;  %v1949_v18 = vadd.s32 %v1917_v59, %v1805_v22  ;;  %v5291_v49 = vpop.permute.xlu1 %1277 }
 0x23b   : > { %vm1312_vm15 = vcmp.eq.s32.totalorder %v3114_v17, %v5291_v49  ;;  %vm1313_vm1 = vcmp.eq.s32.totalorder %v3126_v24, %v5291_v49 }
 0x23c   : > { %v1981_v11 = vcvt.s32.f32 %v1949_v18  ;;  %v1980_v14 = vcvt.s32.f32 %v1948_v54  ;;  %v1344_v35 = vsel %vm1312_vm15, 1, %v5635_v4  ;;  %v1345_v50 = vsel %vm1313_vm1, 1, %v5635_v4 }
 0x23d   : > { %v1376_v33 = vadd.s32 %v1344_v35, %v1232_v13  ;;  %v1377_v59 = vadd.s32 %v1345_v50, %v1233_v38  ;;  %vm1203_vm15 = vcmp.eq.s32.totalorder %v3126_v24, %v5006_v42 }
 0x23e   : > { %2527 = vmatprep.mubr.msk.f32.mxu1 %vm2010_vm4, %v1981_v11  ;;  %v5302_v0 = vpop.f32.mrb[0].mxu0 }
 0x23f   : > { %v1563_v12 = vpop.permute.xlu1 %1562  ;;  %2178 = vmatmul.mubr.f32.gmra.mrb[20].mxu1 %v1980_v14  ;;  %v2327_v56 = vpop.f32.mrb[1].mxu0 }
 0x240   : > { %vm1598_vm10 = vcmp.eq.s32.totalorder %v3114_v17, %v1563_v12  ;;  %vm1599_vm11 = vcmp.eq.s32.totalorder %v3126_v24, %v1563_v12  ;;  %v1854_v14 = vpop.permute.xlu0 %1853 }
 0x241   : > { %v1630_v46 = vsel %vm1598_vm10, 1, %v5635_v4  ;;  %v1631_v15 = vsel %vm1599_vm11, 1, %v5635_v4  ;;  %vm1888_vm9 = vcmp.eq.s32.totalorder %v3114_v17, %v1854_v14  ;;  %vm1889_vm10 = vcmp.eq.s32.totalorder %v3126_v24, %v1854_v14 }
 0x242   : > { %v1662_v10 = vadd.s32 %v1630_v46, %v1518_v43  ;;  %v1663_v21 = vadd.s32 %v1631_v15, %v1519_v8  ;;  %v1920_v41 = vsel %vm1888_vm9, 1, %v5635_v4  ;;  %v1921_v25 = vsel %vm1889_vm10, 1, %v5635_v4 }
 0x244   : > { %v1422_v30 = vpop.permute.xlu1 %1421  ;;  %v5312_v53 = vpop.f32.mrb[2].mxu0 }
 0x245   : > { %v2332_v40 = vpop.f32.mrb[3].mxu0  ;;  %vm1456_vm5 = vcmp.eq.s32.totalorder %v3114_v17, %v1422_v30  ;;  %vm1457_vm6 = vcmp.eq.s32.totalorder %v3126_v24, %v1422_v30 }
 0x246   : > { %v1488_v26 = vsel %vm1456_vm5, 1, %v5635_v4  ;;  %v1489_v57 = vsel %vm1457_vm6, 1, %v5635_v4 }
 0x247   : > { %v1520_v49 = vadd.s32 %v1488_v26, %v1376_v33  ;;  %v1521_v11 = vadd.s32 %v1489_v57, %v1377_v59 }
 0x248   : > { %v5318_v6 = vpop.f32.mrb[4].mxu0 }
 0x249   : > { %v1707_v9 = vpop.permute.xlu1 %1706  ;;  %v2337_v28 = vpop.f32.mrb[5].mxu0 }
 0x24a   : > { %vm1742_vm14 = vcmp.eq.s32.totalorder %v3114_v17, %v1707_v9  ;;  %vm1743_vm0 = vcmp.eq.s32.totalorder %v3126_v24, %v1707_v9 }
 0x24b   : > { %v1774_v31 = vsel %vm1742_vm14, 1, %v5635_v4  ;;  %v1775_v39 = vsel %vm1743_vm0, 1, %v5635_v4  ;;  %vm1202_vm0 = vcmp.eq.s32.totalorder %v3114_v17, %v5006_v42 }
 0x24c   : > { %v1806_v60 = vadd.s32 %v1774_v31, %v1662_v10  ;;  %v1807_v37 = vadd.s32 %v1775_v39, %v1663_v21  ;;  %v5326_v55 = vpop.f32.mrb[6].mxu0  ;;  %v1234_v42 = vsel %vm1202_vm0, 1, %v5635_v4 }
 0x24d   : > { %v2342_v20 = vpop.f32.mrb[7].mxu0 }
 0x24e   : > { %v1950_v2 = vadd.s32 %v1918_v19, %v1806_v60  ;;  %v1951_v23 = vadd.s32 %v1919_v3, %v1807_v37  ;;  %v5328_v27 = vpop.permute.xlu1 %1280 }
 0x24f   : > { %vm1314_vm13 = vcmp.eq.s32.totalorder %v3114_v17, %v5328_v27  ;;  %vm1315_vm14 = vcmp.eq.s32.totalorder %v3126_v24, %v5328_v27 }
 0x250   : > { %v1983_v45 = vcvt.s32.f32 %v1951_v23  ;;  %v1982_v58 = vcvt.s32.f32 %v1950_v2  ;;  %v5330_v36 = vpop.f32.mrb[8].mxu0  ;;  %v1346_v3 = vsel %vm1314_vm13, 1, %v5635_v4  ;;  %v1347_v60 = vsel %vm1315_vm14, 1, %v5635_v4 }
 0x251   : > { %v2347_v47 = vpop.f32.mrb[9].mxu0  ;;  %v1235_v23 = vsel %vm1203_vm15, 1, %v5635_v4  ;;  %vm1205_vm14 = vcmp.eq.s32.totalorder %v3126_v24, %v5018_v29 }
 0x252   : > { %2528 = vmatprep.mubr.msk.f32.mxu1 %vm2010_vm4, %v1983_v45  ;;  %v1378_v45 = vadd.s32 %v1346_v3, %v1234_v42  ;;  %v1857_v47 = vpop.permute.xlu0 %1856 }
 0x253   : > { %v1566_v34 = vpop.permute.xlu1 %1565  ;;  %2183 = vmatmul.mubr.f32.gmra.mrb[22].mxu1 %v1982_v58  ;;  %v1379_v58 = vadd.s32 %v1347_v60, %v1235_v23  ;;  %vm1890_vm6 = vcmp.eq.s32.totalorder %v3114_v17, %v1857_v47 }
 0x254   : > { %v5343_v52 = vpop.f32.mrb[10].mxu0  ;;  %vm1600_vm7 = vcmp.eq.s32.totalorder %v3114_v17, %v1566_v34  ;;  %vm1601_vm8 = vcmp.eq.s32.totalorder %v3126_v24, %v1566_v34  ;;  %v1922_v14 = vsel %vm1890_vm6, 1, %v5635_v4 }
 0x255   : > { %v2352_v61 = vpop.f32.mrb[11].mxu0  ;;  %v1632_v22 = vsel %vm1600_vm7, 1, %v5635_v4  ;;  %v1633_v54 = vsel %vm1601_vm8, 1, %v5635_v4  ;;  %vm1891_vm7 = vcmp.eq.s32.totalorder %v3126_v24, %v1857_v47 }
 0x256   : > { %v1664_v48 = vadd.s32 %v1632_v22, %v1520_v49  ;;  %v1665_v7 = vadd.s32 %v1633_v54, %v1521_v11 }
 0x258   : > { %v5349_v63 = vpop.permute.xlu1 %1424  ;;  %v5355_v51 = vpop.f32.mrb[12].mxu0 }
 0x259   : > { %v2357_v18 = vpop.f32.mrb[13].mxu0  ;;  %vm1458_vm1 = vcmp.eq.s32.totalorder %v3114_v17, %v5349_v63  ;;  %vm1459_vm2 = vcmp.eq.s32.totalorder %v3126_v24, %v5349_v63 }
 0x25a   : > { %v1490_v27 = vsel %vm1458_vm1, 1, %v5635_v4  ;;  %v1491_v20 = vsel %vm1459_vm2, 1, %v5635_v4  ;;  %vm1206_vm2 = vcmp.eq.s32.totalorder %v3114_v17, %v5023_v16 }
 0x25b   : > { %v1522_v63 = vadd.s32 %v1490_v27, %v1378_v45  ;;  %v1523_v13 = vadd.s32 %v1491_v20, %v1379_v58  ;;  %v1238_v23 = vsel %vm1206_vm2, 1, %v5635_v4  ;;  %v1575_v58 = vpop.permute.xlu0 %1574 }
 0x25c   : > { %v5361_v56 = vpop.f32.mrb[14].mxu0 }
 0x25d   : > { %v1710_v12 = vpop.permute.xlu1 %1709  ;;  %v2362_v30 = vpop.f32.mrb[15].mxu0 }
 0x25e   : > { %vm1744_vm11 = vcmp.eq.s32.totalorder %v3114_v17, %v1710_v12  ;;  %vm1745_vm12 = vcmp.eq.s32.totalorder %v3126_v24, %v1710_v12  ;;  %v1923_v12 = vsel %vm1891_vm7, 1, %v5635_v4 }
 0x25f   : > { %v1776_v44 = vsel %vm1744_vm11, 1, %v5635_v4  ;;  %v1777_v5 = vsel %vm1745_vm12, 1, %v5635_v4  ;;  %vm1204_vm11 = vcmp.eq.s32.totalorder %v3114_v17, %v5018_v29 }
 0x260   : > { %v1808_v1 = vadd.s32 %v1776_v44, %v1664_v48  ;;  %v1809_v62 = vadd.s32 %v1777_v5, %v1665_v7 }
 0x262   : > { %v1953_v32 = vadd.s32 %v1921_v25, %v1809_v62  ;;  %v5369_v46 = vpop.f32.mrb[16].mxu0  ;;  %v5371_v15 = vpop.permute.xlu1 %1283  ;;  %v1952_v40 = vadd.s32 %v1920_v41, %v1808_v1 }
 0x263   : > { %v2367_v43 = vpop.f32.mrb[17].mxu0  ;;  %vm1316_vm10 = vcmp.eq.s32.totalorder %v3114_v17, %v5371_v15  ;;  %vm1317_vm12 = vcmp.eq.s32.totalorder %v3126_v24, %v5371_v15  ;;  %v1237_v15 = vsel %vm1205_vm14, 1, %v5635_v4 }
 0x264   : > { %v1985_v8 = vcvt.s32.f32 %v1953_v32  ;;  %v1984_v9 = vcvt.s32.f32 %v1952_v40  ;;  %v2129_v10 = vpop.f32.mrb[0].mxu1 }
 0x265   : > { %v2326_v28 = vadd.f32 %v5302_v0, %v2129_v10  ;;  %v2131_v31 = vpop.f32.mrb[1].mxu1 }
 0x266   : > { %v5379_v21 = vpop.f32.mrb[18].mxu0  ;;  %2529 = vmatprep.mubr.msk.f32.mxu1 %vm2010_vm4, %v1985_v8  ;;  %v1349_v31 = vsel %vm1317_vm12, 1, %v5635_v4  ;;  %vm1607_vm12 = vcmp.eq.s32.totalorder %v3126_v24, %v1575_v58 }
 0x267   : > { %v2372_v39 = vpop.f32.mrb[19].mxu0  ;;  %v1569_v19 = vpop.permute.xlu1 %1568  ;;  %2188 = vmatmul.mubr.f32.gmra.mrb[24].mxu1 %v1984_v9  ;;  %2404 = vst [vmem:[%s5377_s19] sm:$0xff] %v2326_v28  ;;  %v1348_v9 = vsel %vm1316_vm10, 1, %v5635_v4  ;;  %v1236_v28 = vsel %vm1204_vm11, 1, %v5635_v4  ;;  %v1381_v3 = vadd.s32 %v1349_v31, %v1237_v15  ;;  %vm1606_vm11 = vcmp.eq.s32.totalorder %v3114_v17, %v1575_v58 }
 0x268   : > { %vm1602_vm3 = vcmp.eq.s32.totalorder %v3114_v17, %v1569_v19  ;;  %vm1603_vm5 = vcmp.eq.s32.totalorder %v3126_v24, %v1569_v19  ;;  %v1380_v29 = vadd.s32 %v1348_v9, %v1236_v28 }
 0x269   : > { %v1634_v35 = vsel %vm1602_vm3, 1, %v5635_v4  ;;  %v1635_v50 = vsel %vm1603_vm5, 1, %v5635_v4  ;;  %vm1207_vm3 = vcmp.eq.s32.totalorder %v3126_v24, %v5023_v16 }
 0x26a   : > { %v1666_v26 = vadd.s32 %v1634_v35, %v1522_v63  ;;  %v1667_v57 = vadd.s32 %v1635_v50, %v1523_v13  ;;  %v1239_v47 = vsel %vm1207_vm3, 1, %v5635_v4 }
 0x26c   : > { %v5396_v0 = vpop.f32.mrb[20].mxu0  ;;  %v5402_v2 = vpop.permute.xlu1 %1427 }
 0x26d   : > { %v2377_v37 = vpop.f32.mrb[21].mxu0  ;;  %vm1460_vm13 = vcmp.eq.s32.totalorder %v3114_v17, %v5402_v2  ;;  %vm1461_vm0 = vcmp.eq.s32.totalorder %v3126_v24, %v5402_v2 }
 0x26e   : > { %v1492_v39 = vsel %vm1460_vm13, 1, %v5635_v4  ;;  %v1493_v19 = vsel %vm1461_vm0, 1, %v5635_v4 }
 0x26f   : > { %v1524_v60 = vadd.s32 %v1492_v39, %v1380_v29  ;;  %v1525_v27 = vadd.s32 %v1493_v19, %v1381_v3 }
 0x270   : > { %v5408_v34 = vpop.f32.mrb[22].mxu0 }
 0x271   : > { %v2382_v61 = vpop.f32.mrb[23].mxu0  ;;  %v1713_v38 = vpop.permute.xlu1 %1712 }
 0x272   : > { %vm1746_vm8 = vcmp.eq.s32.totalorder %v3114_v17, %v1713_v38  ;;  %vm1747_vm9 = vcmp.eq.s32.totalorder %v3126_v24, %v1713_v38 }
 0x273   : > { %v1778_v22 = vsel %vm1746_vm8, 1, %v5635_v4  ;;  %v1779_v54 = vsel %vm1747_vm9, 1, %v5635_v4 }
 0x274   : > { %v5414_v33 = vpop.f32.mrb[24].mxu0  ;;  %v1810_v18 = vadd.s32 %v1778_v22, %v1666_v26  ;;  %v1811_v49 = vadd.s32 %v1779_v54, %v1667_v57  ;;  %v2134_v11 = vpop.f32.mrb[2].mxu1 }
 0x275   : > { %v2387_v59 = vpop.f32.mrb[25].mxu0  ;;  %v2331_v48 = vadd.f32 %v5312_v53, %v2134_v11  ;;  %v2136_v7 = vpop.f32.mrb[3].mxu1 }
 0x276   : > { %v1955_v30 = vadd.s32 %v1923_v12, %v1811_v49  ;;  %v1287_v5 = vpop.permute.xlu1 %1286  ;;  %v1954_v1 = vadd.s32 %v1922_v14, %v1810_v18  ;;  %v1863_v11 = vpop.permute.xlu0 %1862  ;;  %v1638_v7 = vsel %vm1606_vm11, 1, %v5635_v4 }
 0x277   : > { %2405 = vst [vmem:[%s5377_s19 + $0x8] sm:$0xff] %v2331_v48  ;;  %vm1318_vm5 = vcmp.eq.s32.totalorder %v3114_v17, %v1287_v5  ;;  %vm1319_vm6 = vcmp.eq.s32.totalorder %v3126_v24, %v1287_v5  ;;  %vm1894_vm0 = vcmp.eq.s32.totalorder %v3114_v17, %v1863_v11 }
 0x278   : > { %v5423_v44 = vpop.f32.mrb[26].mxu0  ;;  %v1987_v41 = vcvt.s32.f32 %v1955_v30  ;;  %v1986_v25 = vcvt.s32.f32 %v1954_v1  ;;  %v1350_v20 = vsel %vm1318_vm5, 1, %v5635_v4  ;;  %v1351_v45 = vsel %vm1319_vm6, 1, %v5635_v4 }
 0x279   : > { %v2392_v62 = vpop.f32.mrb[27].mxu0  ;;  %v1382_v22 = vadd.s32 %v1350_v20, %v1238_v23  ;;  %v1383_v54 = vadd.s32 %v1351_v45, %v1239_v47  ;;  %v1639_v30 = vsel %vm1607_vm12, 1, %v5635_v4 }
 0x27a   : > { %2530 = vmatprep.mubr.msk.f32.mxu1 %vm2010_vm4, %v1987_v41 }
 0x27b   : > { %v1572_v43 = vpop.permute.xlu1 %1571  ;;  %2193 = vmatmul.mubr.f32.gmra.mrb[26].mxu1 %v1986_v25 }
 0x27c   : > { %v5426_v32 = vpop.f32.mrb[28].mxu0  ;;  %vm1604_vm15 = vcmp.eq.s32.totalorder %v3114_v17, %v1572_v43  ;;  %vm1605_vm1 = vcmp.eq.s32.totalorder %v3126_v24, %v1572_v43 }
 0x27d   : > { %v2397_v40 = vpop.f32.mrb[29].mxu0  ;;  %v1636_v37 = vsel %vm1604_vm15, 1, %v5635_v4  ;;  %v1637_v2 = vsel %vm1605_vm1, 1, %v5635_v4  ;;  %vm1895_vm15 = vcmp.eq.s32.totalorder %v3126_v24, %v1863_v11 }
 0x27e   : > { %v1668_v35 = vadd.s32 %v1636_v37, %v1524_v60  ;;  %v1669_v13 = vadd.s32 %v1637_v2, %v1525_v27  ;;  %v1927_v28 = vsel %vm1895_vm15, 1, %v5635_v4 }
 0x280   : > { %v5433_v53 = vpop.f32.mrb[30].mxu0  ;;  %v1431_v10 = vpop.permute.xlu1 %1430 }
 0x281   : > { %v2402_v8 = vpop.f32.mrb[31].mxu0  ;;  %vm1462_vm7 = vcmp.eq.s32.totalorder %v3114_v17, %v1431_v10  ;;  %vm1463_vm8 = vcmp.eq.s32.totalorder %v3126_v24, %v1431_v10  ;;  %v1926_v10 = vsel %vm1894_vm0, 1, %v5635_v4 }
 0x282   : > { %v1494_v38 = vsel %vm1462_vm7, 1, %v5635_v4  ;;  %v1495_v26 = vsel %vm1463_vm8, 1, %v5635_v4 }
 0x283   : > { %v1526_v14 = vadd.s32 %v1494_v38, %v1382_v22  ;;  %v1527_v12 = vadd.s32 %v1495_v26, %v1383_v54 }
 0x285   : > { %v1716_v42 = vpop.permute.xlu1 %1715  ;;  %v1670_v40 = vadd.s32 %v1638_v7, %v1526_v14  ;;  %v1671_v43 = vadd.s32 %v1639_v30, %v1527_v12 }
 0x286   : > { %vm1748_vm9 = vcmp.eq.s32.totalorder %v3114_v17, %v1716_v42  ;;  %vm1749_vm10 = vcmp.eq.s32.totalorder %v3126_v24, %v1716_v42 }
 0x287   : > { %v1780_v50 = vsel %vm1748_vm9, 1, %v5635_v4  ;;  %v1781_v61 = vsel %vm1749_vm10, 1, %v5635_v4  ;;  %v2139_v63 = vpop.f32.mrb[4].mxu1 }
 0x288   : > { %v2336_v57 = vadd.f32 %v5318_v6, %v2139_v63  ;;  %v2141_v59 = vpop.f32.mrb[5].mxu1  ;;  %v1812_v18 = vadd.s32 %v1780_v50, %v1668_v35  ;;  %v1813_v49 = vadd.s32 %v1781_v61, %v1669_v13 }
 0x28a   : > { %v1860_v16 = vpop.permute.xlu1 %1859  ;;  %2406 = vst [vmem:[%s5377_s19 + $0x10] sm:$0xff] %v2336_v57 }
 0x28b   : > { %vm1892_vm13 = vcmp.eq.s32.totalorder %v3114_v17, %v1860_v16  ;;  %vm1893_vm14 = vcmp.eq.s32.totalorder %v3126_v24, %v1860_v16 }
 0x28c   : > { %v1924_v6 = vsel %vm1892_vm13, 1, %v5635_v4  ;;  %v1925_v48 = vsel %vm1893_vm14, 1, %v5635_v4 }
 0x28d   : > { %v1956_v5 = vadd.s32 %v1924_v6, %v1812_v18  ;;  %v1957_v1 = vadd.s32 %v1925_v48, %v1813_v49 }
 0x28f   : > { %v1989_v62 = vcvt.s32.f32 %v1957_v1  ;;  %v1719_v41 = vpop.permute.xlu1 %1718  ;;  %v1988_v25 = vcvt.s32.f32 %v1956_v5 }
 0x290   : > { %vm1750_vm1 = vcmp.eq.s32.totalorder %v3114_v17, %v1719_v41  ;;  %vm1751_vm2 = vcmp.eq.s32.totalorder %v3126_v24, %v1719_v41 }
 0x291   : > { %v1782_v8 = vsel %vm1750_vm1, 1, %v5635_v4  ;;  %v1783_v9 = vsel %vm1751_vm2, 1, %v5635_v4  ;;  %2531 = vmatprep.mubr.msk.f32.mxu1 %vm2010_vm4, %v1989_v62 }
 0x292   : > { %v1814_v31 = vadd.s32 %v1782_v8, %v1670_v40  ;;  %v1815_v39 = vadd.s32 %v1783_v9, %v1671_v43  ;;  %2198 = vmatmul.mubr.f32.gmra.mrb[28].mxu1 %v1988_v25 }
 0x294   : > { %v1958_v15 = vadd.s32 %v1926_v10, %v1814_v31  ;;  %v1959_v29 = vadd.s32 %v1927_v28, %v1815_v39 }
 0x296   : > { %v1990_v17 = vcvt.s32.f32 %v1958_v15  ;;  %v1991_v24 = vcvt.s32.f32 %v1959_v29  ;;  %v2144_v19 = vpop.f32.mrb[6].mxu1 }
 0x297   : > { %v2341_v3 = vadd.f32 %v5326_v55, %v2144_v19  ;;  %v2146_v60 = vpop.f32.mrb[7].mxu1 }
 0x298   : > { %2532 = vmatprep.mubr.msk.f32.mxu1 %vm2010_vm4, %v1991_v24 }
 0x299   : > { %2203 = vmatmul.mubr.f32.gmra.mrb[30].mxu1 %v1990_v17  ;;  %2407 = vst [vmem:[%s5377_s19 + $0x18] sm:$0xff] %v2341_v3 }
 0x2a5   : > { %v2149_v4 = vpop.f32.mrb[8].mxu1 }
 0x2a6   : > { %v2346_v37 = vadd.f32 %v5330_v36, %v2149_v4  ;;  %v2151_v2 = vpop.f32.mrb[9].mxu1 }
 0x2a8   : > { %2408 = vst [vmem:[%s5377_s19 + $0x20] sm:$0xff] %v2346_v37 }
 0x2a9   : > { %v2154_v42 = vpop.f32.mrb[10].mxu1 }
 0x2aa   : > { %v2351_v23 = vadd.f32 %v5343_v52, %v2154_v42  ;;  %v2156_v27 = vpop.f32.mrb[11].mxu1 }
 0x2ac   : > { %2409 = vst [vmem:[%s5377_s19 + $0x28] sm:$0xff] %v2351_v23 }
 0x2c0   : > { %v2159_v55 = vpop.f32.mrb[12].mxu1 }
 0x2c1   : > { %v2356_v20 = vadd.f32 %v5355_v51, %v2159_v55  ;;  %v2161_v45 = vpop.f32.mrb[13].mxu1 }
 0x2c3   : > { %2410 = vst [vmem:[%s5377_s19 + $0x30] sm:$0xff] %v2356_v20 }
 0x2d4   : > { %v2164_v58 = vpop.f32.mrb[14].mxu1 }
 0x2d5   : > { %v2361_v47 = vadd.f32 %v5361_v56, %v2164_v58  ;;  %v2166_v35 = vpop.f32.mrb[15].mxu1 }
 0x2d7   : > { %2411 = vst [vmem:[%s5377_s19 + $0x38] sm:$0xff] %v2361_v47 }
 0x2e8   : > { %v2169_v36 = vpop.f32.mrb[16].mxu1 }
 0x2e9   : > { %v2366_v50 = vadd.f32 %v5369_v46, %v2169_v36  ;;  %v2171_v61 = vpop.f32.mrb[17].mxu1 }
 0x2eb   : > { %2412 = vst [vmem:[%s5377_s19 + $0x40] sm:$0xff] %v2366_v50 }
 0x2fe   : > { %v2174_v52 = vpop.f32.mrb[18].mxu1 }
 0x2ff   : > { %v2371_v63 = vadd.f32 %v5379_v21, %v2174_v52  ;;  %v2176_v13 = vpop.f32.mrb[19].mxu1 }
 0x301   : > { %2413 = vst [vmem:[%s5377_s19 + $0x48] sm:$0xff] %v2371_v63 }
 0x312   : > { %v2179_v51 = vpop.f32.mrb[20].mxu1 }
 0x313   : > { %v2376_v38 = vadd.f32 %v5396_v0, %v2179_v51  ;;  %v2181_v26 = vpop.f32.mrb[21].mxu1 }
 0x315   : > { %2414 = vst [vmem:[%s5377_s19 + $0x50] sm:$0xff] %v2376_v38 }
 0x326   : > { %v2184_v56 = vpop.f32.mrb[22].mxu1 }
 0x327   : > { %v2381_v57 = vadd.f32 %v5408_v34, %v2184_v56  ;;  %v2186_v59 = vpop.f32.mrb[23].mxu1 }
 0x329   : > { %2415 = vst [vmem:[%s5377_s19 + $0x58] sm:$0xff] %v2381_v57 }
 0x33a   : > { %v2189_v46 = vpop.f32.mrb[24].mxu1 }
 0x33b   : > { %v2386_v22 = vadd.f32 %v5414_v33, %v2189_v46  ;;  %v2191_v54 = vpop.f32.mrb[25].mxu1 }
 0x33d   : > { %2416 = vst [vmem:[%s5377_s19 + $0x60] sm:$0xff] %v2386_v22 }
 0x34e   : > { %v2194_v21 = vpop.f32.mrb[26].mxu1 }
 0x34f   : > { %v2391_v16 = vadd.f32 %v5423_v44, %v2194_v21  ;;  %v2196_v18 = vpop.f32.mrb[27].mxu1 }
 0x351   : > { %2417 = vst [vmem:[%s5377_s19 + $0x68] sm:$0xff] %v2391_v16 }
 0x365   : > { %v2199_v0 = vpop.f32.mrb[28].mxu1 }
 0x366   : > { %v2396_v49 = vadd.f32 %v5426_v32, %v2199_v0  ;;  %v2201_v11 = vpop.f32.mrb[29].mxu1 }
 0x368   : > { %2418 = vst [vmem:[%s5377_s19 + $0x70] sm:$0xff] %v2396_v49 }
 0x36c   : > { %v2204_v14 = vpop.f32.mrb[30].mxu1 }
 0x36d   : > { %v2401_v34 = vadd.f32 %v5433_v53, %v2204_v14  ;;  %v2206_v12 = vpop.f32.mrb[31].mxu1 }
 0x36f   : > { %2419 = vst [vmem:[%s5377_s19 + $0x78] sm:$0xff] %v2401_v34 }
 0x370 PF: > { %s13_s12 = sadd.s32 1, %s2721_s12  }
 0x371   : > { %p10_p4 = scmp.ge.s32.totalorder %s13_s12, 6  }
 0x373   :  { %12 = sbr.rel (!%p10_p4) target bundleno = 1 (0x1), region = 66 }

</bundles_post_ra>
